<compile_context>
chip_gen: v7x
topology: tpu7x:2x2x1
jax: 0.10.0
libtpu: 0.0.40
codegen_flags: <defaults>
</compile_context>

<pallas_src>
import functools

import jax
import jax.numpy as jnp
import numpy as np
from jax import lax
from jax.experimental import pallas as pl
from jax.experimental.pallas import tpu as pltpu


def _round_up(n, m):
    return ((n + m - 1) // m) * m


# --------------------------------- fused ResnetBlock kernel --------------------------------- #
def _fused_kernel(x_ref, t_ref, mw_ref, mb_ref,
                  w1_ref, b1_ref, g1_ref, be1_ref,
                  w2_ref, b2_ref, g2_ref, be2_ref,
                  rw_ref, rb_ref, gmat_ref,
                  o_ref,
                  xpad_ref, hpad_ref,
                  *, H, W, Cin, Cout, eps_gn, compute_dtype):
    cdt = compute_dtype
    silu = lambda v: v * jax.nn.sigmoid(v)                               # sigmoid on EUP

    def zero_halo(pad_ref):
        # The interior is fully overwritten every grid step; only the 1-pixel halo must be
        # zero.  Zeroing just the halo is O(perimeter*C) stores and is correct under any
        # megacore grid split (no program_id==0 fill-once invariant required).
        Hp, Wp, C = pad_ref.shape
        pad_ref[0:1, :, :] = jnp.zeros((1, Wp, C), pad_ref.dtype)
        pad_ref[Hp - 1:Hp, :, :] = jnp.zeros((1, Wp, C), pad_ref.dtype)
        pad_ref[:, 0:1, :] = jnp.zeros((Hp, 1, C), pad_ref.dtype)
        pad_ref[:, Wp - 1:Wp, :] = jnp.zeros((Hp, 1, C), pad_ref.dtype)

    def conv3x3(pad_ref, w_ref, bias, C):
        # 3x3 conv as 9 accumulated K=C MXU dots over shifted windows of the zero-halo
        # scratch: no im2col slab, no K padded with zeros, no scatter stores.
        acc = jnp.zeros((H * W, Cout), jnp.float32)
        for kh in range(3):
            for kw in range(3):
                j = kh * 3 + kw
                win = pad_ref[kh:kh + H, kw:kw + W, :].reshape(H * W, C)
                acc = acc + jnp.dot(win, w_ref[j * C:(j + 1) * C, :],
                                    preferred_element_type=jnp.float32)
        return acc + bias

    gmat = gmat_ref[...]                                                 # (Cout, Cout)

    def group_norm(acc, gamma, beta):
        # Two-pass GroupNorm: group mean first, then centered variance
        # (no E[x^2]-E[x]^2 cancellation).
        s1 = jnp.sum(acc, axis=0, keepdims=True)                         # (1, Cout)
        gmean = jnp.dot(s1, gmat, preferred_element_type=jnp.float32)    # per-group mean
        cen = acc - gmean
        s2 = jnp.sum(cen * cen, axis=0, keepdims=True)
        gvar = jnp.dot(s2, gmat, preferred_element_type=jnp.float32)
        inv = lax.rsqrt(gvar + eps_gn)                                   # EUP
        return cen * (inv * gamma) + beta

    # ---- time-emb MLP prologue (SiLU -> Linear), folded in: no separate launch ----
    t = silu(t_ref[0].astype(jnp.float32))                               # (1, T)
    ss = jnp.dot(t, mw_ref[...], preferred_element_type=jnp.float32) + mb_ref[...]
    scale, shift = ss[:, :Cout], ss[:, Cout:]

    # ---- block1: WS-conv3x3 + GN + (scale+1, shift) + SiLU ----
    xv = x_ref[0]                                                        # (H, W, Cin), cdt
    zero_halo(xpad_ref)
    xpad_ref[1:H + 1, 1:W + 1, :] = xv
    y1 = group_norm(conv3x3(xpad_ref, w1_ref, b1_ref[...], Cin),
                    g1_ref[...], be1_ref[...])
    h = silu(y1 * (scale + 1.0) + shift)                                 # (H*W, Cout), f32

    # ---- block2: WS-conv3x3 + GN + SiLU; h never leaves VMEM ----
    zero_halo(hpad_ref)
    hpad_ref[1:H + 1, 1:W + 1, :] = h.reshape(H, W, Cout).astype(cdt)
    y2 = silu(group_norm(conv3x3(hpad_ref, w2_ref, b2_ref[...], Cout),
                         g2_ref[...], be2_ref[...]))

    # ---- residual 1x1 conv on the original x (identity case: rw = I, rb = 0) ----
    res = jnp.dot(xv.reshape(H * W, Cin), rw_ref[...],
                  preferred_element_type=jnp.float32) + rb_ref[...]

    # Channel-major store: (Cout, H*W) is lane-dense (H*W multiple of 128) even when
    # Cout < 128, and the result is already NCHW so the wrapper only reshapes.
    o_ref[0] = (y2 + res).T.astype(o_ref.dtype)


# ------------------------------- wrapper-side (grid-invariant) precompute ------------------------------- #
def _standardize_weight(wflat, eps):
    """Per-output-channel weight standardization; wflat: (9*Cin, Cout), rows = (kh, kw, ci)."""
    w = wflat.astype(jnp.float32)
    m = jnp.mean(w, axis=0, keepdims=True)
    v = jnp.mean((w - m) ** 2, axis=0, keepdims=True)                    # unbiased=False
    return (w - m) * lax.rsqrt(v + eps)


def _buf_bytes(shape, dtype):
    """Rough VMEM footprint of one buffer with (8, 128) layout padding."""
    s = (1,) * max(0, 2 - len(shape)) + tuple(int(d) for d in shape)
    lead = int(np.prod(s[:-2])) if len(s) > 2 else 1
    return lead * _round_up(s[-2], 8) * _round_up(s[-1], 128) * np.dtype(dtype).itemsize


def resnet_block_forward(x_nchw, time_emb, params, groups=8, compute_dtype=jnp.float32):
    B, Cin, H, W = x_nchw.shape
    T = time_emb.shape[1]
    Cout = params["w1"].shape[1]
    eps_ws = 1e-5 if x_nchw.dtype == jnp.float32 else 1e-3
    eps_gn = 1e-5
    cdt = compute_dtype

    # NHWC activations kept in the MXU operand dtype in HBM (halves DMA on the bf16 path).
    # NOTE: kernel assumes W % 8 == 0 and (H*W) % 128 == 0 for clean reshapes / lane-dense output.
    x = jnp.transpose(x_nchw, (0, 2, 3, 1)).astype(cdt)
    t3 = time_emb.reshape(B, 1, T).astype(jnp.float32)

    # Weight standardization hoisted out of the grid (grid-invariant, done once).
    w1 = _standardize_weight(params["w1"], eps_ws).astype(cdt)           # (9*Cin, Cout)
    w2 = _standardize_weight(params["w2"], eps_ws).astype(cdt)           # (9*Cout, Cout)
    rw = params["rw"].astype(cdt)                                        # (Cin, Cout)

    # GroupNorm group-average matrix: built once, DMA'd once (constant index_map).
    cpg = Cout // groups
    gidx = jnp.arange(Cout) // cpg
    gmat = jnp.where(gidx[:, None] == gidx[None, :],
                     1.0 / float(H * W * cpg), 0.0).astype(jnp.float32)

    row = lambda v: v.reshape(1, -1).astype(jnp.float32)

    # vmem limit derived from the actual buffers (double-buffered pipeline blocks + scratch
    # + f32 intermediate headroom) instead of a fixed constant.
    est = (2 * _buf_bytes((1, H, W, Cin), cdt)
           + 2 * _buf_bytes((1, Cout, H * W), np.float32)
           + 2 * (_buf_bytes((9 * Cin, Cout), cdt) + _buf_bytes((9 * Cout, Cout), cdt)
                  + _buf_bytes((Cin, Cout), cdt) + _buf_bytes((Cout, Cout), np.float32)
                  + _buf_bytes((T, 2 * Cout), np.float32))
           + 2 * 10 * _buf_bytes((1, 2 * Cout), np.float32)
           + _buf_bytes((H + 2, W + 2, Cin), cdt) + _buf_bytes((H + 2, W + 2, Cout), cdt)
           + 8 * _buf_bytes((H * W, Cout), np.float32))
    vmem_limit = int(min(64 << 20, max(32 << 20, 2 * est)))

    kern = functools.partial(_fused_kernel, H=H, W=W, Cin=Cin, Cout=Cout,
                             eps_gn=eps_gn, compute_dtype=cdt)

    const = lambda b: (0, 0)                                             # grid-invariant inputs

    out = pl.pallas_call(
        kern,
        out_shape=jax.ShapeDtypeStruct((B, Cout, H * W), jnp.float32),
        grid=(B,),
        in_specs=[
            pl.BlockSpec((1, H, W, Cin), lambda b: (b, 0, 0, 0)),        # x (NHWC, unpadded)
            pl.BlockSpec((1, 1, T), lambda b: (b, 0, 0)),                # time_emb row
            pl.BlockSpec((T, 2 * Cout), const),                          # mlp weight
            pl.BlockSpec((1, 2 * Cout), const),                          # mlp bias
            pl.BlockSpec((9 * Cin, Cout), const),                        # w1 (standardized)
            pl.BlockSpec((1, Cout), const),                              # b1
            pl.BlockSpec((1, Cout), const),                              # gn1 gamma
            pl.BlockSpec((1, Cout), const),                              # gn1 beta
            pl.BlockSpec((9 * Cout, Cout), const),                       # w2 (standardized)
            pl.BlockSpec((1, Cout), const),                              # b2
            pl.BlockSpec((1, Cout), const),                              # gn2 gamma
            pl.BlockSpec((1, Cout), const),                              # gn2 beta
            pl.BlockSpec((Cin, Cout), const),                            # res 1x1 conv weight
            pl.BlockSpec((1, Cout), const),                              # res 1x1 conv bias
            pl.BlockSpec((Cout, Cout), const),                           # GroupNorm avg matrix
        ],
        out_specs=pl.BlockSpec((1, Cout, H * W), lambda b: (b, 0, 0)),
        scratch_shapes=[
            pltpu.VMEM((H + 2, W + 2, Cin), cdt),                        # zero-halo x, conv1
            pltpu.VMEM((H + 2, W + 2, Cout), cdt),                       # zero-halo h, conv2
        ],
        compiler_params=pltpu.CompilerParams(
            dimension_semantics=("parallel",),
            vmem_limit_bytes=vmem_limit),
    )(x, t3, params["mlp_w"].astype(jnp.float32), row(params["mlp_b"]),
      w1, row(params["b1"]), row(params["gn1_g"]), row(params["gn1_b"]),
      w2, row(params["b2"]), row(params["gn2_g"]), row(params["gn2_b"]),
      rw, row(params["rb"]), gmat)

    return out.reshape(B, Cout, H, W)            # already channel-major: NCHW, just a reshape


# -------------------------- pure-JAX reference (for checking) -------------------------- #
def ref_forward(x_nchw, t, params, groups=8):
    x = jnp.transpose(x_nchw, (0, 2, 3, 1)).astype(jnp.float32)
    B, H, W, Cin = x.shape
    Cout = params["w1"].shape[1]
    cpg = Cout // groups
    eps_ws = 1e-5 if x_nchw.dtype == jnp.float32 else 1e-3

    silu = lambda v: v * jax.nn.sigmoid(v)

    t2 = silu(t.astype(jnp.float32)) @ params["mlp_w"] + params["mlp_b"]
    scale, shift = t2[:, :Cout], t2[:, Cout:]

    def ws_conv(xin, wflat, bias):
        Ci = xin.shape[-1]
        w = wflat.reshape(3, 3, Ci, Cout)
        m = jnp.mean(w, axis=(0, 1, 2), keepdims=True)
        v = jnp.mean((w - m) ** 2, axis=(0, 1, 2), keepdims=True)
        wn = (w - m) * lax.rsqrt(v + eps_ws)
        y = lax.conv_general_dilated(xin, wn, (1, 1), ((1, 1), (1, 1)),
                                     dimension_numbers=("NHWC", "HWIO", "NHWC"))
        return y + bias

    def gnorm(y, gamma, beta):
        yg = y.reshape(B, H, W, groups, cpg)
        m = jnp.mean(yg, axis=(1, 2, 4), keepdims=True)
        v = jnp.mean((yg - m) ** 2, axis=(1, 2, 4), keepdims=True)
        yn = (yg - m) * lax.rsqrt(v + 1e-5)
        return yn.reshape(B, H, W, Cout) * gamma + beta

    h = ws_conv(x, params["w1"], params["b1"])
    h = gnorm(h, params["gn1_g"], params["gn1_b"])
    h = h * (scale[:, None, None, :] + 1.0) + shift[:, None, None, :]
    h = silu(h)
    h = ws_conv(h, params["w2"], params["b2"])
    h = gnorm(h, params["gn2_g"], params["gn2_b"])
    h = silu(h)
    res = jnp.einsum("bhwc,cd->bhwd", x, params["rw"]) + params["rb"]
    return jnp.transpose(h + res, (0, 3, 1, 2))


# ----------------------------------- params ----------------------------------- #
def init_params(key, dim, dim_out, time_emb_dim):
    ks = jax.random.split(key, 8)
    n = lambda k, s, sc=0.1: (sc * jax.random.normal(k, s)).astype(jnp.float32)
    return {
        "mlp_w": n(ks[0], (time_emb_dim, 2 * dim_out)),
        "mlp_b": n(ks[1], (2 * dim_out,)),
        "w1": n(ks[2], (9 * dim, dim_out)),           # rows = (kh, kw, ci) flattened
        "b1": n(ks[3], (dim_out,)),
        "gn1_g": jnp.ones((dim_out,), jnp.float32),
        "gn1_b": jnp.zeros((dim_out,), jnp.float32),
        "w2": n(ks[4], (9 * dim_out, dim_out)),
        "b2": n(ks[5], (dim_out,)),
        "gn2_g": jnp.ones((dim_out,), jnp.float32),
        "gn2_b": jnp.zeros((dim_out,), jnp.float32),
        # res_conv (1x1). If dim == dim_out the PyTorch module uses Identity,
        # which corresponds to rw = I, rb = 0.
        "rw": n(ks[6], (dim, dim_out)),
        "rb": n(ks[7], (dim_out,)),
    }


if __name__ == "__main__":
    B, dim, dim_out, H, W = 2, 4, 16, 16, 16
    time_emb_dim, groups = 32, 8

    key = jax.random.PRNGKey(0)
    kx, kt, kp = jax.random.split(key, 3)
    x = jax.random.normal(kx, (B, dim, H, W), jnp.float32)               # NCHW like PyTorch
    time_emb = jax.random.normal(kt, (B, time_emb_dim), jnp.float32)
    params = init_params(kp, dim, dim_out, time_emb_dim)

    ref = jax.block_until_ready(ref_forward(x, time_emb, params, groups=groups))

    # f32 MXU-operand path: tight check
    out = jax.block_until_ready(
        resnet_block_forward(x, time_emb, params, groups=groups, compute_dtype=jnp.float32))
    assert out.shape == (B, dim_out, H, W)
    np.testing.assert_allclose(np.asarray(out), np.asarray(ref), rtol=2e-3, atol=2e-3)

    # bf16 MXU-operand path (f32 accumulation): loose check
    out_bf16 = jax.block_until_ready(
        resnet_block_forward(x, time_emb, params, groups=groups, compute_dtype=jnp.bfloat16))
    np.testing.assert_allclose(np.asarray(out_bf16), np.asarray(ref), rtol=1e-1, atol=1e-1)

    print("KERNEL_OK")
</pallas_src>

<mosaic_0001>
module attributes {stable_mosaic.version = 11 : i64} {
  func.func @_fused_kernel(%arg0: i32, %arg1: memref<1x16x16x4xf32, #tpu.memory_space<vmem>>, %arg2: memref<1x1x32xf32, #tpu.memory_space<vmem>>, %arg3: memref<32x32xf32, #tpu.memory_space<vmem>>, %arg4: memref<1x32xf32, #tpu.memory_space<vmem>>, %arg5: memref<36x16xf32, #tpu.memory_space<vmem>>, %arg6: memref<1x16xf32, #tpu.memory_space<vmem>>, %arg7: memref<1x16xf32, #tpu.memory_space<vmem>>, %arg8: memref<1x16xf32, #tpu.memory_space<vmem>>, %arg9: memref<144x16xf32, #tpu.memory_space<vmem>>, %arg10: memref<1x16xf32, #tpu.memory_space<vmem>>, %arg11: memref<1x16xf32, #tpu.memory_space<vmem>>, %arg12: memref<1x16xf32, #tpu.memory_space<vmem>>, %arg13: memref<4x16xf32, #tpu.memory_space<vmem>>, %arg14: memref<1x16xf32, #tpu.memory_space<vmem>>, %arg15: memref<16x16xf32, #tpu.memory_space<vmem>>, %arg16: memref<1x16x256xf32, #tpu.memory_space<vmem>>, %arg17: memref<18x18x4xf32, #tpu.memory_space<vmem>>, %arg18: memref<18x18x16xf32, #tpu.memory_space<vmem>>) attributes {dimension_semantics = [#tpu.dimension_semantics<parallel>], iteration_bounds = array<i64: 2>, scalar_prefetch = 0 : i64, scratch_operands = 2 : i64, tpu.core_type = #tpu.core_type<tc>, window_params = [{transform_indices = @transform_0, window_bounds = array<i64: 1, 16, 16, 4>}, {transform_indices = @transform_1, window_bounds = array<i64: 1, 1, 32>}, {pipeline_mode = #tpu.pipeline_mode<synchronous>, transform_indices = @transform_2, window_bounds = array<i64: 32, 32>}, {pipeline_mode = #tpu.pipeline_mode<synchronous>, transform_indices = @transform_3, window_bounds = array<i64: 1, 32>}, {pipeline_mode = #tpu.pipeline_mode<synchronous>, transform_indices = @transform_4, window_bounds = array<i64: 36, 16>}, {pipeline_mode = #tpu.pipeline_mode<synchronous>, transform_indices = @transform_5, window_bounds = array<i64: 1, 16>}, {pipeline_mode = #tpu.pipeline_mode<synchronous>, transform_indices = @transform_6, window_bounds = array<i64: 1, 16>}, {pipeline_mode = #tpu.pipeline_mode<synchronous>, transform_indices = @transform_7, window_bounds = array<i64: 1, 16>}, {pipeline_mode = #tpu.pipeline_mode<synchronous>, transform_indices = @transform_8, window_bounds = array<i64: 144, 16>}, {pipeline_mode = #tpu.pipeline_mode<synchronous>, transform_indices = @transform_9, window_bounds = array<i64: 1, 16>}, {pipeline_mode = #tpu.pipeline_mode<synchronous>, transform_indices = @transform_10, window_bounds = array<i64: 1, 16>}, {pipeline_mode = #tpu.pipeline_mode<synchronous>, transform_indices = @transform_11, window_bounds = array<i64: 1, 16>}, {pipeline_mode = #tpu.pipeline_mode<synchronous>, transform_indices = @transform_12, window_bounds = array<i64: 4, 16>}, {pipeline_mode = #tpu.pipeline_mode<synchronous>, transform_indices = @transform_13, window_bounds = array<i64: 1, 16>}, {pipeline_mode = #tpu.pipeline_mode<synchronous>, transform_indices = @transform_14, window_bounds = array<i64: 16, 16>}, {transform_indices = @transform_15, window_bounds = array<i64: 1, 16, 256>}]} {
    %c0 = arith.constant 0 : index
    %c0_0 = arith.constant 0 : index
    %0 = vector.load %arg15[%c0, %c0_0] : memref<16x16xf32, #tpu.memory_space<vmem>>, vector<16x16xf32>
    %c0_1 = arith.constant 0 : index
    %c0_2 = arith.constant 0 : index
    %c0_3 = arith.constant 0 : index
    %1 = vector.load %arg2[%c0_1, %c0_2, %c0_3] : memref<1x1x32xf32, #tpu.memory_space<vmem>>, vector<1x1x32xf32>
    %2 = vector.shape_cast %1 : vector<1x1x32xf32> to vector<1x32xf32>
    %3 = arith.negf %2 : vector<1x32xf32>
    %4 = math.exp %3 : vector<1x32xf32>
    %cst = arith.constant 1.000000e+00 : f32
    %5 = vector.broadcast %cst : f32 to vector<1x32xf32>
    %6 = arith.addf %5, %4 : vector<1x32xf32>
    %7 = arith.divf %5, %6 : vector<1x32xf32>
    %8 = arith.mulf %2, %7 : vector<1x32xf32>
    %c0_4 = arith.constant 0 : index
    %c0_5 = arith.constant 0 : index
    %9 = vector.load %arg3[%c0_4, %c0_5] : memref<32x32xf32, #tpu.memory_space<vmem>>, vector<32x32xf32>
    %cst_6 = arith.constant dense<0.000000e+00> : vector<1x32xf32>
    %10 = tpu.matmul %8, %9, %cst_6 {dimension_numbers = #tpu.dot_dimension_numbers<[1], [0], [0], [1], [0, 0, 1, 1], [], []>} : vector<1x32xf32>, vector<32x32xf32>, vector<1x32xf32> -> vector<1x32xf32>
    %c0_7 = arith.constant 0 : index
    %c0_8 = arith.constant 0 : index
    %11 = vector.load %arg4[%c0_7, %c0_8] : memref<1x32xf32, #tpu.memory_space<vmem>>, vector<1x32xf32>
    %12 = arith.addf %10, %11 : vector<1x32xf32>
    %13 = vector.extract_strided_slice %12 {offsets = [0, 0], sizes = [1, 16], strides = [1, 1]} : vector<1x32xf32> to vector<1x16xf32>
    %14 = vector.extract_strided_slice %12 {offsets = [0, 16], sizes = [1, 16], strides = [1, 1]} : vector<1x32xf32> to vector<1x16xf32>
    %c0_9 = arith.constant 0 : index
    %c0_10 = arith.constant 0 : index
    %c0_11 = arith.constant 0 : index
    %c0_12 = arith.constant 0 : index
    %15 = vector.load %arg1[%c0_9, %c0_10, %c0_11, %c0_12] : memref<1x16x16x4xf32, #tpu.memory_space<vmem>>, vector<1x16x16x4xf32>
    %16 = vector.shape_cast %15 : vector<1x16x16x4xf32> to vector<16x16x4xf32>
    %cst_13 = arith.constant 0.000000e+00 : f32
    %17 = vector.broadcast %cst_13 : f32 to vector<1x18x4xf32>
    %c0_14 = arith.constant 0 : index
    %c0_15 = arith.constant 0 : index
    %c0_16 = arith.constant 0 : index
    %18 = vector.load %arg17[%c0_14, %c0_15, %c0_16] : memref<18x18x4xf32, #tpu.memory_space<vmem>>, vector<1x18x4xf32>
    tpu.vector_store %arg17[%c0_14, %c0_15, %c0_16], %17 {strides = array<i32>} : memref<18x18x4xf32, #tpu.memory_space<vmem>>, vector<1x18x4xf32>,
    %cst_17 = arith.constant 0.000000e+00 : f32
    %19 = vector.broadcast %cst_17 : f32 to vector<1x18x4xf32>
    %c17 = arith.constant 17 : index
    %c0_18 = arith.constant 0 : index
    %c0_19 = arith.constant 0 : index
    %20 = vector.load %arg17[%c17, %c0_18, %c0_19] : memref<18x18x4xf32, #tpu.memory_space<vmem>>, vector<1x18x4xf32>
    tpu.vector_store %arg17[%c17, %c0_18, %c0_19], %19 {strides = array<i32>} : memref<18x18x4xf32, #tpu.memory_space<vmem>>, vector<1x18x4xf32>,
    %cst_20 = arith.constant 0.000000e+00 : f32
    %21 = vector.broadcast %cst_20 : f32 to vector<18x1x4xf32>
    %c0_21 = arith.constant 0 : index
    %c0_22 = arith.constant 0 : index
    %c0_23 = arith.constant 0 : index
    %22 = vector.load %arg17[%c0_21, %c0_22, %c0_23] : memref<18x18x4xf32, #tpu.memory_space<vmem>>, vector<18x1x4xf32>
    tpu.vector_store %arg17[%c0_21, %c0_22, %c0_23], %21 {strides = array<i32>} : memref<18x18x4xf32, #tpu.memory_space<vmem>>, vector<18x1x4xf32>,
    %cst_24 = arith.constant 0.000000e+00 : f32
    %23 = vector.broadcast %cst_24 : f32 to vector<18x1x4xf32>
    %c0_25 = arith.constant 0 : index
    %c17_26 = arith.constant 17 : index
    %c0_27 = arith.constant 0 : index
    %24 = vector.load %arg17[%c0_25, %c17_26, %c0_27] : memref<18x18x4xf32, #tpu.memory_space<vmem>>, vector<18x1x4xf32>
    tpu.vector_store %arg17[%c0_25, %c17_26, %c0_27], %23 {strides = array<i32>} : memref<18x18x4xf32, #tpu.memory_space<vmem>>, vector<18x1x4xf32>,
    %c1 = arith.constant 1 : index
    %c1_28 = arith.constant 1 : index
    %c0_29 = arith.constant 0 : index
    %25 = vector.load %arg17[%c1, %c1_28, %c0_29] : memref<18x18x4xf32, #tpu.memory_space<vmem>>, vector<16x16x4xf32>
    tpu.vector_store %arg17[%c1, %c1_28, %c0_29], %16 {strides = array<i32>} : memref<18x18x4xf32, #tpu.memory_space<vmem>>, vector<16x16x4xf32>,
    %c0_30 = arith.constant 0 : index
    %c0_31 = arith.constant 0 : index
    %26 = vector.load %arg6[%c0_30, %c0_31] : memref<1x16xf32, #tpu.memory_space<vmem>>, vector<1x16xf32>
    %cst_32 = arith.constant 0.000000e+00 : f32
    %27 = vector.broadcast %cst_32 : f32 to vector<256x16xf32>
    %c0_33 = arith.constant 0 : index
    %c0_34 = arith.constant 0 : index
    %c0_35 = arith.constant 0 : index
    %28 = vector.load %arg17[%c0_33, %c0_34, %c0_35] : memref<18x18x4xf32, #tpu.memory_space<vmem>>, vector<16x16x4xf32>
    %29 = vector.shape_cast %28 : vector<16x16x4xf32> to vector<256x4xf32>
    %c0_36 = arith.constant 0 : index
    %c0_37 = arith.constant 0 : index
    %30 = vector.load %arg5[%c0_36, %c0_37] : memref<36x16xf32, #tpu.memory_space<vmem>>, vector<4x16xf32>
    %cst_38 = arith.constant dense<0.000000e+00> : vector<256x16xf32>
    %31 = tpu.matmul %29, %30, %cst_38 {dimension_numbers = #tpu.dot_dimension_numbers<[1], [0], [0], [1], [0, 0, 1, 1], [], []>} : vector<256x4xf32>, vector<4x16xf32>, vector<256x16xf32> -> vector<256x16xf32>
    %32 = arith.addf %27, %31 : vector<256x16xf32>
    %c0_39 = arith.constant 0 : index
    %c1_40 = arith.constant 1 : index
    %c0_41 = arith.constant 0 : index
    %33 = vector.load %arg17[%c0_39, %c1_40, %c0_41] : memref<18x18x4xf32, #tpu.memory_space<vmem>>, vector<16x16x4xf32>
    %34 = vector.shape_cast %33 : vector<16x16x4xf32> to vector<256x4xf32>
    %c4 = arith.constant 4 : index
    %c0_42 = arith.constant 0 : index
    %35 = vector.load %arg5[%c4, %c0_42] : memref<36x16xf32, #tpu.memory_space<vmem>>, vector<4x16xf32>
    %cst_43 = arith.constant dense<0.000000e+00> : vector<256x16xf32>
    %36 = tpu.matmul %34, %35, %cst_43 {dimension_numbers = #tpu.dot_dimension_numbers<[1], [0], [0], [1], [0, 0, 1, 1], [], []>} : vector<256x4xf32>, vector<4x16xf32>, vector<256x16xf32> -> vector<256x16xf32>
    %37 = arith.addf %32, %36 : vector<256x16xf32>
    %c0_44 = arith.constant 0 : index
    %c2 = arith.constant 2 : index
    %c0_45 = arith.constant 0 : index
    %38 = vector.load %arg17[%c0_44, %c2, %c0_45] : memref<18x18x4xf32, #tpu.memory_space<vmem>>, vector<16x16x4xf32>
    %39 = vector.shape_cast %38 : vector<16x16x4xf32> to vector<256x4xf32>
    %c8 = arith.constant 8 : index
    %c0_46 = arith.constant 0 : index
    %40 = vector.load %arg5[%c8, %c0_46] : memref<36x16xf32, #tpu.memory_space<vmem>>, vector<4x16xf32>
    %cst_47 = arith.constant dense<0.000000e+00> : vector<256x16xf32>
    %41 = tpu.matmul %39, %40, %cst_47 {dimension_numbers = #tpu.dot_dimension_numbers<[1], [0], [0], [1], [0, 0, 1, 1], [], []>} : vector<256x4xf32>, vector<4x16xf32>, vector<256x16xf32> -> vector<256x16xf32>
    %42 = arith.addf %37, %41 : vector<256x16xf32>
    %c1_48 = arith.constant 1 : index
    %c0_49 = arith.constant 0 : index
    %c0_50 = arith.constant 0 : index
    %43 = vector.load %arg17[%c1_48, %c0_49, %c0_50] : memref<18x18x4xf32, #tpu.memory_space<vmem>>, vector<16x16x4xf32>
    %44 = vector.shape_cast %43 : vector<16x16x4xf32> to vector<256x4xf32>
    %c12 = arith.constant 12 : index
    %c0_51 = arith.constant 0 : index
    %45 = vector.load %arg5[%c12, %c0_51] : memref<36x16xf32, #tpu.memory_space<vmem>>, vector<4x16xf32>
    %cst_52 = arith.constant dense<0.000000e+00> : vector<256x16xf32>
    %46 = tpu.matmul %44, %45, %cst_52 {dimension_numbers = #tpu.dot_dimension_numbers<[1], [0], [0], [1], [0, 0, 1, 1], [], []>} : vector<256x4xf32>, vector<4x16xf32>, vector<256x16xf32> -> vector<256x16xf32>
    %47 = arith.addf %42, %46 : vector<256x16xf32>
    %c1_53 = arith.constant 1 : index
    %c1_54 = arith.constant 1 : index
    %c0_55 = arith.constant 0 : index
    %48 = vector.load %arg17[%c1_53, %c1_54, %c0_55] : memref<18x18x4xf32, #tpu.memory_space<vmem>>, vector<16x16x4xf32>
    %49 = vector.shape_cast %48 : vector<16x16x4xf32> to vector<256x4xf32>
    %c16 = arith.constant 16 : index
    %c0_56 = arith.constant 0 : index
    %50 = vector.load %arg5[%c16, %c0_56] : memref<36x16xf32, #tpu.memory_space<vmem>>, vector<4x16xf32>
    %cst_57 = arith.constant dense<0.000000e+00> : vector<256x16xf32>
    %51 = tpu.matmul %49, %50, %cst_57 {dimension_numbers = #tpu.dot_dimension_numbers<[1], [0], [0], [1], [0, 0, 1, 1], [], []>} : vector<256x4xf32>, vector<4x16xf32>, vector<256x16xf32> -> vector<256x16xf32>
    %52 = arith.addf %47, %51 : vector<256x16xf32>
    %c1_58 = arith.constant 1 : index
    %c2_59 = arith.constant 2 : index
    %c0_60 = arith.constant 0 : index
    %53 = vector.load %arg17[%c1_58, %c2_59, %c0_60] : memref<18x18x4xf32, #tpu.memory_space<vmem>>, vector<16x16x4xf32>
    %54 = vector.shape_cast %53 : vector<16x16x4xf32> to vector<256x4xf32>
    %c20 = arith.constant 20 : index
    %c0_61 = arith.constant 0 : index
    %55 = vector.load %arg5[%c20, %c0_61] : memref<36x16xf32, #tpu.memory_space<vmem>>, vector<4x16xf32>
    %cst_62 = arith.constant dense<0.000000e+00> : vector<256x16xf32>
    %56 = tpu.matmul %54, %55, %cst_62 {dimension_numbers = #tpu.dot_dimension_numbers<[1], [0], [0], [1], [0, 0, 1, 1], [], []>} : vector<256x4xf32>, vector<4x16xf32>, vector<256x16xf32> -> vector<256x16xf32>
    %57 = arith.addf %52, %56 : vector<256x16xf32>
    %c2_63 = arith.constant 2 : index
    %c0_64 = arith.constant 0 : index
    %c0_65 = arith.constant 0 : index
    %58 = vector.load %arg17[%c2_63, %c0_64, %c0_65] : memref<18x18x4xf32, #tpu.memory_space<vmem>>, vector<16x16x4xf32>
    %59 = vector.shape_cast %58 : vector<16x16x4xf32> to vector<256x4xf32>
    %c24 = arith.constant 24 : index
    %c0_66 = arith.constant 0 : index
    %60 = vector.load %arg5[%c24, %c0_66] : memref<36x16xf32, #tpu.memory_space<vmem>>, vector<4x16xf32>
    %cst_67 = arith.constant dense<0.000000e+00> : vector<256x16xf32>
    %61 = tpu.matmul %59, %60, %cst_67 {dimension_numbers = #tpu.dot_dimension_numbers<[1], [0], [0], [1], [0, 0, 1, 1], [], []>} : vector<256x4xf32>, vector<4x16xf32>, vector<256x16xf32> -> vector<256x16xf32>
    %62 = arith.addf %57, %61 : vector<256x16xf32>
    %c2_68 = arith.constant 2 : index
    %c1_69 = arith.constant 1 : index
    %c0_70 = arith.constant 0 : index
    %63 = vector.load %arg17[%c2_68, %c1_69, %c0_70] : memref<18x18x4xf32, #tpu.memory_space<vmem>>, vector<16x16x4xf32>
    %64 = vector.shape_cast %63 : vector<16x16x4xf32> to vector<256x4xf32>
    %c28 = arith.constant 28 : index
    %c0_71 = arith.constant 0 : index
    %65 = vector.load %arg5[%c28, %c0_71] : memref<36x16xf32, #tpu.memory_space<vmem>>, vector<4x16xf32>
    %cst_72 = arith.constant dense<0.000000e+00> : vector<256x16xf32>
    %66 = tpu.matmul %64, %65, %cst_72 {dimension_numbers = #tpu.dot_dimension_numbers<[1], [0], [0], [1], [0, 0, 1, 1], [], []>} : vector<256x4xf32>, vector<4x16xf32>, vector<256x16xf32> -> vector<256x16xf32>
    %67 = arith.addf %62, %66 : vector<256x16xf32>
    %c2_73 = arith.constant 2 : index
    %c2_74 = arith.constant 2 : index
    %c0_75 = arith.constant 0 : index
    %68 = vector.load %arg17[%c2_73, %c2_74, %c0_75] : memref<18x18x4xf32, #tpu.memory_space<vmem>>, vector<16x16x4xf32>
    %69 = vector.shape_cast %68 : vector<16x16x4xf32> to vector<256x4xf32>
    %c32 = arith.constant 32 : index
    %c0_76 = arith.constant 0 : index
    %70 = vector.load %arg5[%c32, %c0_76] : memref<36x16xf32, #tpu.memory_space<vmem>>, vector<4x16xf32>
    %cst_77 = arith.constant dense<0.000000e+00> : vector<256x16xf32>
    %71 = tpu.matmul %69, %70, %cst_77 {dimension_numbers = #tpu.dot_dimension_numbers<[1], [0], [0], [1], [0, 0, 1, 1], [], []>} : vector<256x4xf32>, vector<4x16xf32>, vector<256x16xf32> -> vector<256x16xf32>
    %72 = arith.addf %67, %71 : vector<256x16xf32>
    %73 = vector.broadcast %26 : vector<1x16xf32> to vector<256x16xf32>
    %74 = arith.addf %72, %73 : vector<256x16xf32>
    %c0_78 = arith.constant 0 : index
    %c0_79 = arith.constant 0 : index
    %75 = vector.load %arg7[%c0_78, %c0_79] : memref<1x16xf32, #tpu.memory_space<vmem>>, vector<1x16xf32>
    %c0_80 = arith.constant 0 : index
    %c0_81 = arith.constant 0 : index
    %76 = vector.load %arg8[%c0_80, %c0_81] : memref<1x16xf32, #tpu.memory_space<vmem>>, vector<1x16xf32>
    %cst_82 = arith.constant dense<0.000000e+00> : vector<16xf32>
    %77 = vector.multi_reduction <add>, %74, %cst_82 [0] : vector<256x16xf32> to vector<16xf32>
    %78 = vector.shape_cast %77 : vector<16xf32> to vector<1x16xf32>
    %cst_83 = arith.constant dense<0.000000e+00> : vector<1x16xf32>
    %79 = tpu.matmul %78, %0, %cst_83 {dimension_numbers = #tpu.dot_dimension_numbers<[1], [0], [0], [1], [0, 0, 1, 1], [], []>} : vector<1x16xf32>, vector<16x16xf32>, vector<1x16xf32> -> vector<1x16xf32>
    %80 = vector.broadcast %79 : vector<1x16xf32> to vector<256x16xf32>
    %81 = arith.subf %74, %80 : vector<256x16xf32>
    %82 = arith.mulf %81, %81 : vector<256x16xf32>
    %cst_84 = arith.constant dense<0.000000e+00> : vector<16xf32>
    %83 = vector.multi_reduction <add>, %82, %cst_84 [0] : vector<256x16xf32> to vector<16xf32>
    %84 = vector.shape_cast %83 : vector<16xf32> to vector<1x16xf32>
    %cst_85 = arith.constant dense<0.000000e+00> : vector<1x16xf32>
    %85 = tpu.matmul %84, %0, %cst_85 {dimension_numbers = #tpu.dot_dimension_numbers<[1], [0], [0], [1], [0, 0, 1, 1], [], []>} : vector<1x16xf32>, vector<16x16xf32>, vector<1x16xf32> -> vector<1x16xf32>
    %cst_86 = arith.constant 9.99999974E-6 : f32
    %86 = vector.broadcast %cst_86 : f32 to vector<1x16xf32>
    %87 = arith.addf %85, %86 : vector<1x16xf32>
    %88 = math.rsqrt %87 : vector<1x16xf32>
    %89 = arith.mulf %88, %75 : vector<1x16xf32>
    %90 = vector.broadcast %89 : vector<1x16xf32> to vector<256x16xf32>
    %91 = arith.mulf %81, %90 : vector<256x16xf32>
    %92 = vector.broadcast %76 : vector<1x16xf32> to vector<256x16xf32>
    %93 = arith.addf %91, %92 : vector<256x16xf32>
    %cst_87 = arith.constant 1.000000e+00 : f32
    %94 = vector.broadcast %cst_87 : f32 to vector<1x16xf32>
    %95 = arith.addf %13, %94 : vector<1x16xf32>
    %96 = vector.broadcast %95 : vector<1x16xf32> to vector<256x16xf32>
    %97 = arith.mulf %93, %96 : vector<256x16xf32>
    %98 = vector.broadcast %14 : vector<1x16xf32> to vector<256x16xf32>
    %99 = arith.addf %97, %98 : vector<256x16xf32>
    %100 = arith.negf %99 : vector<256x16xf32>
    %101 = math.exp %100 : vector<256x16xf32>
    %cst_88 = arith.constant 1.000000e+00 : f32
    %102 = vector.broadcast %cst_88 : f32 to vector<256x16xf32>
    %103 = arith.addf %102, %101 : vector<256x16xf32>
    %104 = arith.divf %102, %103 : vector<256x16xf32>
    %105 = arith.mulf %99, %104 : vector<256x16xf32>
    %cst_89 = arith.constant 0.000000e+00 : f32
    %106 = vector.broadcast %cst_89 : f32 to vector<1x18x16xf32>
    %c0_90 = arith.constant 0 : index
    %c0_91 = arith.constant 0 : index
    %c0_92 = arith.constant 0 : index
    %107 = vector.load %arg18[%c0_90, %c0_91, %c0_92] : memref<18x18x16xf32, #tpu.memory_space<vmem>>, vector<1x18x16xf32>
    tpu.vector_store %arg18[%c0_90, %c0_91, %c0_92], %106 {strides = array<i32>} : memref<18x18x16xf32, #tpu.memory_space<vmem>>, vector<1x18x16xf32>,
    %cst_93 = arith.constant 0.000000e+00 : f32
    %108 = vector.broadcast %cst_93 : f32 to vector<1x18x16xf32>
    %c17_94 = arith.constant 17 : index
    %c0_95 = arith.constant 0 : index
    %c0_96 = arith.constant 0 : index
    %109 = vector.load %arg18[%c17_94, %c0_95, %c0_96] : memref<18x18x16xf32, #tpu.memory_space<vmem>>, vector<1x18x16xf32>
    tpu.vector_store %arg18[%c17_94, %c0_95, %c0_96], %108 {strides = array<i32>} : memref<18x18x16xf32, #tpu.memory_space<vmem>>, vector<1x18x16xf32>,
    %cst_97 = arith.constant 0.000000e+00 : f32
    %110 = vector.broadcast %cst_97 : f32 to vector<18x1x16xf32>
    %c0_98 = arith.constant 0 : index
    %c0_99 = arith.constant 0 : index
    %c0_100 = arith.constant 0 : index
    %111 = vector.load %arg18[%c0_98, %c0_99, %c0_100] : memref<18x18x16xf32, #tpu.memory_space<vmem>>, vector<18x1x16xf32>
    tpu.vector_store %arg18[%c0_98, %c0_99, %c0_100], %110 {strides = array<i32>} : memref<18x18x16xf32, #tpu.memory_space<vmem>>, vector<18x1x16xf32>,
    %cst_101 = arith.constant 0.000000e+00 : f32
    %112 = vector.broadcast %cst_101 : f32 to vector<18x1x16xf32>
    %c0_102 = arith.constant 0 : index
    %c17_103 = arith.constant 17 : index
    %c0_104 = arith.constant 0 : index
    %113 = vector.load %arg18[%c0_102, %c17_103, %c0_104] : memref<18x18x16xf32, #tpu.memory_space<vmem>>, vector<18x1x16xf32>
    tpu.vector_store %arg18[%c0_102, %c17_103, %c0_104], %112 {strides = array<i32>} : memref<18x18x16xf32, #tpu.memory_space<vmem>>, vector<18x1x16xf32>,
    %114 = vector.shape_cast %105 : vector<256x16xf32> to vector<16x16x16xf32>
    %c1_105 = arith.constant 1 : index
    %c1_106 = arith.constant 1 : index
    %c0_107 = arith.constant 0 : index
    %115 = vector.load %arg18[%c1_105, %c1_106, %c0_107] : memref<18x18x16xf32, #tpu.memory_space<vmem>>, vector<16x16x16xf32>
    tpu.vector_store %arg18[%c1_105, %c1_106, %c0_107], %114 {strides = array<i32>} : memref<18x18x16xf32, #tpu.memory_space<vmem>>, vector<16x16x16xf32>,
    %c0_108 = arith.constant 0 : index
    %c0_109 = arith.constant 0 : index
    %116 = vector.load %arg10[%c0_108, %c0_109] : memref<1x16xf32, #tpu.memory_space<vmem>>, vector<1x16xf32>
    %cst_110 = arith.constant 0.000000e+00 : f32
    %117 = vector.broadcast %cst_110 : f32 to vector<256x16xf32>
    %c0_111 = arith.constant 0 : index
    %c0_112 = arith.constant 0 : index
    %c0_113 = arith.constant 0 : index
    %118 = vector.load %arg18[%c0_111, %c0_112, %c0_113] : memref<18x18x16xf32, #tpu.memory_space<vmem>>, vector<16x16x16xf32>
    %119 = vector.shape_cast %118 : vector<16x16x16xf32> to vector<256x16xf32>
    %c0_114 = arith.constant 0 : index
    %c0_115 = arith.constant 0 : index
    %120 = vector.load %arg9[%c0_114, %c0_115] : memref<144x16xf32, #tpu.memory_space<vmem>>, vector<16x16xf32>
    %cst_116 = arith.constant dense<0.000000e+00> : vector<256x16xf32>
    %121 = tpu.matmul %119, %120, %cst_116 {dimension_numbers = #tpu.dot_dimension_numbers<[1], [0], [0], [1], [0, 0, 1, 1], [], []>} : vector<256x16xf32>, vector<16x16xf32>, vector<256x16xf32> -> vector<256x16xf32>
    %122 = arith.addf %117, %121 : vector<256x16xf32>
    %c0_117 = arith.constant 0 : index
    %c1_118 = arith.constant 1 : index
    %c0_119 = arith.constant 0 : index
    %123 = vector.load %arg18[%c0_117, %c1_118, %c0_119] : memref<18x18x16xf32, #tpu.memory_space<vmem>>, vector<16x16x16xf32>
    %124 = vector.shape_cast %123 : vector<16x16x16xf32> to vector<256x16xf32>
    %c16_120 = arith.constant 16 : index
    %c0_121 = arith.constant 0 : index
    %125 = vector.load %arg9[%c16_120, %c0_121] : memref<144x16xf32, #tpu.memory_space<vmem>>, vector<16x16xf32>
    %cst_122 = arith.constant dense<0.000000e+00> : vector<256x16xf32>
    %126 = tpu.matmul %124, %125, %cst_122 {dimension_numbers = #tpu.dot_dimension_numbers<[1], [0], [0], [1], [0, 0, 1, 1], [], []>} : vector<256x16xf32>, vector<16x16xf32>, vector<256x16xf32> -> vector<256x16xf32>
    %127 = arith.addf %122, %126 : vector<256x16xf32>
    %c0_123 = arith.constant 0 : index
    %c2_124 = arith.constant 2 : index
    %c0_125 = arith.constant 0 : index
    %128 = vector.load %arg18[%c0_123, %c2_124, %c0_125] : memref<18x18x16xf32, #tpu.memory_space<vmem>>, vector<16x16x16xf32>
    %129 = vector.shape_cast %128 : vector<16x16x16xf32> to vector<256x16xf32>
    %c32_126 = arith.constant 32 : index
    %c0_127 = arith.constant 0 : index
    %130 = vector.load %arg9[%c32_126, %c0_127] : memref<144x16xf32, #tpu.memory_space<vmem>>, vector<16x16xf32>
    %cst_128 = arith.constant dense<0.000000e+00> : vector<256x16xf32>
    %131 = tpu.matmul %129, %130, %cst_128 {dimension_numbers = #tpu.dot_dimension_numbers<[1], [0], [0], [1], [0, 0, 1, 1], [], []>} : vector<256x16xf32>, vector<16x16xf32>, vector<256x16xf32> -> vector<256x16xf32>
    %132 = arith.addf %127, %131 : vector<256x16xf32>
    %c1_129 = arith.constant 1 : index
    %c0_130 = arith.constant 0 : index
    %c0_131 = arith.constant 0 : index
    %133 = vector.load %arg18[%c1_129, %c0_130, %c0_131] : memref<18x18x16xf32, #tpu.memory_space<vmem>>, vector<16x16x16xf32>
    %134 = vector.shape_cast %133 : vector<16x16x16xf32> to vector<256x16xf32>
    %c48 = arith.constant 48 : index
    %c0_132 = arith.constant 0 : index
    %135 = vector.load %arg9[%c48, %c0_132] : memref<144x16xf32, #tpu.memory_space<vmem>>, vector<16x16xf32>
    %cst_133 = arith.constant dense<0.000000e+00> : vector<256x16xf32>
    %136 = tpu.matmul %134, %135, %cst_133 {dimension_numbers = #tpu.dot_dimension_numbers<[1], [0], [0], [1], [0, 0, 1, 1], [], []>} : vector<256x16xf32>, vector<16x16xf32>, vector<256x16xf32> -> vector<256x16xf32>
    %137 = arith.addf %132, %136 : vector<256x16xf32>
    %c1_134 = arith.constant 1 : index
    %c1_135 = arith.constant 1 : index
    %c0_136 = arith.constant 0 : index
    %138 = vector.load %arg18[%c1_134, %c1_135, %c0_136] : memref<18x18x16xf32, #tpu.memory_space<vmem>>, vector<16x16x16xf32>
    %139 = vector.shape_cast %138 : vector<16x16x16xf32> to vector<256x16xf32>
    %c64 = arith.constant 64 : index
    %c0_137 = arith.constant 0 : index
    %140 = vector.load %arg9[%c64, %c0_137] : memref<144x16xf32, #tpu.memory_space<vmem>>, vector<16x16xf32>
    %cst_138 = arith.constant dense<0.000000e+00> : vector<256x16xf32>
    %141 = tpu.matmul %139, %140, %cst_138 {dimension_numbers = #tpu.dot_dimension_numbers<[1], [0], [0], [1], [0, 0, 1, 1], [], []>} : vector<256x16xf32>, vector<16x16xf32>, vector<256x16xf32> -> vector<256x16xf32>
    %142 = arith.addf %137, %141 : vector<256x16xf32>
    %c1_139 = arith.constant 1 : index
    %c2_140 = arith.constant 2 : index
    %c0_141 = arith.constant 0 : index
    %143 = vector.load %arg18[%c1_139, %c2_140, %c0_141] : memref<18x18x16xf32, #tpu.memory_space<vmem>>, vector<16x16x16xf32>
    %144 = vector.shape_cast %143 : vector<16x16x16xf32> to vector<256x16xf32>
    %c80 = arith.constant 80 : index
    %c0_142 = arith.constant 0 : index
    %145 = vector.load %arg9[%c80, %c0_142] : memref<144x16xf32, #tpu.memory_space<vmem>>, vector<16x16xf32>
    %cst_143 = arith.constant dense<0.000000e+00> : vector<256x16xf32>
    %146 = tpu.matmul %144, %145, %cst_143 {dimension_numbers = #tpu.dot_dimension_numbers<[1], [0], [0], [1], [0, 0, 1, 1], [], []>} : vector<256x16xf32>, vector<16x16xf32>, vector<256x16xf32> -> vector<256x16xf32>
    %147 = arith.addf %142, %146 : vector<256x16xf32>
    %c2_144 = arith.constant 2 : index
    %c0_145 = arith.constant 0 : index
    %c0_146 = arith.constant 0 : index
    %148 = vector.load %arg18[%c2_144, %c0_145, %c0_146] : memref<18x18x16xf32, #tpu.memory_space<vmem>>, vector<16x16x16xf32>
    %149 = vector.shape_cast %148 : vector<16x16x16xf32> to vector<256x16xf32>
    %c96 = arith.constant 96 : index
    %c0_147 = arith.constant 0 : index
    %150 = vector.load %arg9[%c96, %c0_147] : memref<144x16xf32, #tpu.memory_space<vmem>>, vector<16x16xf32>
    %cst_148 = arith.constant dense<0.000000e+00> : vector<256x16xf32>
    %151 = tpu.matmul %149, %150, %cst_148 {dimension_numbers = #tpu.dot_dimension_numbers<[1], [0], [0], [1], [0, 0, 1, 1], [], []>} : vector<256x16xf32>, vector<16x16xf32>, vector<256x16xf32> -> vector<256x16xf32>
    %152 = arith.addf %147, %151 : vector<256x16xf32>
    %c2_149 = arith.constant 2 : index
    %c1_150 = arith.constant 1 : index
    %c0_151 = arith.constant 0 : index
    %153 = vector.load %arg18[%c2_149, %c1_150, %c0_151] : memref<18x18x16xf32, #tpu.memory_space<vmem>>, vector<16x16x16xf32>
    %154 = vector.shape_cast %153 : vector<16x16x16xf32> to vector<256x16xf32>
    %c112 = arith.constant 112 : index
    %c0_152 = arith.constant 0 : index
    %155 = vector.load %arg9[%c112, %c0_152] : memref<144x16xf32, #tpu.memory_space<vmem>>, vector<16x16xf32>
    %cst_153 = arith.constant dense<0.000000e+00> : vector<256x16xf32>
    %156 = tpu.matmul %154, %155, %cst_153 {dimension_numbers = #tpu.dot_dimension_numbers<[1], [0], [0], [1], [0, 0, 1, 1], [], []>} : vector<256x16xf32>, vector<16x16xf32>, vector<256x16xf32> -> vector<256x16xf32>
    %157 = arith.addf %152, %156 : vector<256x16xf32>
    %c2_154 = arith.constant 2 : index
    %c2_155 = arith.constant 2 : index
    %c0_156 = arith.constant 0 : index
    %158 = vector.load %arg18[%c2_154, %c2_155, %c0_156] : memref<18x18x16xf32, #tpu.memory_space<vmem>>, vector<16x16x16xf32>
    %159 = vector.shape_cast %158 : vector<16x16x16xf32> to vector<256x16xf32>
    %c128 = arith.constant 128 : index
    %c0_157 = arith.constant 0 : index
    %160 = vector.load %arg9[%c128, %c0_157] : memref<144x16xf32, #tpu.memory_space<vmem>>, vector<16x16xf32>
    %cst_158 = arith.constant dense<0.000000e+00> : vector<256x16xf32>
    %161 = tpu.matmul %159, %160, %cst_158 {dimension_numbers = #tpu.dot_dimension_numbers<[1], [0], [0], [1], [0, 0, 1, 1], [], []>} : vector<256x16xf32>, vector<16x16xf32>, vector<256x16xf32> -> vector<256x16xf32>
    %162 = arith.addf %157, %161 : vector<256x16xf32>
    %163 = vector.broadcast %116 : vector<1x16xf32> to vector<256x16xf32>
    %164 = arith.addf %162, %163 : vector<256x16xf32>
    %c0_159 = arith.constant 0 : index
    %c0_160 = arith.constant 0 : index
    %165 = vector.load %arg11[%c0_159, %c0_160] : memref<1x16xf32, #tpu.memory_space<vmem>>, vector<1x16xf32>
    %c0_161 = arith.constant 0 : index
    %c0_162 = arith.constant 0 : index
    %166 = vector.load %arg12[%c0_161, %c0_162] : memref<1x16xf32, #tpu.memory_space<vmem>>, vector<1x16xf32>
    %cst_163 = arith.constant dense<0.000000e+00> : vector<16xf32>
    %167 = vector.multi_reduction <add>, %164, %cst_163 [0] : vector<256x16xf32> to vector<16xf32>
    %168 = vector.shape_cast %167 : vector<16xf32> to vector<1x16xf32>
    %cst_164 = arith.constant dense<0.000000e+00> : vector<1x16xf32>
    %169 = tpu.matmul %168, %0, %cst_164 {dimension_numbers = #tpu.dot_dimension_numbers<[1], [0], [0], [1], [0, 0, 1, 1], [], []>} : vector<1x16xf32>, vector<16x16xf32>, vector<1x16xf32> -> vector<1x16xf32>
    %170 = vector.broadcast %169 : vector<1x16xf32> to vector<256x16xf32>
    %171 = arith.subf %164, %170 : vector<256x16xf32>
    %172 = arith.mulf %171, %171 : vector<256x16xf32>
    %cst_165 = arith.constant dense<0.000000e+00> : vector<16xf32>
    %173 = vector.multi_reduction <add>, %172, %cst_165 [0] : vector<256x16xf32> to vector<16xf32>
    %174 = vector.shape_cast %173 : vector<16xf32> to vector<1x16xf32>
    %cst_166 = arith.constant dense<0.000000e+00> : vector<1x16xf32>
    %175 = tpu.matmul %174, %0, %cst_166 {dimension_numbers = #tpu.dot_dimension_numbers<[1], [0], [0], [1], [0, 0, 1, 1], [], []>} : vector<1x16xf32>, vector<16x16xf32>, vector<1x16xf32> -> vector<1x16xf32>
    %cst_167 = arith.constant 9.99999974E-6 : f32
    %176 = vector.broadcast %cst_167 : f32 to vector<1x16xf32>
    %177 = arith.addf %175, %176 : vector<1x16xf32>
    %178 = math.rsqrt %177 : vector<1x16xf32>
    %179 = arith.mulf %178, %165 : vector<1x16xf32>
    %180 = vector.broadcast %179 : vector<1x16xf32> to vector<256x16xf32>
    %181 = arith.mulf %171, %180 : vector<256x16xf32>
    %182 = vector.broadcast %166 : vector<1x16xf32> to vector<256x16xf32>
    %183 = arith.addf %181, %182 : vector<256x16xf32>
    %184 = arith.negf %183 : vector<256x16xf32>
    %185 = math.exp %184 : vector<256x16xf32>
    %cst_168 = arith.constant 1.000000e+00 : f32
    %186 = vector.broadcast %cst_168 : f32 to vector<256x16xf32>
    %187 = arith.addf %186, %185 : vector<256x16xf32>
    %188 = arith.divf %186, %187 : vector<256x16xf32>
    %189 = arith.mulf %183, %188 : vector<256x16xf32>
    %190 = vector.shape_cast %16 : vector<16x16x4xf32> to vector<256x4xf32>
    %c0_169 = arith.constant 0 : index
    %c0_170 = arith.constant 0 : index
    %191 = vector.load %arg13[%c0_169, %c0_170] : memref<4x16xf32, #tpu.memory_space<vmem>>, vector<4x16xf32>
    %cst_171 = arith.constant dense<0.000000e+00> : vector<256x16xf32>
    %192 = tpu.matmul %190, %191, %cst_171 {dimension_numbers = #tpu.dot_dimension_numbers<[1], [0], [0], [1], [0, 0, 1, 1], [], []>} : vector<256x4xf32>, vector<4x16xf32>, vector<256x16xf32> -> vector<256x16xf32>
    %c0_172 = arith.constant 0 : index
    %c0_173 = arith.constant 0 : index
    %193 = vector.load %arg14[%c0_172, %c0_173] : memref<1x16xf32, #tpu.memory_space<vmem>>, vector<1x16xf32>
    %194 = vector.broadcast %193 : vector<1x16xf32> to vector<256x16xf32>
    %195 = arith.addf %192, %194 : vector<256x16xf32>
    %196 = arith.addf %189, %195 : vector<256x16xf32>
    %197 = tpu.transpose %196, [1, 0] : vector<256x16xf32> -> vector<16x256xf32>
    %c0_174 = arith.constant 0 : index
    %c0_175 = arith.constant 0 : index
    %c0_176 = arith.constant 0 : index
    %198 = vector.load %arg16[%c0_174, %c0_175, %c0_176] : memref<1x16x256xf32, #tpu.memory_space<vmem>>, vector<1x16x256xf32>
    %199 = vector.shape_cast %198 : vector<1x16x256xf32> to vector<16x256xf32>
    %200 = vector.shape_cast %197 : vector<16x256xf32> to vector<1x16x256xf32>
    tpu.vector_store %arg16[%c0_174, %c0_175, %c0_176], %200 {strides = array<i32>} : memref<1x16x256xf32, #tpu.memory_space<vmem>>, vector<1x16x256xf32>,
    return
  }
  func.func @transform_0(%arg0: i32) -> (i32, i32, i32, i32) {
    %c0_i32 = arith.constant 0 : i32
    %c0_i32_0 = arith.constant 0 : i32
    %c0_i32_1 = arith.constant 0 : i32
    %c0_i32_2 = arith.constant 0 : i32
    return %arg0, %c0_i32, %c0_i32_0, %c0_i32_1 : i32, i32, i32, i32
  }
  func.func @transform_1(%arg0: i32) -> (i32, i32, i32) {
    %c0_i32 = arith.constant 0 : i32
    %c0_i32_0 = arith.constant 0 : i32
    %c0_i32_1 = arith.constant 0 : i32
    return %arg0, %c0_i32, %c0_i32_0 : i32, i32, i32
  }
  func.func @transform_2(%arg0: i32) -> (i32, i32) {
    %c0_i32 = arith.constant 0 : i32
    %c0_i32_0 = arith.constant 0 : i32
    %c0_i32_1 = arith.constant 0 : i32
    return %c0_i32, %c0_i32_0 : i32, i32
  }
  func.func @transform_3(%arg0: i32) -> (i32, i32) {
    %c0_i32 = arith.constant 0 : i32
    %c0_i32_0 = arith.constant 0 : i32
    %c0_i32_1 = arith.constant 0 : i32
    return %c0_i32, %c0_i32_0 : i32, i32
  }
  func.func @transform_4(%arg0: i32) -> (i32, i32) {
    %c0_i32 = arith.constant 0 : i32
    %c0_i32_0 = arith.constant 0 : i32
    %c0_i32_1 = arith.constant 0 : i32
    return %c0_i32, %c0_i32_0 : i32, i32
  }
  func.func @transform_5(%arg0: i32) -> (i32, i32) {
    %c0_i32 = arith.constant 0 : i32
    %c0_i32_0 = arith.constant 0 : i32
    %c0_i32_1 = arith.constant 0 : i32
    return %c0_i32, %c0_i32_0 : i32, i32
  }
  func.func @transform_6(%arg0: i32) -> (i32, i32) {
    %c0_i32 = arith.constant 0 : i32
    %c0_i32_0 = arith.constant 0 : i32
    %c0_i32_1 = arith.constant 0 : i32
    return %c0_i32, %c0_i32_0 : i32, i32
  }
  func.func @transform_7(%arg0: i32) -> (i32, i32) {
    %c0_i32 = arith.constant 0 : i32
    %c0_i32_0 = arith.constant 0 : i32
    %c0_i32_1 = arith.constant 0 : i32
    return %c0_i32, %c0_i32_0 : i32, i32
  }
  func.func @transform_8(%arg0: i32) -> (i32, i32) {
    %c0_i32 = arith.constant 0 : i32
    %c0_i32_0 = arith.constant 0 : i32
    %c0_i32_1 = arith.constant 0 : i32
    return %c0_i32, %c0_i32_0 : i32, i32
  }
  func.func @transform_9(%arg0: i32) -> (i32, i32) {
    %c0_i32 = arith.constant 0 : i32
    %c0_i32_0 = arith.constant 0 : i32
    %c0_i32_1 = arith.constant 0 : i32
    return %c0_i32, %c0_i32_0 : i32, i32
  }
  func.func @transform_10(%arg0: i32) -> (i32, i32) {
    %c0_i32 = arith.constant 0 : i32
    %c0_i32_0 = arith.constant 0 : i32
    %c0_i32_1 = arith.constant 0 : i32
    return %c0_i32, %c0_i32_0 : i32, i32
  }
  func.func @transform_11(%arg0: i32) -> (i32, i32) {
    %c0_i32 = arith.constant 0 : i32
    %c0_i32_0 = arith.constant 0 : i32
    %c0_i32_1 = arith.constant 0 : i32
    return %c0_i32, %c0_i32_0 : i32, i32
  }
  func.func @transform_12(%arg0: i32) -> (i32, i32) {
    %c0_i32 = arith.constant 0 : i32
    %c0_i32_0 = arith.constant 0 : i32
    %c0_i32_1 = arith.constant 0 : i32
    return %c0_i32, %c0_i32_0 : i32, i32
  }
  func.func @transform_13(%arg0: i32) -> (i32, i32) {
    %c0_i32 = arith.constant 0 : i32
    %c0_i32_0 = arith.constant 0 : i32
    %c0_i32_1 = arith.constant 0 : i32
    return %c0_i32, %c0_i32_0 : i32, i32
  }
  func.func @transform_14(%arg0: i32) -> (i32, i32) {
    %c0_i32 = arith.constant 0 : i32
    %c0_i32_0 = arith.constant 0 : i32
    %c0_i32_1 = arith.constant 0 : i32
    return %c0_i32, %c0_i32_0 : i32, i32
  }
  func.func @transform_15(%arg0: i32) -> (i32, i32, i32) {
    %c0_i32 = arith.constant 0 : i32
    %c0_i32_0 = arith.constant 0 : i32
    %c0_i32_1 = arith.constant 0 : i32
    return %arg0, %c0_i32, %c0_i32_0 : i32, i32, i32
  }
}

</mosaic_0001>

<bundles_post_ra>
// kernel: tpu_custom_call.1
= control target key start
LH: loop header
LB: loop body
LE: loop exit
PB: predicated region body
PF: predicated region fallthrough
CT: control target
= control target key end

     0   :  { %s16761_s0 = inlined_call_operand.vmem [shape: f32[2,16,16,4], index: 0, kind: input, shape index: {}]   ;;  %s16762_s1 = inlined_call_operand.vmem [shape: f32[2,1,32], index: 1, kind: input, shape index: {}]   ;;  %s16763_s2 = inlined_call_operand.vmem [shape: f32[32,32], index: 2, kind: input, shape index: {}]   ;;  %s16764_s3 = inlined_call_operand.vmem [shape: f32[1,32], index: 3, kind: input, shape index: {}]   ;;  %s16765_s4 = inlined_call_operand.vmem [shape: f32[36,16], index: 4, kind: input, shape index: {}]   ;;  %s16766_s5 = inlined_call_operand.vmem [shape: f32[1,16], index: 5, kind: input, shape index: {}]   ;;  %s16767_s6 = inlined_call_operand.vmem [shape: f32[1,16], index: 6, kind: input, shape index: {}]   ;;  %s16768_s7 = inlined_call_operand.vmem [shape: f32[1,16], index: 7, kind: input, shape index: {}]   ;;  %s16769_s8 = inlined_call_operand.vmem [shape: f32[144,16], index: 8, kind: input, shape index: {}]   ;;  %s16770_s9 = inlined_call_operand.vmem [shape: f32[1,16], index: 9, kind: input, shape index: {}]   ;;  %s16771_s10 = inlined_call_operand.vmem [shape: f32[1,16], index: 10, kind: input, shape index: {}]   ;;  %s16772_s11 = inlined_call_operand.vmem [shape: f32[1,16], index: 11, kind: input, shape index: {}]   ;;  %s16773_s12 = inlined_call_operand.vmem [shape: f32[4,16], index: 12, kind: input, shape index: {}]   ;;  %s16774_s13 = inlined_call_operand.vmem [shape: f32[1,16], index: 13, kind: input, shape index: {}]   ;;  %s16775_s14 = inlined_call_operand.vmem [shape: f32[16,16], index: 14, kind: input, shape index: {}]   ;;  %s16776_s15 = inlined_call_operand.hbm [shape: f32[2,16,256], index: 15, kind: output, shape index: {}]  }
   0x1   :  { %16933 = sst [smem:[#allocation72_spill]] %s16761_s0 }
   0x2   :  { %16934 = sst [smem:[#allocation73_spill]] %s16762_s1 }
   0x3   :  { %16935 = sst [smem:[#allocation74_spill]] %s16763_s2 }
   0x4   :  { %16936 = sst [smem:[#allocation75_spill]] %s16764_s3 }
   0x5   :  { %16937 = sst [smem:[#allocation76_spill]] %s16765_s4 }
   0x6   :  { %20 = vsyncpa [#allocation5], 0 }
   0x7   :  { %22 = vsyncpa [#allocation5 + $0x1], 0  ;;  %s13020_s18 = smov 0   ;;  %s13022_s19 = smov 0  }
   0x8   :  { %s13024_s20 = smov 0   ;;  %s13026_s21 = smov 0  }
   0x9 LB: > { %s13041_s22 = sadd.s32 4294967295, %s12931_s21   ;;  %s9625_s23 = sadd.s32 4294967294, %s12931_s21   ;;  %s12931_s21 = sphi %s13026_s21, %s17185_s21   ;;  %s12927_s20 = sphi %s13024_s20, %s17184_s20   ;;  %s12923_s19 = sphi %s13022_s19, %s17183_s19   ;;  %s12919_s18 = sphi %s13020_s18, %s17182_s18  }
   0xa   : > { %s13045_s24 = sadd.s32 1, %s12931_s21   ;;  %s360_s25 = sadd.s32 1, %s12927_s20 }
   0xb   : > { %s357_s26 = ssub.s32 %s12931_s21, %s13045_s24  ;;  %p370_p0 = scmp.ne.s32.totalorder %s12927_s20, %s12923_s19 }
   0xc   : > { %p358_p1 = scmp.eq.s32.totalorder %s357_s26, 0  ;;  %p371_p2 = scmp.eq.s32.totalorder %s13041_s22, 1 }
   0xd   : > { %p376_p3 = scmp.ne.s32.totalorder %s12923_s19, %s12919_s18  ;;  %p377_p4 = scmp.eq.s32.totalorder %s9625_s23, 1 }
   0xe   : > { %s13056_s27 = scalar_select %p358_p1, %s12927_s20, %s360_s25  }
   0xf   : > { %p13058_p5 = por %p371_p2, %p370_p0  ;;  %p13062_p6 = por %p377_p4, %p376_p3 }
  0x10   : > { %p9628_p7 = scmp.ge.s32.totalorder %s12931_s21, 1  ;;  %p448_p8 = scmp.lt.s32.totalorder %s12931_s21, 3 }
  0x12   : > { %p449_p9 = pnand %p9628_p7, %p448_p8 }
  0x14   : > { %452 = sbr.rel (%p449_p9) target bundleno = 2965 (0xb95), region = 80 }
  0x1b   : > { %s16940_s4 = sld [smem:[#allocation76_spill]]  ;;  %vm870_vm0 = vcmask 1043456   ;;  %p499_p10 = scmp.lt.s32.totalorder %s13041_s22, 1  ;;  %vm628_vm1 = vcmask 31744   ;;  %v16777_v2 = vmov 0.0   ;;  %vm637_vm2 = vcmask 24576  }
  0x1c   : > { %629 = vst.msk [vmem:[#allocation2] sm:$0xff] %vm628_vm1, %v16777_v2  ;;  %630 = vst.msk [vmem:[#allocation2 + $0x8] sm:$0xff] %vm628_vm1, %v16777_v2  ;;  %vm631_vm3 = vcmask 25600   ;;  %s16942_s0 = sld [smem:[#allocation72_spill]]  ;;  %s17016_s1 = sld [smem:[#allocation73_spill]]  ;;  %vm522_vm4 = vcmask 261120  }
  0x1d   : > { %634 = vst.msk [vmem:[#allocation2 + $0x198] sm:$0xff] %vm628_vm1, %v16777_v2  ;;  %635 = vst.msk [vmem:[#allocation2 + $0x1a0] sm:$0xff] %vm628_vm1, %v16777_v2  ;;  %s13092_s25 = scalar_select %p499_p10, %s13041_s22, 1  ;;  %vm12935_vm5 = vmmov 0   ;;  %vm4187_vm6 = vcmask 130048   ;;  %vm4919_vm7 = vcmask 123904  }
  0x1e   : > { %638 = vst.msk [vmem:[#allocation2] sm:$0x1] %vm637_vm2, %v16777_v2  ;;  %639 = vst.msk [vmem:[#allocation2 + $0x18] sm:$0x1] %vm637_vm2, %v16777_v2  ;;  %s17025_s2 = sld [smem:[#allocation74_spill]]  ;;  %s17046_s3 = sld [smem:[#allocation75_spill]] }
  0x1f   : > { %640 = vst.msk [vmem:[#allocation2 + $0x30] sm:$0x1] %vm637_vm2, %v16777_v2  ;;  %641 = vst.msk [vmem:[#allocation2 + $0x48] sm:$0x1] %vm637_vm2, %v16777_v2  ;;  %s10330_s26 = sshll.u32 %s13092_s25, 8  ;;  %vm4925_vm8 = vcmask 122880  }
  0x20   : > { %642 = vst.msk [vmem:[#allocation2 + $0x60] sm:$0x1] %vm637_vm2, %v16777_v2  ;;  %643 = vst.msk [vmem:[#allocation2 + $0x78] sm:$0x1] %vm637_vm2, %v16777_v2  ;;  %s496_s23 = sand.u32 1, %s12923_s19  }
  0x21   : > { %v13071_v0 = vld [vmem:[%s16940_s4 + $0x4] sm:$0xf]  ;;  %v13079_v1 = vld [vmem:[%s16940_s4] sm:$0xf]  ;;  %644 = vst.msk [vmem:[#allocation2 + $0x90] sm:$0x1] %vm637_vm2, %v16777_v2 }
  0x22   : > { %16941 = vst [vmem:[#allocation7_spill] sm:$0xff] %v13071_v0  ;;  %12046 = vmatprep.subr.msk.mxu1 %vm870_vm0, %v13071_v0  ;;  %645 = vst.msk [vmem:[#allocation2 + $0xa8] sm:$0x1] %vm637_vm2, %v16777_v2  ;;  %s13176_s17 = scalar_lea.vmem %s16942_s0, %s10330_s26  ;;  %v1455_v28 = vld [vmem:[%s16940_s4 + $0x8] sm:$0xf]  ;;  %s9629_s26 = sshll.u32 %s496_s23, 5 }
  0x23   : > { %12047 = vmatpush3.msk.msra.mxu1 %vm870_vm0, %v13071_v0  ;;  %646 = vst.msk [vmem:[#allocation2 + $0xc0] sm:$0x1] %vm637_vm2, %v16777_v2  ;;  %647 = vst.msk [vmem:[#allocation2 + $0xd8] sm:$0x1] %vm637_vm2, %v16777_v2  ;;  %v13179_v3 = vld [vmem:[%s13176_s17 + $0x50] sm:$0xff]  ;;  %v13182_v4 = vld [vmem:[%s13176_s17 + $0x58] sm:$0xff] }
  0x24   : > { %648 = vst.msk [vmem:[#allocation2 + $0xf0] sm:$0x1] %vm637_vm2, %v16777_v2  ;;  %649 = vst.msk [vmem:[#allocation2 + $0x108] sm:$0x1] %vm637_vm2, %v16777_v2  ;;  %11046 = vmatprep.subr.msk.mxu1 %vm870_vm0, %v13079_v1  ;;  %v13185_v5 = vld [vmem:[%s13176_s17 + $0x60] sm:$0xff]  ;;  %v13194_v6 = vld [vmem:[%s13176_s17 + $0x68] sm:$0xff] }
  0x25   : > { %650 = vst.msk [vmem:[#allocation2 + $0x120] sm:$0x1] %vm637_vm2, %v16777_v2  ;;  %651 = vst.msk [vmem:[#allocation2 + $0x138] sm:$0x1] %vm637_vm2, %v16777_v2  ;;  %v13197_v7 = vld [vmem:[%s13176_s17 + $0x70] sm:$0xff]  ;;  %v13200_v8 = vld [vmem:[%s13176_s17 + $0x78] sm:$0xff] }
  0x26   : > { %652 = vst.msk [vmem:[#allocation2 + $0x150] sm:$0x1] %vm637_vm2, %v16777_v2  ;;  %653 = vst.msk [vmem:[#allocation2 + $0x168] sm:$0x1] %vm637_vm2, %v16777_v2  ;;  %v13209_v9 = vld [vmem:[%s13176_s17 + $0x80] sm:$0xff]  ;;  %v13212_v10 = vld [vmem:[%s13176_s17 + $0x88] sm:$0xff] }
  0x27   : > { %654 = vst.msk [vmem:[#allocation2 + $0x180] sm:$0x1] %vm637_vm2, %v16777_v2  ;;  %657 = vst.msk [vmem:[#allocation2 + $0x29] sm:$0x1] %vm637_vm2, %v16777_v2  ;;  %v13215_v11 = vld [vmem:[%s13176_s17 + $0x90] sm:$0xff]  ;;  %v13224_v12 = vld [vmem:[%s13176_s17 + $0x98] sm:$0xff] }
  0x28   : > { %658 = vst.msk [vmem:[#allocation2 + $0x41] sm:$0x1] %vm637_vm2, %v16777_v2  ;;  %659 = vst.msk [vmem:[#allocation2 + $0x59] sm:$0x1] %vm637_vm2, %v16777_v2  ;;  %v13227_v13 = vld [vmem:[%s13176_s17 + $0xa0] sm:$0xff]  ;;  %v13230_v14 = vld [vmem:[%s13176_s17 + $0xa8] sm:$0xff] }
  0x29   : > { %660 = vst.msk [vmem:[#allocation2 + $0x71] sm:$0x1] %vm637_vm2, %v16777_v2  ;;  %661 = vst.msk [vmem:[#allocation2 + $0x89] sm:$0x1] %vm637_vm2, %v16777_v2  ;;  %v13239_v15 = vld [vmem:[%s13176_s17 + $0xb0] sm:$0xff]  ;;  %v13242_v16 = vld [vmem:[%s13176_s17 + $0xb8] sm:$0xff] }
  0x2a   : > { %662 = vst.msk [vmem:[#allocation2 + $0xa1] sm:$0x1] %vm637_vm2, %v16777_v2  ;;  %663 = vst.msk [vmem:[#allocation2 + $0xb9] sm:$0x1] %vm637_vm2, %v16777_v2  ;;  %v13245_v17 = vld [vmem:[%s13176_s17 + $0xc0] sm:$0xff]  ;;  %v13254_v18 = vld [vmem:[%s13176_s17 + $0xc8] sm:$0xff] }
  0x2b   : > { %664 = vst.msk [vmem:[#allocation2 + $0xd1] sm:$0x1] %vm637_vm2, %v16777_v2  ;;  %665 = vst.msk [vmem:[#allocation2 + $0xe9] sm:$0x1] %vm637_vm2, %v16777_v2  ;;  %v13257_v19 = vld [vmem:[%s13176_s17 + $0xd0] sm:$0xff]  ;;  %v13260_v20 = vld [vmem:[%s13176_s17 + $0xd8] sm:$0xff] }
  0x2c   : > { %666 = vst.msk [vmem:[#allocation2 + $0x101] sm:$0x1] %vm637_vm2, %v16777_v2  ;;  %667 = vst.msk [vmem:[#allocation2 + $0x119] sm:$0x1] %vm637_vm2, %v16777_v2  ;;  %v13269_v21 = vld [vmem:[%s13176_s17 + $0xe0] sm:$0xff]  ;;  %v13272_v22 = vld [vmem:[%s13176_s17 + $0xe8] sm:$0xff] }
  0x2d   : > { %668 = vst.msk [vmem:[#allocation2 + $0x131] sm:$0x1] %vm637_vm2, %v16777_v2  ;;  %669 = vst.msk [vmem:[#allocation2 + $0x149] sm:$0x1] %vm637_vm2, %v16777_v2  ;;  %v13279_v23 = vld [vmem:[%s13176_s17] sm:$0xff]  ;;  %v13282_v24 = vld [vmem:[%s13176_s17 + $0x8] sm:$0xff] }
  0x2e   : > { %670 = vst.msk [vmem:[#allocation2 + $0x161] sm:$0x1] %vm637_vm2, %v16777_v2  ;;  %671 = vst.msk [vmem:[#allocation2 + $0x179] sm:$0x1] %vm637_vm2, %v16777_v2  ;;  %v13313_v31 = vld [vmem:[%s13176_s17 + $0x10] sm:$0xff]  ;;  %v13324_v34 = vld [vmem:[%s13176_s17 + $0x18] sm:$0xff] }
  0x2f   : > { %672 = vst.msk [vmem:[#allocation2 + $0x191] sm:$0x1] %vm637_vm2, %v16777_v2  ;;  %655 = vst.msk [vmem:[#allocation2 + $0x198] sm:$0x1] %vm637_vm2, %v16777_v2  ;;  %v13329_v35 = vld [vmem:[%s13176_s17 + $0x20] sm:$0xff]  ;;  %v13332_v36 = vld [vmem:[%s13176_s17 + $0x28] sm:$0xff] }
  0x30   : > { %632 = vst.msk [vmem:[#allocation2 + $0x10] sm:$0x3] %vm631_vm3, %v16777_v2  ;;  %636 = vst.msk [vmem:[#allocation2 + $0x1a8] sm:$0x3] %vm631_vm3, %v16777_v2  ;;  %v13335_v37 = vld [vmem:[%s13176_s17 + $0x30] sm:$0xff]  ;;  %v13344_v38 = vld [vmem:[%s13176_s17 + $0x38] sm:$0xff] }
  0x31   : > { %656 = vst.msk [vmem:[#allocation2 + $0x11] sm:$0x1] %vm637_vm2, %v16777_v2  ;;  %673 = vst.msk [vmem:[#allocation2 + $0x1a9] sm:$0x1] %vm637_vm2, %v16777_v2  ;;  %v13347_v39 = vld [vmem:[%s13176_s17 + $0x40] sm:$0xff]  ;;  %v13350_v40 = vld [vmem:[%s13176_s17 + $0x48] sm:$0xff] }
  0x32   : > { %16943 = vst [vmem:[#allocation8_spill] sm:$0xff] %v13179_v3  ;;  %16944 = vst [vmem:[#allocation9_spill] sm:$0xff] %v13182_v4  ;;  %v708_v54 = vld [vmem:[#allocation2] sm:$0xff]  ;;  %v709_v55 = vld [vmem:[#allocation2 + $0x8] sm:$0xff]  ;;  %s498_s30 = scalar_lea.vmem [#allocation4], %s9629_s26  ;;  %s16720_s26 = scalar_lea.sflag [#allocation5], %s496_s23 }
  0x33   : > { %16945 = vst [vmem:[#allocation10_spill] sm:$0xff] %v13185_v5  ;;  %685 = vst.msk [vmem:[#allocation2 + $0x91] sm:$0xff] %vm628_vm1, %v13179_v3  ;;  %v13420_v57 = vld [vmem:[%s16940_s4 + $0xc] sm:$0xf]  ;;  %v1423_v3 = vld [vmem:[#allocation2 + $0x2] sm:$0xff]  ;;  %s9554_s16 = sshll.u32 %s498_s30, 4  ;;  %s16713_s16 = int_to_ptr.vmem [resolvable:$true] %s9554_s16 }
  0x34   : > { %686 = vst.msk [vmem:[#allocation2 + $0x99] sm:$0xff] %vm628_vm1, %v13182_v4  ;;  %687 = vst.msk [vmem:[#allocation2 + $0xa9] sm:$0xff] %vm628_vm1, %v13185_v5 }
  0x35   : > { %16946 = vst [vmem:[#allocation11_spill] sm:$0xff] %v13194_v6  ;;  %16947 = vst [vmem:[#allocation12_spill] sm:$0xff] %v13197_v7 }
  0x36   : > { %16948 = vst [vmem:[#allocation13_spill] sm:$0xff] %v13200_v8  ;;  %688 = vst.msk [vmem:[#allocation2 + $0xb1] sm:$0xff] %vm628_vm1, %v13194_v6  ;;  %v13534_v6 = vld [vmem:[%s13176_s17 + $0xf8] sm:$0xff] }
  0x37   : > { %689 = vst.msk [vmem:[#allocation2 + $0xc1] sm:$0xff] %vm628_vm1, %v13197_v7  ;;  %690 = vst.msk [vmem:[#allocation2 + $0xc9] sm:$0xff] %vm628_vm1, %v13200_v8  ;;  %v13529_v7 = vld [vmem:[%s13176_s17 + $0xf0] sm:$0xff]  ;;  %s506_s17 = scalar_lea.vmem %s17016_s1, %s13092_s25  ;;  %s12936_s25 = smov 112  }
  0x38   : > { %16949 = vst [vmem:[#allocation14_spill] sm:$0xff] %v13209_v9  ;;  %16950 = vst [vmem:[#allocation15_spill] sm:$0xff] %v13212_v10 }
  0x39   : > { %16951 = vst [vmem:[#allocation16_spill] sm:$0xff] %v13215_v11  ;;  %691 = vst.msk [vmem:[#allocation2 + $0xd9] sm:$0xff] %vm628_vm1, %v13209_v9 }
  0x3a   : > { %692 = vst.msk [vmem:[#allocation2 + $0xe1] sm:$0xff] %vm628_vm1, %v13212_v10  ;;  %693 = vst.msk [vmem:[#allocation2 + $0xf1] sm:$0xff] %vm628_vm1, %v13215_v11  ;;  %v13284_v25 = vld [vmem:[#allocation2 + $0x91] sm:$0xff] }
  0x3b   : > { %16952 = vst [vmem:[#allocation17_spill] sm:$0xff] %v13224_v12  ;;  %16953 = vst [vmem:[#allocation18_spill] sm:$0xff] %v13227_v13  ;;  %v13286_v26 = vld [vmem:[#allocation2 + $0x99] sm:$0xff]  ;;  %v13288_v27 = vld [vmem:[#allocation2 + $0xa9] sm:$0xff]  ;;  %11016 = vmatprep.mubr.msk.f32.mxu1 %vm628_vm1, %v13284_v25 }
  0x3c   : > { %16954 = vst [vmem:[#allocation19_spill] sm:$0xff] %v13230_v14  ;;  %694 = vst.msk [vmem:[#allocation2 + $0xf9] sm:$0xff] %vm628_vm1, %v13224_v12  ;;  %11017 = vmatmul.mubr.msk.f32.vlgmr.msra.gmra.mrb[0].mxu1 %vm628_vm1, %v13286_v26  ;;  %v13468_v2 = vld [vmem:[#allocation2 + $0x98] sm:$0xff] }
  0x3d   : > { %695 = vst.msk [vmem:[#allocation2 + $0x109] sm:$0xff] %vm628_vm1, %v13227_v13  ;;  %696 = vst.msk [vmem:[#allocation2 + $0x111] sm:$0xff] %vm628_vm1, %v13230_v14  ;;  %11047 = vmatpush3.msk.msra.mxu1 %vm870_vm0, %v13079_v1  ;;  %11019 = vmatprep.mubr.msk.f32.mxu1 %vm628_vm1, %v13288_v27  ;;  %v13305_v29 = vld [vmem:[#allocation2 + $0xb1] sm:$0xff] }
  0x3e   : > { %16955 = vst [vmem:[#allocation20_spill] sm:$0xff] %v13239_v15  ;;  %16956 = vst [vmem:[#allocation21_spill] sm:$0xff] %v13242_v16  ;;  %v13307_v30 = vld [vmem:[#allocation2 + $0xc1] sm:$0xff]  ;;  %11096 = vmatprep.subr.msk.mxu1 %vm870_vm0, %v1455_v28  ;;  %v13317_v32 = vld [vmem:[#allocation2 + $0xc9] sm:$0xff] }
  0x3f   : > { %16957 = vst [vmem:[#allocation22_spill] sm:$0xff] %v13245_v17  ;;  %697 = vst.msk [vmem:[#allocation2 + $0x121] sm:$0xff] %vm628_vm1, %v13239_v15  ;;  %v13611_v0 = vld [vmem:[#allocation2 + $0xaa] sm:$0xff] }
  0x40   : > { %698 = vst.msk [vmem:[#allocation2 + $0x129] sm:$0xff] %vm628_vm1, %v13242_v16  ;;  %699 = vst.msk [vmem:[#allocation2 + $0x139] sm:$0xff] %vm628_vm1, %v13245_v17  ;;  %11020 = vmatmul.mubr.msk.f32.gmra.mrb[2].mxu1 %vm628_vm1, %v13305_v29  ;;  %v13319_v33 = vld [vmem:[#allocation2 + $0xd9] sm:$0xff] }
  0x41   : > { %16958 = vst [vmem:[#allocation23_spill] sm:$0xff] %v13254_v18  ;;  %16959 = vst [vmem:[#allocation24_spill] sm:$0xff] %v13257_v19  ;;  %11022 = vmatprep.mubr.msk.f32.mxu1 %vm628_vm1, %v13307_v30  ;;  %v13362_v41 = vld [vmem:[#allocation2 + $0xe1] sm:$0xff]  ;;  %v13364_v42 = vld [vmem:[#allocation2 + $0xf1] sm:$0xff] }
  0x42   : > { %16960 = vst [vmem:[#allocation25_spill] sm:$0xff] %v13260_v20  ;;  %700 = vst.msk [vmem:[#allocation2 + $0x141] sm:$0xff] %vm628_vm1, %v13254_v18  ;;  %v13486_v18 = vld [vmem:[#allocation2 + $0xd8] sm:$0xff]  ;;  %v13492_v17 = vld [vmem:[#allocation2 + $0xe0] sm:$0xff] }
  0x43   : > { %701 = vst.msk [vmem:[#allocation2 + $0x151] sm:$0xff] %vm628_vm1, %v13257_v19  ;;  %702 = vst.msk [vmem:[#allocation2 + $0x159] sm:$0xff] %vm628_vm1, %v13260_v20  ;;  %v13370_v43 = vld [vmem:[#allocation2 + $0xf9] sm:$0xff]  ;;  %v13484_v19 = vld [vmem:[#allocation2 + $0xc8] sm:$0xff] }
  0x44   : > { %16961 = vst [vmem:[#allocation26_spill] sm:$0xff] %v13269_v21  ;;  %16962 = vst [vmem:[#allocation27_spill] sm:$0xff] %v13272_v22  ;;  %11023 = vmatmul.mubr.msk.f32.gmra.mrb[4].mxu1 %vm628_vm1, %v13317_v32  ;;  %v13372_v44 = vld [vmem:[#allocation2 + $0x109] sm:$0xff]  ;;  %v13378_v45 = vld [vmem:[#allocation2 + $0x111] sm:$0xff] }
  0x45   : > { %703 = vst.msk [vmem:[#allocation2 + $0x169] sm:$0xff] %vm628_vm1, %v13269_v21  ;;  %704 = vst.msk [vmem:[#allocation2 + $0x171] sm:$0xff] %vm628_vm1, %v13272_v22  ;;  %11025 = vmatprep.mubr.msk.f32.mxu1 %vm628_vm1, %v13319_v33  ;;  %v13470_v22 = vld [vmem:[#allocation2 + $0xa8] sm:$0xff]  ;;  %v13476_v21 = vld [vmem:[#allocation2 + $0xb0] sm:$0xff] }
  0x46   : > { %16963 = vst [vmem:[#allocation28_spill] sm:$0xff] %v13279_v23  ;;  %16964 = vst [vmem:[#allocation29_spill] sm:$0xff] %v13282_v24  ;;  %v13380_v46 = vld [vmem:[#allocation2 + $0x121] sm:$0xff]  ;;  %v13494_v16 = vld [vmem:[#allocation2 + $0xf0] sm:$0xff] }
  0x47   : > { %675 = vst.msk [vmem:[#allocation2 + $0x19] sm:$0xff] %vm628_vm1, %v13279_v23  ;;  %676 = vst.msk [vmem:[#allocation2 + $0x21] sm:$0xff] %vm628_vm1, %v13282_v24  ;;  %v13386_v47 = vld [vmem:[#allocation2 + $0x129] sm:$0xff]  ;;  %v13388_v48 = vld [vmem:[#allocation2 + $0x139] sm:$0xff] }
  0x48   : > { %16965 = vst [vmem:[#allocation30_spill] sm:$0xff] %v13313_v31  ;;  %677 = vst.msk [vmem:[#allocation2 + $0x31] sm:$0xff] %vm628_vm1, %v13313_v31  ;;  %11026 = vmatmul.mubr.msk.f32.gmra.mrb[6].mxu1 %vm628_vm1, %v13362_v41  ;;  %v13478_v20 = vld [vmem:[#allocation2 + $0xc0] sm:$0xff]  ;;  %v13500_v15 = vld [vmem:[#allocation2 + $0xf8] sm:$0xff] }
  0x49   : > { %16966 = vst [vmem:[#allocation31_spill] sm:$0xff] %v13324_v34  ;;  %678 = vst.msk [vmem:[#allocation2 + $0x39] sm:$0xff] %vm628_vm1, %v13324_v34  ;;  %11028 = vmatprep.mubr.msk.f32.mxu1 %vm628_vm1, %v13364_v42  ;;  %v13394_v49 = vld [vmem:[#allocation2 + $0x141] sm:$0xff]  ;;  %v13508_v13 = vld [vmem:[#allocation2 + $0x110] sm:$0xff] }
  0x4a   : > { %16967 = vst [vmem:[#allocation32_spill] sm:$0xff] %v13329_v35  ;;  %16968 = vst [vmem:[#allocation33_spill] sm:$0xff] %v13332_v36  ;;  %v13396_v50 = vld [vmem:[#allocation2 + $0x151] sm:$0xff]  ;;  %v13402_v51 = vld [vmem:[#allocation2 + $0x159] sm:$0xff] }
  0x4b   : > { %16969 = vst [vmem:[#allocation34_spill] sm:$0xff] %v13335_v37  ;;  %679 = vst.msk [vmem:[#allocation2 + $0x49] sm:$0xff] %vm628_vm1, %v13329_v35  ;;  %v13502_v14 = vld [vmem:[#allocation2 + $0x108] sm:$0xff]  ;;  %v13510_v12 = vld [vmem:[#allocation2 + $0x120] sm:$0xff] }
  0x4c   : > { %680 = vst.msk [vmem:[#allocation2 + $0x51] sm:$0xff] %vm628_vm1, %v13332_v36  ;;  %681 = vst.msk [vmem:[#allocation2 + $0x61] sm:$0xff] %vm628_vm1, %v13335_v37  ;;  %11029 = vmatmul.mubr.msk.f32.gmra.mrb[8].mxu1 %vm628_vm1, %v13370_v43  ;;  %v13404_v52 = vld [vmem:[#allocation2 + $0x169] sm:$0xff]  ;;  %v13410_v53 = vld [vmem:[#allocation2 + $0x171] sm:$0xff] }
  0x4d   : > { %16970 = vst [vmem:[#allocation35_spill] sm:$0xff] %v13344_v38  ;;  %16971 = vst [vmem:[#allocation36_spill] sm:$0xff] %v13347_v39  ;;  %11031 = vmatprep.mubr.msk.f32.mxu1 %vm628_vm1, %v13372_v44  ;;  %v13516_v11 = vld [vmem:[#allocation2 + $0x128] sm:$0xff]  ;;  %v13518_v10 = vld [vmem:[#allocation2 + $0x138] sm:$0xff] }
  0x4e   : > { %16972 = vst [vmem:[#allocation37_spill] sm:$0xff] %v13350_v40  ;;  %682 = vst.msk [vmem:[#allocation2 + $0x69] sm:$0xff] %vm628_vm1, %v13344_v38  ;;  %v13415_v56 = vld [vmem:[#allocation2 + $0x18] sm:$0xff]  ;;  %v13426_v58 = vld [vmem:[#allocation2 + $0x20] sm:$0xff] }
  0x4f   : > { %683 = vst.msk [vmem:[#allocation2 + $0x79] sm:$0xff] %vm628_vm1, %v13347_v39  ;;  %684 = vst.msk [vmem:[#allocation2 + $0x81] sm:$0xff] %vm628_vm1, %v13350_v40  ;;  %v13428_v59 = vld [vmem:[#allocation2 + $0x30] sm:$0xff]  ;;  %v13524_v9 = vld [vmem:[#allocation2 + $0x140] sm:$0xff] }
  0x50   : > { %11032 = vmatmul.mubr.msk.f32.gmra.mrb[10].mxu1 %vm628_vm1, %v13378_v45  ;;  %v13436_v60 = vld [vmem:[#allocation2 + $0x38] sm:$0xff]  ;;  %16973 = vst [vmem:[#allocation38_spill] sm:$0xff] %v13516_v11  ;;  %16974 = vst [vmem:[#allocation39_spill] sm:$0xff] %v13518_v10  ;;  %v13526_v8 = vld [vmem:[#allocation2 + $0x150] sm:$0xff] }
  0x51   : > { %11034 = vmatprep.mubr.msk.f32.mxu1 %vm628_vm1, %v13380_v46  ;;  %16975 = vst [vmem:[#allocation40_spill] sm:$0xff] %v13524_v9  ;;  %16976 = vst [vmem:[#allocation41_spill] sm:$0xff] %v13526_v8  ;;  %v13542_v5 = vld [vmem:[#allocation2 + $0x158] sm:$0xff]  ;;  %v13544_v4 = vld [vmem:[#allocation2 + $0x168] sm:$0xff] }
  0x52   : > { %v13438_v61 = vld [vmem:[#allocation2 + $0x48] sm:$0xff]  ;;  %16977 = vst [vmem:[#allocation42_spill] sm:$0xff] %v13529_v7  ;;  %705 = vst.msk [vmem:[#allocation2 + $0x181] sm:$0xff] %vm628_vm1, %v13529_v7  ;;  %v13550_v7 = vld [vmem:[#allocation2 + $0x170] sm:$0xff] }
  0x53   : > { %v13444_v62 = vld [vmem:[#allocation2 + $0x50] sm:$0xff]  ;;  %v13446_v63 = vld [vmem:[#allocation2 + $0x60] sm:$0xff]  ;;  %16978 = vst [vmem:[#allocation43_spill] sm:$0xff] %v13534_v6  ;;  %706 = vst.msk [vmem:[#allocation2 + $0x189] sm:$0xff] %vm628_vm1, %v13534_v6 }
  0x54   : > { %11035 = vmatmul.mubr.msk.f32.gmra.mrb[12].mxu1 %vm628_vm1, %v13386_v47  ;;  %16979 = vst [vmem:[#allocation44_spill] sm:$0xff] %v13542_v5  ;;  %16980 = vst [vmem:[#allocation45_spill] sm:$0xff] %v13544_v4  ;;  %v1424_v6 = vld [vmem:[#allocation2 + $0xa] sm:$0xff]  ;;  %v13555_v40 = vld [vmem:[#allocation2 + $0x1a] sm:$0xff] }
  0x55   : > { %11037 = vmatprep.mubr.msk.f32.mxu1 %vm628_vm1, %v13388_v48  ;;  %v13452_v1 = vld [vmem:[#allocation2 + $0x68] sm:$0xff]  ;;  %16981 = vst [vmem:[#allocation46_spill] sm:$0xff] %v13550_v7  ;;  %v13560_v39 = vld [vmem:[%s16940_s4 + $0x10] sm:$0xf]  ;;  %v13609_v23 = vld [vmem:[#allocation2 + $0x9a] sm:$0xff] }
  0x56   : > { %v13567_v38 = vld [vmem:[#allocation2 + $0x22] sm:$0xff]  ;;  %v13569_v37 = vld [vmem:[#allocation2 + $0x32] sm:$0xff]  ;;  %v13593_v35 = vld [vmem:[#allocation2 + $0x6a] sm:$0xff]  ;;  %16986 = vst [vmem:[#allocation51_spill] sm:$0xff] %v13609_v23 }
  0x57   : > { %v13587_v36 = vld [vmem:[#allocation2 + $0x62] sm:$0xff]  ;;  %16982 = vst [vmem:[#allocation47_spill] sm:$0xff] %v13593_v35  ;;  %v13595_v34 = vld [vmem:[#allocation2 + $0x7a] sm:$0xff]  ;;  %v13603_v24 = vld [vmem:[#allocation2 + $0x92] sm:$0xff] }
  0x58   : > { %11038 = vmatmul.mubr.msk.f32.gmra.mrb[14].mxu1 %vm628_vm1, %v13394_v49  ;;  %16983 = vst [vmem:[#allocation48_spill] sm:$0xff] %v13595_v34  ;;  %v13601_v31 = vld [vmem:[#allocation2 + $0x82] sm:$0xff]  ;;  %16985 = vst [vmem:[#allocation50_spill] sm:$0xff] %v13603_v24 }
  0x59   : > { %11040 = vmatprep.mubr.msk.f32.mxu1 %vm628_vm1, %v13396_v50  ;;  %16984 = vst [vmem:[#allocation49_spill] sm:$0xff] %v13601_v31  ;;  %16987 = vst [vmem:[#allocation52_spill] sm:$0xff] %v13611_v0 }
  0x5c   : > { %11041 = vmatmul.mubr.msk.f32.gmra.mrb[16].mxu1 %vm628_vm1, %v13402_v51 }
  0x5d   : > { %11043 = vmatprep.mubr.msk.f32.mxu1 %vm628_vm1, %v13404_v52 }
  0x60   : > { %11044 = vmatmul.mubr.msk.f32.gmra.mrb[18].mxu1 %vm628_vm1, %v13410_v53 }
  0x61   : > { %11048 = vmatprep.mubr.msk.f32.mxu1 %vm628_vm1, %v708_v54  ;;  %v13460_v54 = vld [vmem:[#allocation2 + $0x80] sm:$0xff] }
  0x64   : > { %11049 = vmatmul.mubr.msk.f32.vlgmr.msra.gmra.mrb[20].mxu1 %vm628_vm1, %v709_v55  ;;  %v13462_v55 = vld [vmem:[#allocation2 + $0x90] sm:$0xff] }
  0x65   : > { %11097 = vmatpush3.msk.msra.mxu1 %vm870_vm0, %v1455_v28  ;;  %11051 = vmatprep.mubr.msk.f32.mxu1 %vm628_vm1, %v13415_v56  ;;  %v13454_v28 = vld [vmem:[#allocation2 + $0x78] sm:$0xff] }
  0x66   : > { %11146 = vmatprep.subr.msk.mxu1 %vm870_vm0, %v13420_v57 }
  0x68   : > { %11052 = vmatmul.mubr.msk.f32.gmra.mrb[22].mxu1 %vm628_vm1, %v13426_v58 }
  0x69   : > { %11054 = vmatprep.mubr.msk.f32.mxu1 %vm628_vm1, %v13428_v59 }
  0x6c   : > { %11055 = vmatmul.mubr.msk.f32.gmra.mrb[24].mxu1 %vm628_vm1, %v13436_v60 }
  0x6d   : > { %11057 = vmatprep.mubr.msk.f32.mxu1 %vm628_vm1, %v13438_v61 }
  0x70   : > { %11058 = vmatmul.mubr.msk.f32.gmra.mrb[26].mxu1 %vm628_vm1, %v13444_v62 }
  0x71   : > { %11060 = vmatprep.mubr.msk.f32.mxu1 %vm628_vm1, %v13446_v63 }
  0x74   : > { %11061 = vmatmul.mubr.msk.f32.gmra.mrb[28].mxu1 %vm628_vm1, %v13452_v1 }
  0x75   : > { %11063 = vmatprep.mubr.msk.f32.mxu1 %vm628_vm1, %v13454_v28 }
  0x78   : > { %11064 = vmatmul.mubr.msk.f32.gmra.mrb[30].mxu1 %vm628_vm1, %v13460_v54 }
  0x79   : > { %11066 = vmatprep.mubr.msk.f32.mxu1 %vm628_vm1, %v13462_v55 }
  0x7c   : > { %11067 = vmatmul.mubr.msk.f32.gmra.mrb[0].mxu1 %vm628_vm1, %v13468_v2 }
  0x7d   : > { %11069 = vmatprep.mubr.msk.f32.mxu1 %vm628_vm1, %v13470_v22 }
  0x80   : > { %11070 = vmatmul.mubr.msk.f32.gmra.mrb[2].mxu1 %vm628_vm1, %v13476_v21 }
  0x81   : > { %11072 = vmatprep.mubr.msk.f32.mxu1 %vm628_vm1, %v13478_v20 }
  0x84   : > { %11073 = vmatmul.mubr.msk.f32.gmra.mrb[4].mxu1 %vm628_vm1, %v13484_v19 }
  0x85   : > { %11075 = vmatprep.mubr.msk.f32.mxu1 %vm628_vm1, %v13486_v18 }
  0x88   : > { %11076 = vmatmul.mubr.msk.f32.gmra.mrb[6].mxu1 %vm628_vm1, %v13492_v17 }
  0x89   : > { %11078 = vmatprep.mubr.msk.f32.mxu1 %vm628_vm1, %v13494_v16 }
  0x8c   : > { %11079 = vmatmul.mubr.msk.f32.gmra.mrb[8].mxu1 %vm628_vm1, %v13500_v15 }
  0x8d   : > { %11081 = vmatprep.mubr.msk.f32.mxu1 %vm628_vm1, %v13502_v14 }
  0x90   : > { %11082 = vmatmul.mubr.msk.f32.gmra.mrb[10].mxu1 %vm628_vm1, %v13508_v13 }
  0x91   : > { %11084 = vmatprep.mubr.msk.f32.mxu1 %vm628_vm1, %v13510_v12 }
  0x94   : > { %11085 = vmatmul.mubr.msk.f32.gmra.mrb[12].mxu1 %vm628_vm1, %v13516_v11 }
  0x95   : > { %11087 = vmatprep.mubr.msk.f32.mxu1 %vm628_vm1, %v13518_v10 }
  0x98   : > { %11088 = vmatmul.mubr.msk.f32.gmra.mrb[14].mxu1 %vm628_vm1, %v13524_v9 }
  0x99   : > { %11090 = vmatprep.mubr.msk.f32.mxu1 %vm628_vm1, %v13526_v8 }
  0x9c   : > { %11091 = vmatmul.mubr.msk.f32.gmra.mrb[16].mxu1 %vm628_vm1, %v13542_v5 }
  0x9d   : > { %11093 = vmatprep.mubr.msk.f32.mxu1 %vm628_vm1, %v13544_v4 }
  0xa0   : > { %11094 = vmatmul.mubr.msk.f32.gmra.mrb[18].mxu1 %vm628_vm1, %v13550_v7 }
  0xa1   : > { %11098 = vmatprep.mubr.msk.f32.mxu1 %vm628_vm1, %v1423_v3  ;;  %v13577_v3 = vld [vmem:[#allocation2 + $0x3a] sm:$0xff] }
  0xa4   : > { %11099 = vmatmul.mubr.msk.f32.vlgmr.msra.gmra.mrb[20].mxu1 %vm628_vm1, %v1424_v6  ;;  %v13579_v6 = vld [vmem:[#allocation2 + $0x4a] sm:$0xff] }
  0xa5   : > { %11147 = vmatpush3.msk.msra.mxu1 %vm870_vm0, %v13420_v57  ;;  %11101 = vmatprep.mubr.msk.f32.mxu1 %vm628_vm1, %v13555_v40  ;;  %v13585_v57 = vld [vmem:[#allocation2 + $0x52] sm:$0xff] }
  0xa6   : > { %11196 = vmatprep.subr.msk.mxu1 %vm870_vm0, %v13560_v39 }
  0xa8   : > { %11102 = vmatmul.mubr.msk.f32.gmra.mrb[22].mxu1 %vm628_vm1, %v13567_v38 }
  0xa9   : > { %11104 = vmatprep.mubr.msk.f32.mxu1 %vm628_vm1, %v13569_v37 }
  0xac   : > { %11105 = vmatmul.mubr.msk.f32.gmra.mrb[24].mxu1 %vm628_vm1, %v13577_v3 }
  0xad   : > { %11107 = vmatprep.mubr.msk.f32.mxu1 %vm628_vm1, %v13579_v6 }
  0xb0   : > { %11108 = vmatmul.mubr.msk.f32.gmra.mrb[26].mxu1 %vm628_vm1, %v13585_v57 }
  0xb1   : > { %11110 = vmatprep.mubr.msk.f32.mxu1 %vm628_vm1, %v13587_v36 }
  0xb4   : > { %11111 = vmatmul.mubr.msk.f32.gmra.mrb[28].mxu1 %vm628_vm1, %v13593_v35  ;;  %v13619_v35 = vld [vmem:[#allocation2 + $0xc2] sm:$0xff] }
  0xb5   : > { %11113 = vmatprep.mubr.msk.f32.mxu1 %vm628_vm1, %v13595_v34  ;;  %v13617_v34 = vld [vmem:[#allocation2 + $0xb2] sm:$0xff]  ;;  %16989 = vst [vmem:[#allocation54_spill] sm:$0xff] %v13619_v35 }
  0xb6   : > { %16988 = vst [vmem:[#allocation53_spill] sm:$0xff] %v13617_v34 }
  0xb8   : > { %11114 = vmatmul.mubr.msk.f32.gmra.mrb[30].mxu1 %vm628_vm1, %v13601_v31  ;;  %v13627_v31 = vld [vmem:[#allocation2 + $0xda] sm:$0xff] }
  0xb9   : > { %11116 = vmatprep.mubr.msk.f32.mxu1 %vm628_vm1, %v13603_v24  ;;  %v13625_v24 = vld [vmem:[#allocation2 + $0xca] sm:$0xff]  ;;  %16991 = vst [vmem:[#allocation56_spill] sm:$0xff] %v13627_v31 }
  0xba   : > { %16990 = vst [vmem:[#allocation55_spill] sm:$0xff] %v13625_v24 }
  0xbc   : > { %11117 = vmatmul.mubr.msk.f32.gmra.mrb[0].mxu1 %vm628_vm1, %v13609_v23  ;;  %v13635_v23 = vld [vmem:[#allocation2 + $0xf2] sm:$0xff] }
  0xbd   : > { %11119 = vmatprep.mubr.msk.f32.mxu1 %vm628_vm1, %v13611_v0  ;;  %v13633_v0 = vld [vmem:[#allocation2 + $0xe2] sm:$0xff]  ;;  %16993 = vst [vmem:[#allocation58_spill] sm:$0xff] %v13635_v23 }
  0xbe   : > { %16992 = vst [vmem:[#allocation57_spill] sm:$0xff] %v13633_v0 }
  0xc0   : > { %11120 = vmatmul.mubr.msk.f32.gmra.mrb[2].mxu1 %vm628_vm1, %v13617_v34  ;;  %v13643_v34 = vld [vmem:[#allocation2 + $0x10a] sm:$0xff] }
  0xc1   : > { %11122 = vmatprep.mubr.msk.f32.mxu1 %vm628_vm1, %v13619_v35  ;;  %v13641_v35 = vld [vmem:[#allocation2 + $0xfa] sm:$0xff]  ;;  %16995 = vst [vmem:[#allocation60_spill] sm:$0xff] %v13643_v34 }
  0xc2   : > { %16994 = vst [vmem:[#allocation59_spill] sm:$0xff] %v13641_v35 }
  0xc4   : > { %11123 = vmatmul.mubr.msk.f32.gmra.mrb[4].mxu1 %vm628_vm1, %v13625_v24  ;;  %v13651_v24 = vld [vmem:[#allocation2 + $0x122] sm:$0xff] }
  0xc5   : > { %11125 = vmatprep.mubr.msk.f32.mxu1 %vm628_vm1, %v13627_v31  ;;  %v13649_v31 = vld [vmem:[#allocation2 + $0x112] sm:$0xff]  ;;  %16997 = vst [vmem:[#allocation62_spill] sm:$0xff] %v13651_v24 }
  0xc6   : > { %16996 = vst [vmem:[#allocation61_spill] sm:$0xff] %v13649_v31 }
  0xc8   : > { %11126 = vmatmul.mubr.msk.f32.gmra.mrb[6].mxu1 %vm628_vm1, %v13633_v0  ;;  %v13659_v0 = vld [vmem:[#allocation2 + $0x13a] sm:$0xff] }
  0xc9   : > { %11128 = vmatprep.mubr.msk.f32.mxu1 %vm628_vm1, %v13635_v23  ;;  %v13657_v23 = vld [vmem:[#allocation2 + $0x12a] sm:$0xff]  ;;  %16999 = vst [vmem:[#allocation64_spill] sm:$0xff] %v13659_v0 }
  0xca   : > { %16998 = vst [vmem:[#allocation63_spill] sm:$0xff] %v13657_v23 }
  0xcc   : > { %11129 = vmatmul.mubr.msk.f32.gmra.mrb[8].mxu1 %vm628_vm1, %v13641_v35  ;;  %v13667_v35 = vld [vmem:[#allocation2 + $0x152] sm:$0xff] }
  0xcd   : > { %11131 = vmatprep.mubr.msk.f32.mxu1 %vm628_vm1, %v13643_v34  ;;  %v13665_v34 = vld [vmem:[#allocation2 + $0x142] sm:$0xff]  ;;  %17001 = vst [vmem:[#allocation66_spill] sm:$0xff] %v13667_v35 }
  0xce   : > { %17000 = vst [vmem:[#allocation65_spill] sm:$0xff] %v13665_v34 }
  0xd0   : > { %11132 = vmatmul.mubr.msk.f32.gmra.mrb[10].mxu1 %vm628_vm1, %v13649_v31  ;;  %v13675_v31 = vld [vmem:[#allocation2 + $0x16a] sm:$0xff] }
  0xd1   : > { %11134 = vmatprep.mubr.msk.f32.mxu1 %vm628_vm1, %v13651_v24  ;;  %v13673_v24 = vld [vmem:[#allocation2 + $0x15a] sm:$0xff]  ;;  %17003 = vst [vmem:[#allocation68_spill] sm:$0xff] %v13675_v31 }
  0xd2   : > { %17002 = vst [vmem:[#allocation67_spill] sm:$0xff] %v13673_v24 }
  0xd4   : > { %11135 = vmatmul.mubr.msk.f32.gmra.mrb[12].mxu1 %vm628_vm1, %v13657_v23 }
  0xd5   : > { %11137 = vmatprep.mubr.msk.f32.mxu1 %vm628_vm1, %v13659_v0  ;;  %v13681_v0 = vld [vmem:[#allocation2 + $0x172] sm:$0xff] }
  0xd8   : > { %11138 = vmatmul.mubr.msk.f32.gmra.mrb[14].mxu1 %vm628_vm1, %v13665_v34 }
  0xd9   : > { %11140 = vmatprep.mubr.msk.f32.mxu1 %vm628_vm1, %v13667_v35  ;;  %v2622_v35 = vld [vmem:[%s16940_s4 + $0x14] sm:$0xf] }
  0xdc   : > { %11141 = vmatmul.mubr.msk.f32.gmra.mrb[16].mxu1 %vm628_vm1, %v13673_v24 }
  0xdd   : > { %11143 = vmatprep.mubr.msk.f32.mxu1 %vm628_vm1, %v13675_v31 }
  0xe0   : > { %11144 = vmatmul.mubr.msk.f32.gmra.mrb[18].mxu1 %vm628_vm1, %v13681_v0 }
  0xe1   : > { %11148 = vmatprep.mubr.msk.f32.mxu1 %vm628_vm1, %v13415_v56  ;;  %v13755_v56 = vld [vmem:[#allocation2 + $0x188] sm:$0xff] }
  0xe2   : > { %17005 = vst [vmem:[#allocation70_spill] sm:$0xff] %v13755_v56 }
  0xe4   : > { %11149 = vmatmul.mubr.msk.f32.vlgmr.msra.gmra.mrb[20].mxu1 %vm628_vm1, %v13426_v58  ;;  %v13757_v58 = vld [vmem:[#allocation2 + $0x19] sm:$0xff] }
  0xe5   : > { %11197 = vmatpush3.msk.msra.mxu1 %vm870_vm0, %v13560_v39  ;;  %11151 = vmatprep.mubr.msk.f32.mxu1 %vm628_vm1, %v13428_v59  ;;  %v13749_v39 = vld [vmem:[#allocation2 + $0x180] sm:$0xff] }
  0xe6   : > { %11246 = vmatprep.subr.msk.mxu1 %vm870_vm0, %v2622_v35  ;;  %17004 = vst [vmem:[#allocation69_spill] sm:$0xff] %v13749_v39 }
  0xe8   : > { %11152 = vmatmul.mubr.msk.f32.gmra.mrb[22].mxu1 %vm628_vm1, %v13436_v60 }
  0xe9   : > { %11154 = vmatprep.mubr.msk.f32.mxu1 %vm628_vm1, %v13438_v61 }
  0xec   : > { %11155 = vmatmul.mubr.msk.f32.gmra.mrb[24].mxu1 %vm628_vm1, %v13444_v62 }
  0xed   : > { %11157 = vmatprep.mubr.msk.f32.mxu1 %vm628_vm1, %v13446_v63 }
  0xf0   : > { %11158 = vmatmul.mubr.msk.f32.gmra.mrb[26].mxu1 %vm628_vm1, %v13452_v1 }
  0xf1   : > { %11160 = vmatprep.mubr.msk.f32.mxu1 %vm628_vm1, %v13454_v28 }
  0xf4   : > { %11161 = vmatmul.mubr.msk.f32.gmra.mrb[28].mxu1 %vm628_vm1, %v13460_v54 }
  0xf5   : > { %11163 = vmatprep.mubr.msk.f32.mxu1 %vm628_vm1, %v13462_v55 }
  0xf8   : > { %11164 = vmatmul.mubr.msk.f32.gmra.mrb[30].mxu1 %vm628_vm1, %v13468_v2 }
  0xf9   : > { %11166 = vmatprep.mubr.msk.f32.mxu1 %vm628_vm1, %v13470_v22 }
  0xfc   : > { %11167 = vmatmul.mubr.msk.f32.gmra.mrb[0].mxu1 %vm628_vm1, %v13476_v21 }
  0xfd   : > { %11169 = vmatprep.mubr.msk.f32.mxu1 %vm628_vm1, %v13478_v20 }
 0x100   : > { %11170 = vmatmul.mubr.msk.f32.gmra.mrb[2].mxu1 %vm628_vm1, %v13484_v19 }
 0x101   : > { %11172 = vmatprep.mubr.msk.f32.mxu1 %vm628_vm1, %v13486_v18 }
 0x104   : > { %11173 = vmatmul.mubr.msk.f32.gmra.mrb[4].mxu1 %vm628_vm1, %v13492_v17 }
 0x105   : > { %11175 = vmatprep.mubr.msk.f32.mxu1 %vm628_vm1, %v13494_v16 }
 0x108   : > { %11176 = vmatmul.mubr.msk.f32.gmra.mrb[6].mxu1 %vm628_vm1, %v13500_v15 }
 0x109   : > { %11178 = vmatprep.mubr.msk.f32.mxu1 %vm628_vm1, %v13502_v14 }
 0x10c   : > { %11179 = vmatmul.mubr.msk.f32.gmra.mrb[8].mxu1 %vm628_vm1, %v13508_v13 }
 0x10d   : > { %11181 = vmatprep.mubr.msk.f32.mxu1 %vm628_vm1, %v13510_v12 }
 0x110   : > { %11182 = vmatmul.mubr.msk.f32.gmra.mrb[10].mxu1 %vm628_vm1, %v13516_v11  ;;  %v13800_v11 = vld [vmem:[#allocation2 + $0x81] sm:$0xff] }
 0x111   : > { %11184 = vmatprep.mubr.msk.f32.mxu1 %vm628_vm1, %v13518_v10  ;;  %v13794_v10 = vld [vmem:[#allocation2 + $0x79] sm:$0xff] }
 0x114   : > { %11185 = vmatmul.mubr.msk.f32.gmra.mrb[12].mxu1 %vm628_vm1, %v13524_v9  ;;  %v13786_v9 = vld [vmem:[#allocation2 + $0x61] sm:$0xff] }
 0x115   : > { %11187 = vmatprep.mubr.msk.f32.mxu1 %vm628_vm1, %v13526_v8  ;;  %v13784_v8 = vld [vmem:[#allocation2 + $0x51] sm:$0xff] }
 0x118   : > { %11188 = vmatmul.mubr.msk.f32.gmra.mrb[14].mxu1 %vm628_vm1, %v13542_v5  ;;  %v13763_v5 = vld [vmem:[#allocation2 + $0x21] sm:$0xff] }
 0x119   : > { %11190 = vmatprep.mubr.msk.f32.mxu1 %vm628_vm1, %v13544_v4  ;;  %v13765_v4 = vld [vmem:[#allocation2 + $0x31] sm:$0xff] }
 0x11c   : > { %11191 = vmatmul.mubr.msk.f32.gmra.mrb[16].mxu1 %vm628_vm1, %v13550_v7  ;;  %v3012_v7 = vld [vmem:[%s16940_s4 + $0x18] sm:$0xf] }
 0x11d   : > { %11193 = vmatprep.mubr.msk.f32.mxu1 %vm628_vm1, %v13749_v39  ;;  %v13777_v39 = vld [vmem:[#allocation2 + $0x49] sm:$0xff] }
 0x120   : > { %11194 = vmatmul.mubr.msk.f32.gmra.mrb[18].mxu1 %vm628_vm1, %v13755_v56  ;;  %v13775_v56 = vld [vmem:[#allocation2 + $0x39] sm:$0xff] }
 0x121   : > { %11198 = vmatprep.mubr.msk.f32.mxu1 %vm628_vm1, %v13757_v58 }
 0x124   : > { %11199 = vmatmul.mubr.msk.f32.vlgmr.msra.gmra.mrb[20].mxu1 %vm628_vm1, %v13763_v5 }
 0x125   : > { %11247 = vmatpush3.msk.msra.mxu1 %vm870_vm0, %v2622_v35  ;;  %11201 = vmatprep.mubr.msk.f32.mxu1 %vm628_vm1, %v13765_v4  ;;  %v13792_v35 = vld [vmem:[#allocation2 + $0x69] sm:$0xff] }
 0x126   : > { %11296 = vmatprep.subr.msk.mxu1 %vm870_vm0, %v3012_v7 }
 0x128   : > { %11202 = vmatmul.mubr.msk.f32.gmra.mrb[22].mxu1 %vm628_vm1, %v13775_v56 }
 0x129   : > { %11204 = vmatprep.mubr.msk.f32.mxu1 %vm628_vm1, %v13777_v39 }
 0x12c   : > { %11205 = vmatmul.mubr.msk.f32.gmra.mrb[24].mxu1 %vm628_vm1, %v13784_v8 }
 0x12d   : > { %11207 = vmatprep.mubr.msk.f32.mxu1 %vm628_vm1, %v13786_v9 }
 0x130   : > { %11208 = vmatmul.mubr.msk.f32.gmra.mrb[26].mxu1 %vm628_vm1, %v13792_v35 }
 0x131   : > { %11210 = vmatprep.mubr.msk.f32.mxu1 %vm628_vm1, %v13794_v10 }
 0x134   : > { %11211 = vmatmul.mubr.msk.f32.gmra.mrb[28].mxu1 %vm628_vm1, %v13800_v11 }
 0x135   : > { %11213 = vmatprep.mubr.msk.f32.mxu1 %vm628_vm1, %v13284_v25  ;;  %v13842_v25 = vld [vmem:[#allocation2 + $0x181] sm:$0xff] }
 0x138   : > { %11214 = vmatmul.mubr.msk.f32.gmra.mrb[30].mxu1 %vm628_vm1, %v13286_v26  ;;  %v13848_v26 = vld [vmem:[#allocation2 + $0x189] sm:$0xff] }
 0x139   : > { %11216 = vmatprep.mubr.msk.f32.mxu1 %vm628_vm1, %v13288_v27  ;;  %v13857_v27 = vld [vmem:[%s16940_s4 + $0x1c] sm:$0xf] }
 0x13c   : > { %11217 = vmatmul.mubr.msk.f32.gmra.mrb[0].mxu1 %vm628_vm1, %v13305_v29  ;;  %v17007_v29 = vld [vmem:[#allocation48_spill] sm:$0xff] }
 0x13d   : > { %11219 = vmatprep.mubr.msk.f32.mxu1 %vm628_vm1, %v13307_v30  ;;  %v17008_v30 = vld [vmem:[#allocation49_spill] sm:$0xff] }
 0x140   : > { %11220 = vmatmul.mubr.msk.f32.gmra.mrb[2].mxu1 %vm628_vm1, %v13317_v32  ;;  %v17009_v32 = vld [vmem:[#allocation50_spill] sm:$0xff] }
 0x141   : > { %11222 = vmatprep.mubr.msk.f32.mxu1 %vm628_vm1, %v13319_v33  ;;  %v17010_v33 = vld [vmem:[#allocation51_spill] sm:$0xff] }
 0x144   : > { %11223 = vmatmul.mubr.msk.f32.gmra.mrb[4].mxu1 %vm628_vm1, %v13362_v41  ;;  %v17013_v41 = vld [vmem:[#allocation54_spill] sm:$0xff] }
 0x145   : > { %11225 = vmatprep.mubr.msk.f32.mxu1 %vm628_vm1, %v13364_v42  ;;  %v17014_v42 = vld [vmem:[#allocation55_spill] sm:$0xff] }
 0x148   : > { %11226 = vmatmul.mubr.msk.f32.gmra.mrb[6].mxu1 %vm628_vm1, %v13370_v43  ;;  %v17015_v43 = vld [vmem:[#allocation56_spill] sm:$0xff] }
 0x149   : > { %11228 = vmatprep.mubr.msk.f32.mxu1 %vm628_vm1, %v13372_v44  ;;  %v509_v44 = vld [vmem:[%s506_s17] sm:$0x1]  ;;  %s10331_s17 = sshll.u32 %s13041_s22, 9  ;;  %s12937_s22 = smov [#allocation4]  }
 0x14a   : > { %s16718_s1 = scalar_lea.hbm %s16776_s15, %s10331_s17 }
 0x14c   : > { %11229 = vmatmul.mubr.msk.f32.gmra.mrb[8].mxu1 %vm628_vm1, %v13378_v45  ;;  %v9632_v45 = vmul.f32 -1.442695, %v509_v44 }
 0x14d   : > { %11231 = vmatprep.mubr.msk.f32.mxu1 %vm628_vm1, %v13380_v46  ;;  %v17017_v46 = vld [vmem:[#allocation57_spill] sm:$0xff] }
 0x14e   : > { %12605 = vpow2.f32 %v9632_v45  ;;  %v17024_v45 = vld [vmem:[#allocation66_spill] sm:$0xff] }
 0x150   : > { %11232 = vmatmul.mubr.msk.f32.gmra.mrb[10].mxu1 %vm628_vm1, %v13386_v47  ;;  %v17018_v47 = vld [vmem:[#allocation58_spill] sm:$0xff] }
 0x151   : > { %11234 = vmatprep.mubr.msk.f32.mxu1 %vm628_vm1, %v13388_v48  ;;  %v17019_v48 = vld [vmem:[#allocation59_spill] sm:$0xff] }
 0x154   : > { %11235 = vmatmul.mubr.msk.f32.gmra.mrb[12].mxu1 %vm628_vm1, %v13394_v49  ;;  %v17020_v49 = vld [vmem:[#allocation60_spill] sm:$0xff] }
 0x155   : > { %11237 = vmatprep.mubr.msk.f32.mxu1 %vm628_vm1, %v13396_v50  ;;  %v17021_v50 = vld [vmem:[#allocation61_spill] sm:$0xff] }
 0x158   : > { %11238 = vmatmul.mubr.msk.f32.gmra.mrb[14].mxu1 %vm628_vm1, %v13402_v51  ;;  %v17022_v51 = vld [vmem:[#allocation62_spill] sm:$0xff] }
 0x159   : > { %11240 = vmatprep.mubr.msk.f32.mxu1 %vm628_vm1, %v13404_v52  ;;  %v12606_v52 = vpop.eup %12605 }
 0x15c   : > { %11241 = vmatmul.mubr.msk.f32.gmra.mrb[16].mxu1 %vm628_vm1, %v13410_v53  ;;  %v513_v53 = vadd.f32 1.0, %v12606_v52  ;;  %v518_v52 = vld [vmem:[%s17025_s2 + $0x8] sm:$0xff] }
 0x15d   : > { %11243 = vmatprep.mubr.msk.f32.mxu1 %vm628_vm1, %v13842_v25 }
 0x15e   : > { %12607 = vrcp.f32 %v513_v53  ;;  %v519_v53 = vld [vmem:[%s17025_s2 + $0x10] sm:$0xff] }
 0x160   : > { %11244 = vmatmul.mubr.msk.f32.gmra.mrb[18].mxu1 %vm628_vm1, %v13848_v26 }
 0x161   : > { %11248 = vmatprep.mubr.msk.f32.mxu1 %vm628_vm1, %v13555_v40  ;;  %v17012_v40 = vld [vmem:[#allocation53_spill] sm:$0xff] }
 0x164   : > { %11249 = vmatmul.mubr.msk.f32.vlgmr.msra.gmra.mrb[20].mxu1 %vm628_vm1, %v13567_v38  ;;  %v17011_v38 = vld [vmem:[#allocation52_spill] sm:$0xff] }
 0x165   : > { %11297 = vmatpush3.msk.msra.mxu1 %vm870_vm0, %v3012_v7  ;;  %11251 = vmatprep.mubr.msk.f32.mxu1 %vm628_vm1, %v13569_v37  ;;  %v17006_v7 = vld [vmem:[#allocation47_spill] sm:$0xff] }
 0x166   : > { %11346 = vmatprep.subr.msk.mxu1 %vm870_vm0, %v13857_v27 }
 0x168   : > { %11252 = vmatmul.mubr.msk.f32.gmra.mrb[22].mxu1 %vm628_vm1, %v13577_v3 }
 0x169   : > { %11254 = vmatprep.mubr.msk.f32.mxu1 %vm628_vm1, %v13579_v6 }
 0x16c   : > { %11255 = vmatmul.mubr.msk.f32.gmra.mrb[24].mxu1 %vm628_vm1, %v13585_v57 }
 0x16d   : > { %11257 = vmatprep.mubr.msk.f32.mxu1 %vm628_vm1, %v13587_v36 }
 0x170   : > { %11258 = vmatmul.mubr.msk.f32.gmra.mrb[26].mxu1 %vm628_vm1, %v17006_v7 }
 0x171   : > { %11260 = vmatprep.mubr.msk.f32.mxu1 %vm628_vm1, %v17007_v29 }
 0x174   : > { %11261 = vmatmul.mubr.msk.f32.gmra.mrb[28].mxu1 %vm628_vm1, %v17008_v30 }
 0x175   : > { %11263 = vmatprep.mubr.msk.f32.mxu1 %vm628_vm1, %v17009_v32 }
 0x178   : > { %11264 = vmatmul.mubr.msk.f32.gmra.mrb[30].mxu1 %vm628_vm1, %v17010_v33 }
 0x179   : > { %11266 = vmatprep.mubr.msk.f32.mxu1 %vm628_vm1, %v17011_v38 }
 0x17c   : > { %11267 = vmatmul.mubr.msk.f32.gmra.mrb[0].mxu1 %vm628_vm1, %v17012_v40 }
 0x17d   : > { %11269 = vmatprep.mubr.msk.f32.mxu1 %vm628_vm1, %v17013_v41 }
 0x180   : > { %11270 = vmatmul.mubr.msk.f32.gmra.mrb[2].mxu1 %vm628_vm1, %v17014_v42 }
 0x181   : > { %11272 = vmatprep.mubr.msk.f32.mxu1 %vm628_vm1, %v17015_v43 }
 0x184   : > { %11273 = vmatmul.mubr.msk.f32.gmra.mrb[4].mxu1 %vm628_vm1, %v17017_v46  ;;  %v17023_v46 = vld [vmem:[#allocation64_spill] sm:$0xff] }
 0x185   : > { %11275 = vmatprep.mubr.msk.f32.mxu1 %vm628_vm1, %v17018_v47 }
 0x188   : > { %11276 = vmatmul.mubr.msk.f32.gmra.mrb[6].mxu1 %vm628_vm1, %v17019_v48 }
 0x189   : > { %11278 = vmatprep.mubr.msk.f32.mxu1 %vm628_vm1, %v17020_v49  ;;  %v16860_v49 = vmov 0.0|0.0  }
 0x18a   : > { %11992 = vmatprep.subr.bf16.mxu0 %v16860_v49 }
 0x18c   : > { %11279 = vmatmul.mubr.msk.f32.gmra.mrb[8].mxu1 %vm628_vm1, %v17021_v50 }
 0x18d   : > { %11281 = vmatprep.mubr.msk.f32.mxu1 %vm628_vm1, %v17022_v51  ;;  %v517_v51 = vld [vmem:[%s17025_s2] sm:$0xff] }
 0x190   : > { %11282 = vmatmul.mubr.msk.f32.gmra.mrb[10].mxu1 %vm628_vm1, %v13657_v23  ;;  %v11993_v23 = vpack.c.bf16 %v518_v52, %v517_v51  ;;  %v12608_v52 = vpop.eup %12607 }
 0x191   : > { %11284 = vmatprep.mubr.msk.f32.mxu1 %vm628_vm1, %v17023_v46 }
 0x192   : > { %11994 = vmatpush3.bf16.msra.mxu0 %v11993_v23  ;;  %v13942_v23 = vld [vmem:[#allocation2 + $0x18a] sm:$0xff] }
 0x193   : > { %11995 = vmatprep.subr.bf16.mxu0 %v16860_v49  ;;  %v17026_v49 = vmov 0.0  }
 0x194   : > { %11285 = vmatmul.mubr.msk.f32.gmra.mrb[12].mxu1 %vm628_vm1, %v13665_v34  ;;  %v13936_v34 = vld [vmem:[#allocation2 + $0x182] sm:$0xff]  ;;  %10993 = vmatprep.mubr.msk.f32.mxu0 %vm12935_vm5, %v17026_v49  ;;  %4917 = vst.msk [vmem:[#allocation3] sm:$0xff] %vm4187_vm6, %v17026_v49  ;;  %4918 = vst.msk [vmem:[#allocation3 + $0x8] sm:$0xff] %vm4187_vm6, %v17026_v49 }
 0x195   : > { %11287 = vmatprep.mubr.msk.f32.mxu1 %vm628_vm1, %v17024_v45  ;;  %v520_v45 = vld [vmem:[%s17025_s2 + $0x18] sm:$0xff]  ;;  %4922 = vst.msk [vmem:[#allocation3 + $0x198] sm:$0xff] %vm4187_vm6, %v17026_v49  ;;  %4923 = vst.msk [vmem:[#allocation3 + $0x1a0] sm:$0xff] %vm4187_vm6, %v17026_v49  ;;  %s12869_s2 = scalar_lea.vmem %s16713_s16, 512 }
 0x196   : > { %v11996_v51 = vpack.c.bf16 %v520_v45, %v519_v53  ;;  %v741_v45 = vld [vmem:[#allocation2 + $0x1] sm:$0xff]  ;;  %v742_v53 = vld [vmem:[#allocation2 + $0x9] sm:$0xff]  ;;  %4920 = vst.msk [vmem:[#allocation3 + $0x10] sm:$0x3] %vm4919_vm7, %v17026_v49  ;;  %4924 = vst.msk [vmem:[#allocation3 + $0x1a8] sm:$0x3] %vm4919_vm7, %v17026_v49  ;;  %p12870_p11 = scmp.ne.s32.totalorder %s16713_s16, %s12869_s2 }
 0x197   : > { %4926 = vst.msk [vmem:[#allocation3] sm:$0x1] %vm4925_vm8, %v17026_v49  ;;  %4927 = vst.msk [vmem:[#allocation3 + $0x18] sm:$0x1] %vm4925_vm8, %v17026_v49 }
 0x198   : > { %11288 = vmatmul.mubr.msk.f32.gmra.mrb[14].mxu1 %vm628_vm1, %v13673_v24  ;;  %11997 = vmatpush3.bf16.msra.mxu0 %v11996_v51  ;;  %v17027_v24 = vld [vmem:[#allocation7_spill] sm:$0xff]  ;;  %v17028_v51 = vmov 0.0|0.0   ;;  %4928 = vst.msk [vmem:[#allocation3 + $0x30] sm:$0x1] %vm4925_vm8, %v17026_v49  ;;  %4929 = vst.msk [vmem:[#allocation3 + $0x48] sm:$0x1] %vm4925_vm8, %v17026_v49  ;;  %p12871_p12 = pnand %p12870_p11, %p13058_p5 }
 0x199   : > { %11290 = vmatprep.mubr.msk.f32.mxu1 %vm628_vm1, %v13675_v31  ;;  %v516_v31 = vmul.f32 %v12608_v52, %v509_v44  ;;  %10996 = vmatprep.subr.msk.mxu0 %vm870_vm0, %v17027_v24  ;;  %v3790_v44 = vld [vmem:[%s16940_s4 + $0x20] sm:$0xf]  ;;  %4930 = vst.msk [vmem:[#allocation3 + $0x60] sm:$0x1] %vm4925_vm8, %v17026_v49  ;;  %4931 = vst.msk [vmem:[#allocation3 + $0x78] sm:$0x1] %vm4925_vm8, %v17026_v49 }
 0x19a   : > { %4932 = vst.msk [vmem:[#allocation3 + $0x90] sm:$0x1] %vm4925_vm8, %v17026_v49  ;;  %4933 = vst.msk [vmem:[#allocation3 + $0xa8] sm:$0x1] %vm4925_vm8, %v17026_v49  ;;  %p12872_p13 = pneg %p12871_p12 }
 0x19b   : > { %10994 = vmatmul.mubr.msk.f32.vlgmr.msra.gmra.mrb[0].mxu0 %vm522_vm4, %v516_v31  ;;  %v3385_v31 = vld [vmem:[#allocation2 + $0xf1] sm:$0xff]  ;;  %4934 = vst.msk [vmem:[#allocation3 + $0xc0] sm:$0x1] %vm4925_vm8, %v17026_v49  ;;  %4935 = vst.msk [vmem:[#allocation3 + $0xd8] sm:$0x1] %vm4925_vm8, %v17026_v49 }
 0x19c   : > { %11291 = vmatmul.mubr.msk.f32.gmra.mrb[16].mxu1 %vm628_vm1, %v13681_v0  ;;  %10997 = vmatpush3.msk.msra.mxu0 %vm870_vm0, %v17027_v24  ;;  %v3382_v24 = vld [vmem:[#allocation2 + $0xc9] sm:$0xff]  ;;  %4936 = vst.msk [vmem:[#allocation3 + $0xf0] sm:$0x1] %vm4925_vm8, %v17026_v49  ;;  %4937 = vst.msk [vmem:[#allocation3 + $0x108] sm:$0x1] %vm4925_vm8, %v17026_v49 }
 0x19d   : > { %11293 = vmatprep.mubr.msk.f32.mxu1 %vm628_vm1, %v13936_v34  ;;  %10998 = vmatprep.mubr.msk.f32.mxu0 %vm628_vm1, %v741_v45  ;;  %4938 = vst.msk [vmem:[#allocation3 + $0x120] sm:$0x1] %vm4925_vm8, %v17026_v49  ;;  %4939 = vst.msk [vmem:[#allocation3 + $0x138] sm:$0x1] %vm4925_vm8, %v17026_v49 }
 0x19e   : > { %11998 = vmatprep.subr.bf16.mxu0 %v17028_v51  ;;  %4940 = vst.msk [vmem:[#allocation3 + $0x150] sm:$0x1] %vm4925_vm8, %v17026_v49  ;;  %4941 = vst.msk [vmem:[#allocation3 + $0x168] sm:$0x1] %vm4925_vm8, %v17026_v49 }
 0x19f   : > { %10999 = vmatmul.mubr.msk.f32.vlgmr.msra.gmra.mrb[2].mxu0 %vm628_vm1, %v742_v53  ;;  %4942 = vst.msk [vmem:[#allocation3 + $0x180] sm:$0x1] %vm4925_vm8, %v17026_v49  ;;  %4943 = vst.msk [vmem:[#allocation3 + $0x198] sm:$0x1] %vm4925_vm8, %v17026_v49 }
 0x1a0   : > { %11294 = vmatmul.mubr.msk.f32.gmra.mrb[18].mxu1 %vm628_vm1, %v13942_v23  ;;  %11001 = vmatprep.mubr.msk.f32.mxu0 %vm628_vm1, %v13757_v58  ;;  %v3399_v58 = vld [vmem:[#allocation2 + $0x199] sm:$0xff]  ;;  %4945 = vst.msk [vmem:[#allocation3 + $0x29] sm:$0x1] %vm4925_vm8, %v17026_v49  ;;  %4946 = vst.msk [vmem:[#allocation3 + $0x41] sm:$0x1] %vm4925_vm8, %v17026_v49 }
 0x1a1   : > { %11298 = vmatprep.mubr.msk.f32.mxu1 %vm628_vm1, %v13428_v59  ;;  %v3386_v59 = vld [vmem:[#allocation2 + $0xf9] sm:$0xff]  ;;  %4947 = vst.msk [vmem:[#allocation3 + $0x59] sm:$0x1] %vm4925_vm8, %v17026_v49  ;;  %4948 = vst.msk [vmem:[#allocation3 + $0x71] sm:$0x1] %vm4925_vm8, %v17026_v49 }
 0x1a2   : > { %4949 = vst.msk [vmem:[#allocation3 + $0x89] sm:$0x1] %vm4925_vm8, %v17026_v49  ;;  %4950 = vst.msk [vmem:[#allocation3 + $0xa1] sm:$0x1] %vm4925_vm8, %v17026_v49 }
 0x1a3   : > { %11002 = vmatmul.mubr.msk.f32.gmra.mrb[4].mxu0 %vm628_vm1, %v13763_v5  ;;  %v17030_v5 = vld [vmem:[#allocation39_spill] sm:$0xff]  ;;  %4951 = vst.msk [vmem:[#allocation3 + $0xb9] sm:$0x1] %vm4925_vm8, %v17026_v49  ;;  %4952 = vst.msk [vmem:[#allocation3 + $0xd1] sm:$0x1] %vm4925_vm8, %v17026_v49 }
 0x1a4   : > { %11299 = vmatmul.mubr.msk.f32.vlgmr.msra.gmra.mrb[20].mxu1 %vm628_vm1, %v13436_v60  ;;  %11004 = vmatprep.mubr.msk.f32.mxu0 %vm628_vm1, %v13765_v4  ;;  %v3387_v60 = vld [vmem:[#allocation2 + $0x109] sm:$0xff]  ;;  %4953 = vst.msk [vmem:[#allocation3 + $0xe9] sm:$0x1] %vm4925_vm8, %v17026_v49  ;;  %4954 = vst.msk [vmem:[#allocation3 + $0x101] sm:$0x1] %vm4925_vm8, %v17026_v49 }
 0x1a5   : > { %11347 = vmatpush3.msk.msra.mxu1 %vm870_vm0, %v13857_v27  ;;  %11301 = vmatprep.mubr.msk.f32.mxu1 %vm628_vm1, %v13438_v61  ;;  %v3388_v61 = vld [vmem:[#allocation2 + $0x111] sm:$0xff]  ;;  %v17045_v27 = vld [vmem:[#allocation68_spill] sm:$0xff]  ;;  %4955 = vst.msk [vmem:[#allocation3 + $0x119] sm:$0x1] %vm4925_vm8, %v17026_v49  ;;  %4956 = vst.msk [vmem:[#allocation3 + $0x131] sm:$0x1] %vm4925_vm8, %v17026_v49 }
 0x1a6   : > { %11396 = vmatprep.subr.msk.mxu1 %vm870_vm0, %v3790_v44  ;;  %4957 = vst.msk [vmem:[#allocation3 + $0x149] sm:$0x1] %vm4925_vm8, %v17026_v49  ;;  %4958 = vst.msk [vmem:[#allocation3 + $0x161] sm:$0x1] %vm4925_vm8, %v17026_v49 }
 0x1a7   : > { %11005 = vmatmul.mubr.msk.f32.gmra.mrb[6].mxu0 %vm628_vm1, %v13775_v56  ;;  %4959 = vst.msk [vmem:[#allocation3 + $0x179] sm:$0x1] %vm4925_vm8, %v17026_v49  ;;  %4960 = vst.msk [vmem:[#allocation3 + $0x191] sm:$0x1] %vm4925_vm8, %v17026_v49 }
 0x1a8   : > { %11302 = vmatmul.mubr.msk.f32.gmra.mrb[22].mxu1 %vm628_vm1, %v13444_v62  ;;  %11007 = vmatprep.mubr.msk.f32.mxu0 %vm628_vm1, %v13777_v39  ;;  %v3389_v62 = vld [vmem:[#allocation2 + $0x121] sm:$0xff]  ;;  %4944 = vst.msk [vmem:[#allocation3 + $0x11] sm:$0x1] %vm4925_vm8, %v17026_v49  ;;  %4961 = vst.msk [vmem:[#allocation3 + $0x1a9] sm:$0x1] %vm4925_vm8, %v17026_v49 }
 0x1a9   : > { %11304 = vmatprep.mubr.msk.f32.mxu1 %vm628_vm1, %v13446_v63  ;;  %v3390_v63 = vld [vmem:[#allocation2 + $0x129] sm:$0xff] }
 0x1ab   : > { %11008 = vmatmul.mubr.msk.f32.gmra.mrb[8].mxu0 %vm628_vm1, %v13784_v8 }
 0x1ac   : > { %11305 = vmatmul.mubr.msk.f32.gmra.mrb[24].mxu1 %vm628_vm1, %v13452_v1  ;;  %11010 = vmatprep.mubr.msk.f32.mxu0 %vm628_vm1, %v13786_v9  ;;  %v3391_v1 = vld [vmem:[#allocation2 + $0x139] sm:$0xff] }
 0x1ad   : > { %11307 = vmatprep.mubr.msk.f32.mxu1 %vm628_vm1, %v13454_v28  ;;  %v3392_v28 = vld [vmem:[#allocation2 + $0x141] sm:$0xff] }
 0x1af   : > { %11011 = vmatmul.mubr.msk.f32.gmra.mrb[10].mxu0 %vm628_vm1, %v13792_v35 }
 0x1b0   : > { %11308 = vmatmul.mubr.msk.f32.gmra.mrb[26].mxu1 %vm628_vm1, %v13460_v54  ;;  %11013 = vmatprep.mubr.msk.f32.mxu0 %vm628_vm1, %v13794_v10  ;;  %v3393_v54 = vld [vmem:[#allocation2 + $0x151] sm:$0xff] }
 0x1b1   : > { %11310 = vmatprep.mubr.msk.f32.mxu1 %vm628_vm1, %v13462_v55  ;;  %v3394_v55 = vld [vmem:[#allocation2 + $0x159] sm:$0xff] }
 0x1b3   : > { %11014 = vmatmul.mubr.msk.f32.gmra.mrb[12].mxu0 %vm628_vm1, %v13800_v11 }
 0x1b4   : > { %11311 = vmatmul.mubr.msk.f32.gmra.mrb[28].mxu1 %vm628_vm1, %v13468_v2  ;;  %11450 = vmatprep.mubr.msk.f32.mxu0 %vm12935_vm5, %v17026_v49  ;;  %v17029_v2 = vld [vmem:[#allocation38_spill] sm:$0xff] }
 0x1b5   : > { %11313 = vmatprep.mubr.msk.f32.mxu1 %vm628_vm1, %v13470_v22  ;;  %v3379_v22 = vld [vmem:[#allocation2 + $0xa9] sm:$0xff] }
 0x1b8   : > { %11314 = vmatmul.mubr.msk.f32.gmra.mrb[30].mxu1 %vm628_vm1, %v13476_v21  ;;  %v3378_v21 = vld [vmem:[#allocation2 + $0x99] sm:$0xff] }
 0x1b9   : > { %11316 = vmatprep.mubr.msk.f32.mxu1 %vm628_vm1, %v13478_v20  ;;  %v3011_v20 = vld [vmem:[#allocation2 + $0x1a0] sm:$0xff] }
 0x1bc   : > { %11317 = vmatmul.mubr.msk.f32.gmra.mrb[0].mxu1 %vm628_vm1, %v13484_v19  ;;  %v17037_v19 = vld [vmem:[#allocation70_spill] sm:$0xff] }
 0x1bd   : > { %11319 = vmatprep.mubr.msk.f32.mxu1 %vm628_vm1, %v13486_v18  ;;  %v3010_v18 = vld [vmem:[#allocation2 + $0x198] sm:$0xff] }
 0x1c0   : > { %11320 = vmatmul.mubr.msk.f32.gmra.mrb[2].mxu1 %vm628_vm1, %v13492_v17  ;;  %v17031_v17 = vld [vmem:[#allocation40_spill] sm:$0xff] }
 0x1c1   : > { %11322 = vmatprep.mubr.msk.f32.mxu1 %vm628_vm1, %v13494_v16  ;;  %v17032_v16 = vld [vmem:[#allocation41_spill] sm:$0xff] }
 0x1c4   : > { %11323 = vmatmul.mubr.msk.f32.gmra.mrb[4].mxu1 %vm628_vm1, %v13500_v15  ;;  %v17033_v15 = vld [vmem:[#allocation44_spill] sm:$0xff] }
 0x1c5   : > { %11325 = vmatprep.mubr.msk.f32.mxu1 %vm628_vm1, %v13502_v14  ;;  %v17034_v14 = vld [vmem:[#allocation45_spill] sm:$0xff] }
 0x1c8   : > { %11326 = vmatmul.mubr.msk.f32.gmra.mrb[6].mxu1 %vm628_vm1, %v13508_v13  ;;  %v17035_v13 = vld [vmem:[#allocation46_spill] sm:$0xff] }
 0x1c9   : > { %11328 = vmatprep.mubr.msk.f32.mxu1 %vm628_vm1, %v13510_v12  ;;  %v17036_v12 = vld [vmem:[#allocation69_spill] sm:$0xff] }
 0x1cc   : > { %11329 = vmatmul.mubr.msk.f32.gmra.mrb[8].mxu1 %vm628_vm1, %v17029_v2 }
 0x1cd   : > { %11331 = vmatprep.mubr.msk.f32.mxu1 %vm628_vm1, %v17030_v5  ;;  %v507_v5 = vld [vmem:[%s16775_s14] sm:$0xff] }
 0x1d0   : > { %11332 = vmatmul.mubr.msk.f32.gmra.mrb[10].mxu1 %vm628_vm1, %v17031_v17  ;;  %v508_v17 = vld [vmem:[%s16775_s14 + $0x8] sm:$0xff] }
 0x1d1   : > { %11334 = vmatprep.mubr.msk.f32.mxu1 %vm628_vm1, %v17032_v16  ;;  %v14176_v16 = vpack.c.bf16 %v508_v17, %v507_v5 }
 0x1d3   : > { %17048 = vst [vmem:[#allocation48_spill] sm:$0xff] %v14176_v16  ;;  %12000 = vmatpush3.bf16.msra.mxu0 %v14176_v16 }
 0x1d4   : > { %11335 = vmatmul.mubr.msk.f32.gmra.mrb[12].mxu1 %vm628_vm1, %v17033_v15  ;;  %12001 = vmatprep.subr.bf16.mxu0 %v17028_v51  ;;  %v14184_v15 = vld [vmem:[%s16766_s5] ss:$0 sm:$0xff] }
 0x1d5   : > { %11337 = vmatprep.mubr.msk.f32.mxu1 %vm628_vm1, %v17034_v14 }
 0x1d8   : > { %11338 = vmatmul.mubr.msk.f32.gmra.mrb[14].mxu1 %vm628_vm1, %v17035_v13 }
 0x1d9   : > { %11340 = vmatprep.mubr.msk.f32.mxu1 %vm628_vm1, %v17036_v12 }
 0x1dc   : > { %11341 = vmatmul.mubr.msk.f32.gmra.mrb[16].mxu1 %vm628_vm1, %v17037_v19 }
 0x1dd   : > { %11343 = vmatprep.mubr.msk.f32.mxu1 %vm628_vm1, %v3010_v18 }
 0x1e0   : > { %11344 = vmatmul.mubr.msk.f32.gmra.mrb[18].mxu1 %vm628_vm1, %v3011_v20 }
 0x1e1   : > { %11348 = vmatprep.mubr.msk.f32.mxu1 %vm628_vm1, %v13765_v4  ;;  %v3377_v4 = vld [vmem:[#allocation2 + $0x91] sm:$0xff] }
 0x1e4   : > { %11349 = vmatmul.mubr.msk.f32.vlgmr.msra.gmra.mrb[20].mxu1 %vm628_vm1, %v13775_v56  ;;  %v3396_v56 = vld [vmem:[#allocation2 + $0x171] sm:$0xff] }
 0x1e5   : > { %11397 = vmatpush3.msk.msra.mxu1 %vm870_vm0, %v3790_v44  ;;  %11351 = vmatprep.mubr.msk.f32.mxu1 %vm628_vm1, %v13777_v39  ;;  %v3395_v39 = vld [vmem:[#allocation2 + $0x169] sm:$0xff] }
 0x1e6   : > { %12043 = vmatprep.subr.bf16.mxu1 %v17028_v51  ;;  %v6513_v51 = vld [vmem:[%s16769_s8 + $0x48] sm:$0xff] }
 0x1e8   : > { %11352 = vmatmul.mubr.msk.f32.gmra.mrb[22].mxu1 %vm628_vm1, %v13784_v8  ;;  %v3380_v8 = vld [vmem:[#allocation2 + $0xb1] sm:$0xff] }
 0x1e9   : > { %11354 = vmatprep.mubr.msk.f32.mxu1 %vm628_vm1, %v13786_v9  ;;  %v3381_v9 = vld [vmem:[#allocation2 + $0xc1] sm:$0xff] }
 0x1ec   : > { %11355 = vmatmul.mubr.msk.f32.gmra.mrb[24].mxu1 %vm628_vm1, %v13792_v35  ;;  %v3400_v35 = vld [vmem:[#allocation2 + $0x1a1] sm:$0xff] }
 0x1ed   : > { %11357 = vmatprep.mubr.msk.f32.mxu1 %vm628_vm1, %v13794_v10  ;;  %v3383_v10 = vld [vmem:[#allocation2 + $0xd9] sm:$0xff] }
 0x1f0   : > { %11358 = vmatmul.mubr.msk.f32.gmra.mrb[26].mxu1 %vm628_vm1, %v13800_v11  ;;  %v3384_v11 = vld [vmem:[#allocation2 + $0xe1] sm:$0xff] }
 0x1f1   : > { %11360 = vmatprep.mubr.msk.f32.mxu1 %vm628_vm1, %v3377_v4 }
 0x1f4   : > { %11361 = vmatmul.mubr.msk.f32.gmra.mrb[28].mxu1 %vm628_vm1, %v3378_v21 }
 0x1f5   : > { %11363 = vmatprep.mubr.msk.f32.mxu1 %vm628_vm1, %v3379_v22 }
 0x1f8   : > { %11364 = vmatmul.mubr.msk.f32.gmra.mrb[30].mxu1 %vm628_vm1, %v3380_v8 }
 0x1f9   : > { %11366 = vmatprep.mubr.msk.f32.mxu1 %vm628_vm1, %v3381_v9 }
 0x1fc   : > { %11367 = vmatmul.mubr.msk.f32.gmra.mrb[0].mxu1 %vm628_vm1, %v3382_v24 }
 0x1fd   : > { %11369 = vmatprep.mubr.msk.f32.mxu1 %vm628_vm1, %v3383_v10 }
 0x200   : > { %11370 = vmatmul.mubr.msk.f32.gmra.mrb[2].mxu1 %vm628_vm1, %v3384_v11 }
 0x201   : > { %11372 = vmatprep.mubr.msk.f32.mxu1 %vm628_vm1, %v3385_v31 }
 0x204   : > { %11373 = vmatmul.mubr.msk.f32.gmra.mrb[4].mxu1 %vm628_vm1, %v3386_v59 }
 0x205   : > { %11375 = vmatprep.mubr.msk.f32.mxu1 %vm628_vm1, %v3387_v60 }
 0x208   : > { %11376 = vmatmul.mubr.msk.f32.gmra.mrb[6].mxu1 %vm628_vm1, %v3388_v61 }
 0x209   : > { %11378 = vmatprep.mubr.msk.f32.mxu1 %vm628_vm1, %v3389_v62 }
 0x20c   : > { %11379 = vmatmul.mubr.msk.f32.gmra.mrb[8].mxu1 %vm628_vm1, %v3390_v63 }
 0x20d   : > { %11381 = vmatprep.mubr.msk.f32.mxu1 %vm628_vm1, %v3391_v1 }
 0x210   : > { %11382 = vmatmul.mubr.msk.f32.gmra.mrb[10].mxu1 %vm628_vm1, %v3392_v28 }
 0x211   : > { %11384 = vmatprep.mubr.msk.f32.mxu1 %vm628_vm1, %v3393_v54 }
 0x214   : > { %11385 = vmatmul.mubr.msk.f32.gmra.mrb[12].mxu1 %vm628_vm1, %v3394_v55 }
 0x215   : > { %11387 = vmatprep.mubr.msk.f32.mxu1 %vm628_vm1, %v3395_v39 }
 0x218   : > { %11388 = vmatmul.mubr.msk.f32.gmra.mrb[14].mxu1 %vm628_vm1, %v3396_v56 }
 0x219   : > { %11390 = vmatprep.mubr.msk.f32.mxu1 %vm628_vm1, %v13842_v25  ;;  %v17043_v25 = vld [vmem:[#allocation66_spill] sm:$0xff] }
 0x21c   : > { %11391 = vmatmul.mubr.msk.f32.gmra.mrb[16].mxu1 %vm628_vm1, %v13848_v26  ;;  %v17044_v26 = vld [vmem:[#allocation67_spill] sm:$0xff] }
 0x21d   : > { %11393 = vmatprep.mubr.msk.f32.mxu1 %vm628_vm1, %v3399_v58 }
 0x220   : > { %11394 = vmatmul.mubr.msk.f32.gmra.mrb[18].mxu1 %vm628_vm1, %v3400_v35 }
 0x221   : > { %11398 = vmatprep.mubr.msk.f32.mxu1 %vm628_vm1, %v13569_v37  ;;  %v17039_v37 = vld [vmem:[#allocation60_spill] sm:$0xff] }
 0x224   : > { %11399 = vmatmul.mubr.msk.f32.vlgmr.msra.gmra.mrb[20].mxu1 %vm628_vm1, %v13577_v3  ;;  %v17040_v3 = vld [vmem:[#allocation62_spill] sm:$0xff] }
 0x225   : > { %11401 = vmatprep.mubr.msk.f32.mxu1 %vm628_vm1, %v13579_v6  ;;  %v17041_v6 = vld [vmem:[#allocation63_spill] sm:$0xff]  ;;  %12045 = vmatpush3.bf16.msra.mxu1 %v14176_v16 }
 0x228   : > { %11402 = vmatmul.mubr.msk.f32.gmra.mrb[22].mxu1 %vm628_vm1, %v13585_v57  ;;  %v17042_v57 = vld [vmem:[#allocation65_spill] sm:$0xff] }
 0x229   : > { %11404 = vmatprep.mubr.msk.f32.mxu1 %vm628_vm1, %v13587_v36  ;;  %v17038_v36 = vld [vmem:[#allocation57_spill] sm:$0xff] }
 0x22c   : > { %11405 = vmatmul.mubr.msk.f32.gmra.mrb[24].mxu1 %vm628_vm1, %v17006_v7  ;;  %v3788_v7 = vld [vmem:[#allocation2 + $0x19a] sm:$0xff] }
 0x22d   : > { %11407 = vmatprep.mubr.msk.f32.mxu1 %vm628_vm1, %v17007_v29  ;;  %v3789_v29 = vld [vmem:[#allocation2 + $0x1a2] sm:$0xff] }
 0x230   : > { %11408 = vmatmul.mubr.msk.f32.gmra.mrb[26].mxu1 %vm628_vm1, %v17008_v30  ;;  %v4330_v30 = vlaneseq }
 0x231   : > { %11410 = vmatprep.mubr.msk.f32.mxu1 %vm628_vm1, %v17009_v32 }
 0x232   : > { %v4331_v32 = vshrl.u32 %v4330_v30, 7 }
 0x234   : > { %11411 = vmatmul.mubr.msk.f32.gmra.mrb[28].mxu1 %vm628_vm1, %v17010_v33 }
 0x235   : > { %11413 = vmatprep.mubr.msk.f32.mxu1 %vm628_vm1, %v17011_v38 }
 0x238   : > { %11414 = vmatmul.mubr.msk.f32.gmra.mrb[30].mxu1 %vm628_vm1, %v17012_v40 }
 0x239   : > { %11416 = vmatprep.mubr.msk.f32.mxu1 %vm628_vm1, %v17013_v41 }
 0x23c   : > { %11417 = vmatmul.mubr.msk.f32.gmra.mrb[0].mxu1 %vm628_vm1, %v17014_v42 }
 0x23d   : > { %11419 = vmatprep.mubr.msk.f32.mxu1 %vm628_vm1, %v17015_v43 }
 0x240   : > { %11420 = vmatmul.mubr.msk.f32.gmra.mrb[2].mxu1 %vm628_vm1, %v17038_v36 }
 0x241   : > { %11422 = vmatprep.mubr.msk.f32.mxu1 %vm628_vm1, %v17018_v47 }
 0x244   : > { %11423 = vmatmul.mubr.msk.f32.gmra.mrb[4].mxu1 %vm628_vm1, %v17019_v48 }
 0x245   : > { %11425 = vmatprep.mubr.msk.f32.mxu1 %vm628_vm1, %v17039_v37 }
 0x248   : > { %11426 = vmatmul.mubr.msk.f32.gmra.mrb[6].mxu1 %vm628_vm1, %v17021_v50 }
 0x249   : > { %11428 = vmatprep.mubr.msk.f32.mxu1 %vm628_vm1, %v17040_v3 }
 0x24c   : > { %11429 = vmatmul.mubr.msk.f32.gmra.mrb[8].mxu1 %vm628_vm1, %v17041_v6 }
 0x24d   : > { %11431 = vmatprep.mubr.msk.f32.mxu1 %vm628_vm1, %v17023_v46 }
 0x250   : > { %11432 = vmatmul.mubr.msk.f32.gmra.mrb[10].mxu1 %vm628_vm1, %v17042_v57 }
 0x251   : > { %11434 = vmatprep.mubr.msk.f32.mxu1 %vm628_vm1, %v17043_v25 }
 0x254   : > { %11435 = vmatmul.mubr.msk.f32.gmra.mrb[12].mxu1 %vm628_vm1, %v17044_v26 }
 0x255   : > { %11437 = vmatprep.mubr.msk.f32.mxu1 %vm628_vm1, %v17045_v27 }
 0x258   : > { %11438 = vmatmul.mubr.msk.f32.gmra.mrb[14].mxu1 %vm628_vm1, %v13681_v0  ;;  %v521_v0 = vld [vmem:[%s17046_s3] sm:$0x1]  ;;  %s12873_s3 = sshll.u32 %s12937_s22, 4  ;;  %s12874_s3 = int_to_ptr.vmem [resolvable:$false] %s12873_s3 }
 0x259   : > { %11440 = vmatprep.mubr.msk.f32.mxu1 %vm628_vm1, %v13936_v34  ;;  %v14156_v34 = vsub.s32 0, %v4331_v32  ;;  %s12875_s4 = scalar_lea.vmem %s12874_s3, 1024  ;;  %p12876_p0 = scmp.lt.s32.totalorder %s16713_s16, %s12874_s3 }
 0x25a   : > { %p12877_p1 = scmp.lt.s32.totalorder %s12875_s4, %s12869_s2 }
 0x25b   : > { %17047 = vst [vmem:[#allocation47_spill] sm:$0xff] %v14156_v34 }
 0x25c   : > { %11441 = vmatmul.mubr.msk.f32.gmra.mrb[16].mxu1 %vm628_vm1, %v13942_v23  ;;  %p12878_p2 = por %p12877_p1, %p12876_p0 }
 0x25d   : > { %11443 = vmatprep.mubr.msk.f32.mxu1 %vm628_vm1, %v3788_v7 }
 0x25e   : > { %p12879_p3 = pnand %p12878_p2, %p12872_p13 }
 0x260   : > { %11444 = vmatmul.mubr.msk.f32.gmra.mrb[18].mxu1 %vm628_vm1, %v3789_v29 }
 0x261   : > { %11939 = vmatprep.mubr.msk.f32.mxu1 %vm12935_vm5, %v17026_v49 }
 0x26e   : > { %v592_v33 = vpop.f32.mrb[0].mxu0 }
 0x26f   : > { %v14158_v38 = vadd.f32 %v592_v33, %v521_v0  ;;  %v10995_v40 = vpop.f32.mrb[1].mxu0 }
 0x271   : > { %v4656_v42 = vrot.slane %v14158_v38, %v14156_v34 }
 0x272   : > { %v11000_v41 = vpop.f32.mrb[2].mxu0 }
 0x273   : > { %v940_v43 = vpop.f32.mrb[3].mxu0  ;;  %4658 = vrot.lane.b32.xlu0 %v4656_v42, %s12936_s25 }
 0x276   : > { %v11003_v46 = vpop.f32.mrb[4].mxu0 }
 0x277   : > { %v950_v47 = vpop.f32.mrb[5].mxu0 }
 0x27a   : > { %v11006_v48 = vpop.f32.mrb[6].mxu0 }
 0x27b   : > { %v960_v50 = vpop.f32.mrb[7].mxu0 }
 0x27e   : > { %v11009_v52 = vpop.f32.mrb[8].mxu0 }
 0x27f   : > { %v970_v23 = vpop.f32.mrb[9].mxu0 }
 0x282   : > { %v11012_v45 = vpop.f32.mrb[10].mxu0 }
 0x283   : > { %v980_v53 = vpop.f32.mrb[11].mxu0 }
 0x286   : > { %v11015_v44 = vpop.f32.mrb[12].mxu0 }
 0x287   : > { %v990_v2 = vpop.f32.mrb[13].mxu0 }
 0x2f7   : > { %v11400_v14 = vpop.f32.mrb[20].mxu1 }
 0x2f8   : > { %v12048_v13 = vadd.f32 %v11400_v14, %v11000_v41  ;;  %v3956_v12 = vpop.f32.mrb[21].mxu1 }
 0x2f9   : > { %v12049_v18 = vadd.f32 %v3956_v12, %v940_v43 }
 0x2fa   : > { %v14187_v19 = vadd.f32 %v12048_v13, %v14184_v15 }
 0x2fb   : > { %v14190_v20 = vadd.f32 %v12049_v18, %v14184_v15  ;;  %v11403_v4 = vpop.f32.mrb[22].mxu1 }
 0x2fc   : > { %v12050_v21 = vadd.f32 %v11403_v4, %v11003_v46  ;;  %v3966_v22 = vpop.f32.mrb[23].mxu1  ;;  %v4189_v8 = vsel %vm4187_vm6, %v14187_v19, 0.0 }
 0x2fd   : > { %v4188_v9 = vsel %vm4187_vm6, %v14190_v20, 0.0  ;;  %v12051_v24 = vadd.f32 %v3966_v22, %v950_v47 }
 0x2fe   : > { %v14197_v10 = vadd.f32 %v12050_v21, %v14184_v15  ;;  %v4190_v59 = vadd.f32 %v4189_v8, %v4188_v9 }
 0x2ff   : > { %v14200_v11 = vadd.f32 %v12051_v24, %v14184_v15  ;;  %v11406_v31 = vpop.f32.mrb[24].mxu1 }
 0x300   : > { %v12052_v60 = vadd.f32 %v11406_v31, %v11006_v48  ;;  %v3976_v61 = vpop.f32.mrb[25].mxu1  ;;  %v4193_v28 = vsel %vm4187_vm6, %v14197_v10, 0.0 }
 0x301   : > { %v4191_v62 = vsel %vm4187_vm6, %v14200_v11, 0.0  ;;  %v12053_v63 = vadd.f32 %v3976_v61, %v960_v50 }
 0x302   : > { %v4192_v1 = vadd.f32 %v4191_v62, %v4190_v59  ;;  %v14207_v54 = vadd.f32 %v12052_v60, %v14184_v15 }
 0x303   : > { %v14210_v55 = vadd.f32 %v12053_v63, %v14184_v15  ;;  %v11409_v39 = vpop.f32.mrb[26].mxu1 }
 0x304   : > { %v4194_v56 = vadd.f32 %v4193_v28, %v4192_v1  ;;  %v12054_v58 = vadd.f32 %v11409_v39, %v11009_v52  ;;  %v3986_v35 = vpop.f32.mrb[27].mxu1  ;;  %v4197_v6 = vsel %vm4187_vm6, %v14207_v54, 0.0 }
 0x305   : > { %v4195_v36 = vsel %vm4187_vm6, %v14210_v55, 0.0  ;;  %v12055_v37 = vadd.f32 %v3986_v35, %v970_v23 }
 0x306   : > { %v4196_v3 = vadd.f32 %v4195_v36, %v4194_v56  ;;  %v14217_v57 = vadd.f32 %v12054_v58, %v14184_v15 }
 0x307   : > { %v14220_v25 = vadd.f32 %v12055_v37, %v14184_v15  ;;  %v11412_v26 = vpop.f32.mrb[28].mxu1 }
 0x308   : > { %v4198_v27 = vadd.f32 %v4197_v6, %v4196_v3  ;;  %v12056_v7 = vadd.f32 %v11412_v26, %v11012_v45  ;;  %v3996_v29 = vpop.f32.mrb[29].mxu1  ;;  %v4201_v33 = vsel %vm4187_vm6, %v14217_v57, 0.0 }
 0x309   : > { %v4199_v30 = vsel %vm4187_vm6, %v14220_v25, 0.0  ;;  %v12057_v32 = vadd.f32 %v3996_v29, %v980_v53 }
 0x30a   : > { %v4200_v0 = vadd.f32 %v4199_v30, %v4198_v27  ;;  %v14227_v40 = vadd.f32 %v12056_v7, %v14184_v15 }
 0x30b   : > { %v14230_v41 = vadd.f32 %v12057_v32, %v14184_v15  ;;  %v11415_v42 = vpop.f32.mrb[30].mxu1 }
 0x30c   : > { %v4202_v43 = vadd.f32 %v4201_v33, %v4200_v0  ;;  %v12058_v46 = vadd.f32 %v11415_v42, %v11015_v44  ;;  %v4006_v47 = vpop.f32.mrb[31].mxu1  ;;  %v4205_v23 = vsel %vm4187_vm6, %v14227_v40, 0.0 }
 0x30d   : > { %v4203_v48 = vsel %vm4187_vm6, %v14230_v41, 0.0  ;;  %v12059_v50 = vadd.f32 %v4006_v47, %v990_v2 }
 0x30e   : > { %v4204_v52 = vadd.f32 %v4203_v48, %v4202_v43  ;;  %v14237_v45 = vadd.f32 %v12058_v46, %v14184_v15 }
 0x30f   : > { %v14240_v53 = vadd.f32 %v12059_v50, %v14184_v15  ;;  %v11418_v5 = vpop.f32.mrb[0].mxu1 }
 0x310   : > { %v4206_v17 = vadd.f32 %v4205_v23, %v4204_v52  ;;  %v4016_v14 = vpop.f32.mrb[1].mxu1  ;;  %v4209_v12 = vsel %vm4187_vm6, %v14237_v45, 0.0  ;;  %v14250_v18 = vadd.f32 %v11418_v5, %v14184_v15 }
 0x311   : > { %v4207_v44 = vsel %vm4187_vm6, %v14240_v53, 0.0  ;;  %v14245_v13 = vadd.f32 %v14184_v15, %v4016_v14 }
 0x312   : > { %v4208_v2 = vadd.f32 %v4207_v44, %v4206_v17  ;;  %v4213_v31 = vsel %vm4187_vm6, %v14250_v18, 0.0 }
 0x313   : > { %v11421_v4 = vpop.f32.mrb[2].mxu1  ;;  %v4211_v8 = vsel %vm4187_vm6, %v14245_v13, 0.0 }
 0x314   : > { %v4210_v21 = vadd.f32 %v4209_v12, %v4208_v2  ;;  %v4026_v22 = vpop.f32.mrb[3].mxu1  ;;  %v14260_v59 = vadd.f32 %v11421_v4, %v14184_v15 }
 0x315   : > { %v14255_v9 = vadd.f32 %v14184_v15, %v4026_v22 }
 0x316   : > { %v4212_v24 = vadd.f32 %v4211_v8, %v4210_v21  ;;  %v4217_v39 = vsel %vm4187_vm6, %v14260_v59, 0.0 }
 0x317   : > { %v11424_v60 = vpop.f32.mrb[4].mxu1  ;;  %v4215_v63 = vsel %vm4187_vm6, %v14255_v9, 0.0 }
 0x318   : > { %v4214_v61 = vadd.f32 %v4213_v31, %v4212_v24  ;;  %v4036_v62 = vpop.f32.mrb[5].mxu1  ;;  %v14270_v56 = vadd.f32 %v11424_v60, %v14184_v15 }
 0x319   : > { %v14265_v1 = vadd.f32 %v14184_v15, %v4036_v62 }
 0x31a   : > { %v4216_v28 = vadd.f32 %v4215_v63, %v4214_v61  ;;  %v4221_v26 = vsel %vm4187_vm6, %v14270_v56, 0.0 }
 0x31b   : > { %v11427_v58 = vpop.f32.mrb[6].mxu1  ;;  %v4219_v37 = vsel %vm4187_vm6, %v14265_v1, 0.0 }
 0x31c   : > { %v4218_v35 = vadd.f32 %v4217_v39, %v4216_v28  ;;  %v4046_v36 = vpop.f32.mrb[7].mxu1  ;;  %v14280_v27 = vadd.f32 %v11427_v58, %v14184_v15 }
 0x31d   : > { %v14275_v3 = vadd.f32 %v14184_v15, %v4046_v36 }
 0x31e   : > { %v4220_v6 = vadd.f32 %v4219_v37, %v4218_v35  ;;  %v4225_v42 = vsel %vm4187_vm6, %v14280_v27, 0.0 }
 0x31f   : > { %v11430_v7 = vpop.f32.mrb[8].mxu1  ;;  %v4223_v32 = vsel %vm4187_vm6, %v14275_v3, 0.0 }
 0x320   : > { %v4222_v29 = vadd.f32 %v4221_v26, %v4220_v6  ;;  %v4056_v30 = vpop.f32.mrb[9].mxu1  ;;  %v14290_v43 = vadd.f32 %v11430_v7, %v14184_v15 }
 0x321   : > { %v14285_v0 = vadd.f32 %v14184_v15, %v4056_v30 }
 0x322   : > { %v4224_v33 = vadd.f32 %v4223_v32, %v4222_v29  ;;  %v4229_v5 = vsel %vm4187_vm6, %v14290_v43, 0.0 }
 0x323   : > { %v11433_v46 = vpop.f32.mrb[10].mxu1  ;;  %v4227_v50 = vsel %vm4187_vm6, %v14285_v0, 0.0 }
 0x324   : > { %v4226_v47 = vadd.f32 %v4225_v42, %v4224_v33  ;;  %v4066_v48 = vpop.f32.mrb[11].mxu1  ;;  %v14300_v17 = vadd.f32 %v11433_v46, %v14184_v15 }
 0x325   : > { %v14295_v52 = vadd.f32 %v14184_v15, %v4066_v48 }
 0x326   : > { %v4228_v23 = vadd.f32 %v4227_v50, %v4226_v47  ;;  %v4233_v22 = vsel %vm4187_vm6, %v14300_v17, 0.0 }
 0x327   : > { %v11436_v14 = vpop.f32.mrb[12].mxu1  ;;  %v4231_v12 = vsel %vm4187_vm6, %v14295_v52, 0.0 }
 0x328   : > { %v4230_v44 = vadd.f32 %v4229_v5, %v4228_v23  ;;  %v4076_v2 = vpop.f32.mrb[13].mxu1  ;;  %v14310_v8 = vadd.f32 %v11436_v14, %v14184_v15 }
 0x329   : > { %v14305_v4 = vadd.f32 %v14184_v15, %v4076_v2 }
 0x32a   : > { %v4232_v21 = vadd.f32 %v4231_v12, %v4230_v44  ;;  %v4237_v28 = vsel %vm4187_vm6, %v14310_v8, 0.0 }
 0x32b   : > { %v11439_v24 = vpop.f32.mrb[14].mxu1  ;;  %v4235_v61 = vsel %vm4187_vm6, %v14305_v4, 0.0 }
 0x32c   : > { %v4234_v31 = vadd.f32 %v4233_v22, %v4232_v21  ;;  %v4086_v60 = vpop.f32.mrb[15].mxu1  ;;  %v14320_v39 = vadd.f32 %v11439_v24, %v14184_v15 }
 0x32d   : > { %v14315_v62 = vadd.f32 %v14184_v15, %v4086_v60 }
 0x32e   : > { %v4236_v63 = vadd.f32 %v4235_v61, %v4234_v31  ;;  %v4241_v7 = vsel %vm4187_vm6, %v14320_v39, 0.0 }
 0x32f   : > { %v11442_v58 = vpop.f32.mrb[16].mxu1  ;;  %v4239_v37 = vsel %vm4187_vm6, %v14315_v62, 0.0 }
 0x330   : > { %v4238_v35 = vadd.f32 %v4237_v28, %v4236_v63  ;;  %v4096_v36 = vpop.f32.mrb[17].mxu1  ;;  %v14330_v29 = vadd.f32 %v11442_v58, %v14184_v15 }
 0x331   : > { %v14325_v6 = vadd.f32 %v14184_v15, %v4096_v36 }
 0x332   : > { %v4240_v26 = vadd.f32 %v4239_v37, %v4238_v35  ;;  %v4245_v48 = vsel %vm4187_vm6, %v14330_v29, 0.0 }
 0x333   : > { %v11445_v30 = vpop.f32.mrb[18].mxu1  ;;  %v4243_v42 = vsel %vm4187_vm6, %v14325_v6, 0.0 }
 0x334   : > { %v4242_v32 = vadd.f32 %v4241_v7, %v4240_v26  ;;  %v4106_v33 = vpop.f32.mrb[19].mxu1  ;;  %v14340_v50 = vadd.f32 %v11445_v30, %v14184_v15 }
 0x335   : > { %v14335_v46 = vadd.f32 %v14184_v15, %v4106_v33 }
 0x336   : > { %v4244_v47 = vadd.f32 %v4243_v42, %v4242_v32  ;;  %v4249_v44 = vsel %vm4187_vm6, %v14340_v50, 0.0 }
 0x337   : > { %v4247_v5 = vsel %vm4187_vm6, %v14335_v46, 0.0 }
 0x338   : > { %v4246_v23 = vadd.f32 %v4245_v48, %v4244_v47 }
 0x33a   : > { %v4248_v14 = vadd.f32 %v4247_v5, %v4246_v23 }
 0x33c   : > { %v4250_v2 = vadd.f32 %v4249_v44, %v4248_v14 }
 0x33e   : > { %v4251_v12 = vrot.slane %v4250_v2, 4 }
 0x340   : > { %v4252_v21 = vadd.f32 %v4251_v12, %v4250_v2 }
 0x342   : > { %v4253_v22 = vrot.slane %v4252_v21, 2 }
 0x344   : > { %v4254_v24 = vadd.f32 %v4253_v22, %v4252_v21 }
 0x346   : > { %v4255_v31 = vrot.slane %v4254_v24, 1 }
 0x348   : > { %v4256_v60 = vadd.f32 %v4255_v31, %v4254_v24 }
 0x34a   : > { %11451 = vmatmul.mubr.msk.f32.vlgmr.msra.gmra.mrb[14].mxu0 %vm4187_vm6, %v4256_v60 }
 0x34b   : > { %12003 = vmatpush3.bf16.msra.mxu0 %v14176_v16  ;;  %11457 = vmatprep.mubr.msk.f32.mxu0 %vm12935_vm5, %v17026_v49  ;;  %v6512_v16 = vld [vmem:[%s16769_s8 + $0x40] sm:$0xff] }
 0x41d   : > { %v4326_v15 = vpop.f32.mrb[14].mxu0 }
 0x41e   : > { %v11452_v61 = vpop.f32.mrb[15].mxu0  ;;  %v14351_v63 = vrot.slane %v4326_v15, %v14156_v34 }
 0x420   : > { %v14355_v28 = vsub.f32 %v14190_v20, %v14351_v63  ;;  %v14359_v58 = vsub.f32 %v14187_v19, %v14351_v63  ;;  %v14363_v35 = vsub.f32 %v14200_v11, %v14351_v63  ;;  %v14367_v36 = vsub.f32 %v14197_v10, %v14351_v63 }
 0x421   : > { %v14375_v20 = vsub.f32 %v14210_v55, %v14351_v63  ;;  %v14381_v11 = vsub.f32 %v14207_v54, %v14351_v63  ;;  %v14389_v33 = vsub.f32 %v14220_v25, %v14351_v63  ;;  %v14396_v54 = vsub.f32 %v14217_v57, %v14351_v63 }
 0x422   : > { %v4366_v37 = vmul.f32 %v14355_v28, %v14355_v28  ;;  %v4367_v26 = vmul.f32 %v14359_v58, %v14359_v58  ;;  %v4368_v19 = vmul.f32 %v14363_v35, %v14363_v35  ;;  %v4369_v10 = vmul.f32 %v14367_v36, %v14367_v36 }
 0x423   : > { %v4370_v55 = vmul.f32 %v14375_v20, %v14375_v20  ;;  %v4371_v48 = vmul.f32 %v14381_v11, %v14381_v11  ;;  %v14403_v25 = vsub.f32 %v14230_v41, %v14351_v63  ;;  %v4372_v14 = vmul.f32 %v14389_v33, %v14389_v33 }
 0x424   : > { %v4398_v7 = vsel %vm4187_vm6, %v4366_v37, 0.0  ;;  %v4399_v30 = vsel %vm4187_vm6, %v4367_v26, 0.0  ;;  %v4401_v42 = vsel %vm4187_vm6, %v4368_v19, 0.0  ;;  %v4403_v23 = vsel %vm4187_vm6, %v4369_v10, 0.0 }
 0x425   : > { %v4400_v32 = vadd.f32 %v4399_v30, %v4398_v7  ;;  %v4405_v44 = vsel %vm4187_vm6, %v4370_v55, 0.0  ;;  %v14410_v57 = vsub.f32 %v14227_v40, %v14351_v63  ;;  %v4373_v12 = vmul.f32 %v14396_v54, %v14396_v54 }
 0x426   : > { %v4407_v21 = vsel %vm4187_vm6, %v4371_v48, 0.0  ;;  %v14417_v41 = vsub.f32 %v14240_v53, %v14351_v63  ;;  %v4374_v24 = vmul.f32 %v14403_v25, %v14403_v25  ;;  %v4409_v31 = vsel %vm4187_vm6, %v4372_v14, 0.0 }
 0x427   : > { %v4402_v47 = vadd.f32 %v4401_v42, %v4400_v32  ;;  %v14424_v40 = vsub.f32 %v14237_v45, %v14351_v63  ;;  %v4375_v15 = vmul.f32 %v14410_v57, %v14410_v57  ;;  %v4411_v61 = vsel %vm4187_vm6, %v4373_v12, 0.0 }
 0x428   : > { %v14431_v53 = vsub.f32 %v14245_v13, %v14351_v63  ;;  %v4376_v26 = vmul.f32 %v14417_v41, %v14417_v41  ;;  %v4413_v19 = vsel %vm4187_vm6, %v4374_v24, 0.0  ;;  %v14438_v45 = vsub.f32 %v14250_v18, %v14351_v63 }
 0x429   : > { %v4404_v5 = vadd.f32 %v4403_v23, %v4402_v47  ;;  %v4377_v7 = vmul.f32 %v14424_v40, %v14424_v40  ;;  %v4415_v30 = vsel %vm4187_vm6, %v4375_v15, 0.0  ;;  %v14445_v13 = vsub.f32 %v14255_v9, %v14351_v63 }
 0x42a   : > { %v4378_v55 = vmul.f32 %v14431_v53, %v14431_v53  ;;  %v4417_v42 = vsel %vm4187_vm6, %v4376_v26, 0.0  ;;  %v14452_v18 = vsub.f32 %v14260_v59, %v14351_v63  ;;  %v4379_v48 = vmul.f32 %v14438_v45, %v14438_v45 }
 0x42b   : > { %v4406_v2 = vadd.f32 %v4405_v44, %v4404_v5  ;;  %v4419_v23 = vsel %vm4187_vm6, %v4377_v7, 0.0  ;;  %v14459_v9 = vsub.f32 %v14265_v1, %v14351_v63  ;;  %v4380_v14 = vmul.f32 %v14445_v13, %v14445_v13 }
 0x42c   : > { %v4421_v44 = vsel %vm4187_vm6, %v4378_v55, 0.0  ;;  %v14466_v59 = vsub.f32 %v14270_v56, %v14351_v63  ;;  %v4381_v12 = vmul.f32 %v14452_v18, %v14452_v18  ;;  %v14473_v1 = vsub.f32 %v14275_v3, %v14351_v63 }
 0x42d   : > { %v4408_v22 = vadd.f32 %v4407_v21, %v4406_v2  ;;  %v4423_v21 = vsel %vm4187_vm6, %v4379_v48, 0.0  ;;  %v4382_v24 = vmul.f32 %v14459_v9, %v14459_v9  ;;  %v14480_v56 = vsub.f32 %v14280_v27, %v14351_v63 }
 0x42e   : > { %v4383_v15 = vmul.f32 %v14466_v59, %v14466_v59  ;;  %v14487_v3 = vsub.f32 %v14285_v0, %v14351_v63  ;;  %v4384_v26 = vmul.f32 %v14473_v1, %v14473_v1  ;;  %v14494_v27 = vsub.f32 %v14290_v43, %v14351_v63 }
 0x42f   : > { %v4410_v60 = vadd.f32 %v4409_v31, %v4408_v22  ;;  %v4425_v31 = vsel %vm4187_vm6, %v4380_v14, 0.0  ;;  %v4385_v7 = vmul.f32 %v14480_v56, %v14480_v56  ;;  %v14501_v0 = vsub.f32 %v14295_v52, %v14351_v63 }
 0x430   : > { %v4386_v55 = vmul.f32 %v14487_v3, %v14487_v3  ;;  %v14508_v43 = vsub.f32 %v14300_v17, %v14351_v63  ;;  %v4387_v48 = vmul.f32 %v14494_v27, %v14494_v27  ;;  %v14515_v52 = vsub.f32 %v14305_v4, %v14351_v63 }
 0x431   : > { %v4412_v37 = vadd.f32 %v4411_v61, %v4410_v60  ;;  %v4427_v61 = vsel %vm4187_vm6, %v4381_v12, 0.0  ;;  %v4388_v14 = vmul.f32 %v14501_v0, %v14501_v0  ;;  %v14522_v17 = vsub.f32 %v14310_v8, %v14351_v63 }
 0x432   : > { %v4389_v12 = vmul.f32 %v14508_v43, %v14508_v43  ;;  %v14529_v4 = vsub.f32 %v14315_v62, %v14351_v63  ;;  %v14536_v8 = vsub.f32 %v14320_v39, %v14351_v63  ;;  %v14543_v62 = vsub.f32 %v14325_v6, %v14351_v63 }
 0x433   : > { %v4414_v10 = vadd.f32 %v4413_v19, %v4412_v37  ;;  %v4429_v19 = vsel %vm4187_vm6, %v4382_v24, 0.0  ;;  %v4390_v24 = vmul.f32 %v14515_v52, %v14515_v52  ;;  %v14550_v39 = vsub.f32 %v14330_v29, %v14351_v63 }
 0x434   : > { %v14557_v6 = vsub.f32 %v14335_v46, %v14351_v63  ;;  %v14564_v29 = vsub.f32 %v14340_v50, %v14351_v63 }
 0x435   : > { %v4416_v32 = vadd.f32 %v4415_v30, %v4414_v10  ;;  %v4431_v30 = vsel %vm4187_vm6, %v4383_v15, 0.0  ;;  %v4391_v15 = vmul.f32 %v14522_v17, %v14522_v17 }
 0x436   : > { %v4396_v46 = vmul.f32 %v14557_v6, %v14557_v6 }
 0x437   : > { %v4418_v47 = vadd.f32 %v4417_v42, %v4416_v32  ;;  %v4433_v42 = vsel %vm4187_vm6, %v4384_v26, 0.0  ;;  %v4392_v26 = vmul.f32 %v14529_v4, %v14529_v4 }
 0x438   : > { %v4457_v50 = vsel %vm4187_vm6, %v4396_v46, 0.0  ;;  %v4185_v46 = vld [vmem:[%s16767_s6] sm:$0x1] }
 0x439   : > { %v4420_v5 = vadd.f32 %v4419_v23, %v4418_v47  ;;  %v4435_v23 = vsel %vm4187_vm6, %v4385_v7, 0.0  ;;  %v4393_v7 = vmul.f32 %v14536_v8, %v14536_v8 }
 0x43b   : > { %v4422_v2 = vadd.f32 %v4421_v44, %v4420_v5  ;;  %v4437_v44 = vsel %vm4187_vm6, %v4386_v55, 0.0  ;;  %v4394_v55 = vmul.f32 %v14543_v62, %v14543_v62 }
 0x43d   : > { %v4424_v22 = vadd.f32 %v4423_v21, %v4422_v2  ;;  %v4439_v21 = vsel %vm4187_vm6, %v4387_v48, 0.0  ;;  %v4395_v48 = vmul.f32 %v14550_v39, %v14550_v39 }
 0x43f   : > { %v4426_v60 = vadd.f32 %v4425_v31, %v4424_v22  ;;  %v4441_v31 = vsel %vm4187_vm6, %v4388_v14, 0.0  ;;  %v4453_v14 = vsel %vm4187_vm6, %v4394_v55, 0.0  ;;  %v5029_v55 = vld [vmem:[%s16769_s8 + $0x8] sm:$0xff] }
 0x441   : > { %v4428_v37 = vadd.f32 %v4427_v61, %v4426_v60  ;;  %v4443_v61 = vsel %vm4187_vm6, %v4389_v12, 0.0  ;;  %v4455_v12 = vsel %vm4187_vm6, %v4395_v48, 0.0 }
 0x443   : > { %v4430_v10 = vadd.f32 %v4429_v19, %v4428_v37  ;;  %v4445_v19 = vsel %vm4187_vm6, %v4390_v24, 0.0 }
 0x445   : > { %v4432_v32 = vadd.f32 %v4431_v30, %v4430_v10  ;;  %v4447_v30 = vsel %vm4187_vm6, %v4391_v15, 0.0 }
 0x447   : > { %v4434_v47 = vadd.f32 %v4433_v42, %v4432_v32  ;;  %v4449_v42 = vsel %vm4187_vm6, %v4392_v26, 0.0 }
 0x449   : > { %v4436_v5 = vadd.f32 %v4435_v23, %v4434_v47  ;;  %v4451_v23 = vsel %vm4187_vm6, %v4393_v7, 0.0  ;;  %v5030_v7 = vld [vmem:[#allocation3 + $0x1] sm:$0xff] }
 0x44b   : > { %v4438_v2 = vadd.f32 %v4437_v44, %v4436_v5 }
 0x44d   : > { %v4440_v22 = vadd.f32 %v4439_v21, %v4438_v2  ;;  %v4397_v2 = vmul.f32 %v14564_v29, %v14564_v29 }
 0x44f   : > { %v4442_v60 = vadd.f32 %v4441_v31, %v4440_v22  ;;  %v4459_v22 = vsel %vm4187_vm6, %v4397_v2, 0.0 }
 0x451   : > { %v4444_v37 = vadd.f32 %v4443_v61, %v4442_v60 }
 0x453   : > { %v4446_v10 = vadd.f32 %v4445_v19, %v4444_v37  ;;  %v5062_v19 = vld [vmem:[%s16769_s8 + $0x10] sm:$0xff] }
 0x455   : > { %v4448_v32 = vadd.f32 %v4447_v30, %v4446_v10  ;;  %v5063_v10 = vld [vmem:[%s16769_s8 + $0x18] sm:$0xff] }
 0x456   : > { %v12004_v30 = vpack.c.bf16 %v5063_v10, %v5062_v19 }
 0x457   : > { %v4450_v47 = vadd.f32 %v4449_v42, %v4448_v32  ;;  %v5028_v32 = vld [vmem:[%s16769_s8] sm:$0xff] }
 0x458   : > { %v12008_v42 = vpack.c.bf16 %v5029_v55, %v5028_v32  ;;  %12005 = vmatprep.subr.bf16.mxu0 %v12004_v30 }
 0x459   : > { %v4452_v5 = vadd.f32 %v4451_v23, %v4450_v47  ;;  %v5031_v47 = vld [vmem:[#allocation3 + $0x9] sm:$0xff] }
 0x45b   : > { %v4454_v44 = vadd.f32 %v4453_v14, %v4452_v5  ;;  %v5738_v14 = vld [vmem:[%s16769_s8 + $0x20] sm:$0xff] }
 0x45d   : > { %v4456_v21 = vadd.f32 %v4455_v12, %v4454_v44  ;;  %v5739_v44 = vld [vmem:[%s16769_s8 + $0x28] sm:$0xff] }
 0x45e   : > { %v14675_v2 = vpack.c.bf16 %v5739_v44, %v5738_v14 }
 0x45f   : > { %v4458_v63 = vadd.f32 %v4457_v50, %v4456_v21  ;;  %v4616_v21 = vadd.f32 1.0, %v14158_v38 }
 0x461   : > { %v4460_v24 = vadd.f32 %v4459_v22, %v4458_v63  ;;  %v14681_v22 = vrot.slane %v4616_v21, %v14156_v34 }
 0x463   : > { %v4461_v31 = vrot.slane %v4460_v24, 4 }
 0x465   : > { %v4462_v60 = vadd.f32 %v4461_v31, %v4460_v24 }
 0x467   : > { %v4463_v15 = vrot.slane %v4462_v60, 2 }
 0x469   : > { %v4464_v61 = vadd.f32 %v4463_v15, %v4462_v60 }
 0x46b   : > { %v4465_v37 = vrot.slane %v4464_v61, 1 }
 0x46d   : > { %v4466_v26 = vadd.f32 %v4465_v37, %v4464_v61 }
 0x46f   : > { %11458 = vmatmul.mubr.msk.f32.vlgmr.msra.gmra.mrb[16].mxu0 %vm4187_vm6, %v4466_v26 }
 0x470   : > { %11464 = vmatprep.mubr.msk.f32.mxu0 %vm4187_vm6, %v5030_v7  ;;  %12007 = vmatpush3.bf16.msra.mxu0 %v12004_v30 }
 0x471   : > { %12009 = vmatprep.subr.bf16.mxu0 %v12008_v42 }
 0x473   : > { %11465 = vmatmul.mubr.msk.f32.vlgmr.msra.gmra.mrb[18].mxu0 %vm4187_vm6, %v5031_v47 }
 0x474   : > { %12011 = vmatpush3.bf16.msra.mxu0 %v12008_v42 }
 0x475   : > { %12013 = vmatprep.subr.bf16.mxu0 %v14675_v2 }
 0x542   : > { %v4536_v48 = vpop.f32.mrb[16].mxu0 }
 0x543   : > { %v4537_v23 = vadd.f32 1e-05, %v4536_v48  ;;  %v11459_v5 = vpop.f32.mrb[17].mxu0 }
 0x545   : > { %12609 = vrsqrt.f32 %v4537_v23 }
 0x54f   : > { %v12610_v12 = vpop.eup %12609 }
 0x550   : > { %v4541_v50 = vmul.f32 %v12610_v12, %v4185_v46 }
 0x552   : > { %v4545_v63 = vrot.slane %v4541_v50, %v14156_v34  ;;  %v5706_v34 = vld [vmem:[#allocation3 + $0x2] sm:$0xff] }
 0x554   : > { %v4546_v24 = vmul.f32 %v4545_v63, %v14355_v28  ;;  %v4547_v31 = vmul.f32 %v4545_v63, %v14359_v58  ;;  %v4548_v60 = vmul.f32 %v4545_v63, %v14363_v35  ;;  %v4549_v15 = vmul.f32 %v4545_v63, %v14367_v36 }
 0x555   : > { %v4550_v61 = vmul.f32 %v4545_v63, %v14375_v20  ;;  %v4551_v38 = vmul.f32 %v4545_v63, %v14381_v11  ;;  %v4552_v37 = vmul.f32 %v4545_v63, %v14389_v33  ;;  %v4553_v26 = vmul.f32 %v4545_v63, %v14396_v54 }
 0x556   : > { %v4554_v19 = vmul.f32 %v4545_v63, %v14403_v25  ;;  %v4555_v10 = vmul.f32 %v4545_v63, %v14410_v57  ;;  %v4556_v28 = vmul.f32 %v4545_v63, %v14417_v41  ;;  %v4557_v58 = vmul.f32 %v4545_v63, %v14424_v40  ;;  %v9934_v41 = vld [vmem:[%s16768_s7] ss:$0 sm:$0xff] }
 0x557   : > { %v4558_v35 = vmul.f32 %v4545_v63, %v14431_v53  ;;  %v4559_v36 = vmul.f32 %v4545_v63, %v14438_v45  ;;  %v4560_v20 = vmul.f32 %v4545_v63, %v14445_v13  ;;  %v4561_v11 = vmul.f32 %v4545_v63, %v14452_v18 }
 0x558   : > { %v4562_v33 = vmul.f32 %v4545_v63, %v14459_v9  ;;  %v4563_v54 = vmul.f32 %v4545_v63, %v14466_v59  ;;  %v4564_v25 = vmul.f32 %v4545_v63, %v14473_v1  ;;  %v4565_v57 = vmul.f32 %v4545_v63, %v14480_v56 }
 0x559   : > { %v4566_v40 = vmul.f32 %v4545_v63, %v14487_v3  ;;  %v4567_v53 = vmul.f32 %v4545_v63, %v14494_v27  ;;  %v4568_v45 = vmul.f32 %v4545_v63, %v14501_v0  ;;  %v4569_v13 = vmul.f32 %v4545_v63, %v14508_v43 }
 0x55a   : > { %v4570_v18 = vmul.f32 %v4545_v63, %v14515_v52  ;;  %v4571_v9 = vmul.f32 %v4545_v63, %v14522_v17  ;;  %v4572_v59 = vmul.f32 %v4545_v63, %v14529_v4  ;;  %v4573_v1 = vmul.f32 %v4545_v63, %v14536_v8 }
 0x55b   : > { %v4574_v56 = vmul.f32 %v4545_v63, %v14543_v62  ;;  %v4575_v7 = vmul.f32 %v4545_v63, %v14550_v39  ;;  %v4576_v3 = vmul.f32 %v4545_v63, %v14557_v6  ;;  %v4577_v27 = vmul.f32 %v4545_v63, %v14564_v29 }
 0x55c   : > { %v4584_v30 = vadd.f32 %v9934_v41, %v4546_v24  ;;  %v4585_v0 = vadd.f32 %v9934_v41, %v4547_v31  ;;  %v4586_v32 = vadd.f32 %v9934_v41, %v4548_v60  ;;  %v4587_v43 = vadd.f32 %v9934_v41, %v4549_v15 }
 0x55d   : > { %v4588_v55 = vadd.f32 %v9934_v41, %v4550_v61  ;;  %v4589_v52 = vadd.f32 %v9934_v41, %v4551_v38  ;;  %v4590_v42 = vadd.f32 %v9934_v41, %v4552_v37  ;;  %v4591_v17 = vadd.f32 %v9934_v41, %v4553_v26 }
 0x55e   : > { %v4592_v47 = vadd.f32 %v9934_v41, %v4554_v19  ;;  %v4593_v4 = vadd.f32 %v9934_v41, %v4555_v10  ;;  %v4594_v48 = vadd.f32 %v9934_v41, %v4556_v28  ;;  %v4595_v8 = vadd.f32 %v9934_v41, %v4557_v58 }
 0x55f   : > { %v4596_v23 = vadd.f32 %v9934_v41, %v4558_v35  ;;  %v4597_v62 = vadd.f32 %v9934_v41, %v4559_v36  ;;  %v4598_v5 = vadd.f32 %v9934_v41, %v4560_v20  ;;  %v4599_v39 = vadd.f32 %v9934_v41, %v4561_v11 }
 0x560   : > { %v4600_v46 = vadd.f32 %v9934_v41, %v4562_v33  ;;  %v4601_v6 = vadd.f32 %v9934_v41, %v4563_v54  ;;  %v4602_v14 = vadd.f32 %v9934_v41, %v4564_v25  ;;  %v4603_v29 = vadd.f32 %v9934_v41, %v4565_v57 }
 0x561   : > { %v4604_v44 = vadd.f32 %v9934_v41, %v4566_v40  ;;  %v4605_v12 = vadd.f32 %v9934_v41, %v4567_v53  ;;  %v4606_v21 = vadd.f32 %v9934_v41, %v4568_v45  ;;  %v4607_v50 = vadd.f32 %v9934_v41, %v4569_v13 }
 0x562   : > { %v4608_v63 = vadd.f32 %v9934_v41, %v4570_v18  ;;  %v4609_v24 = vadd.f32 %v9934_v41, %v4571_v9  ;;  %v4610_v31 = vadd.f32 %v9934_v41, %v4572_v59  ;;  %v4611_v60 = vadd.f32 %v9934_v41, %v4573_v1 }
 0x563   : > { %v4612_v15 = vadd.f32 %v9934_v41, %v4574_v56  ;;  %v4613_v61 = vadd.f32 %v9934_v41, %v4575_v7  ;;  %v4614_v38 = vadd.f32 %v9934_v41, %v4576_v3  ;;  %v4615_v37 = vadd.f32 %v9934_v41, %v4577_v27 }
 0x564   : > { %v4621_v26 = vmul.f32 %v14681_v22, %v4584_v30  ;;  %v4622_v19 = vmul.f32 %v14681_v22, %v4585_v0  ;;  %v4623_v10 = vmul.f32 %v14681_v22, %v4586_v32  ;;  %v4624_v28 = vmul.f32 %v14681_v22, %v4587_v43  ;;  %v14776_v32 = vpop.permute.xlu0 %4658 }
 0x565   : > { %v4625_v58 = vmul.f32 %v14681_v22, %v4588_v55  ;;  %v4626_v35 = vmul.f32 %v14681_v22, %v4589_v52  ;;  %v4627_v36 = vmul.f32 %v14681_v22, %v4590_v42  ;;  %v4628_v20 = vmul.f32 %v14681_v22, %v4591_v17 }
 0x566   : > { %v4629_v11 = vmul.f32 %v14681_v22, %v4592_v47  ;;  %v4630_v33 = vmul.f32 %v14681_v22, %v4593_v4  ;;  %v4631_v54 = vmul.f32 %v14681_v22, %v4594_v48  ;;  %v4632_v25 = vmul.f32 %v14681_v22, %v4595_v8 }
 0x567   : > { %v4633_v57 = vmul.f32 %v14681_v22, %v4596_v23  ;;  %v14732_v41 = vmul.f32 %v14681_v22, %v4597_v62  ;;  %v14735_v40 = vmul.f32 %v14681_v22, %v4598_v5  ;;  %v14738_v53 = vmul.f32 %v14681_v22, %v4599_v39 }
 0x568   : > { %v14741_v45 = vmul.f32 %v14681_v22, %v4600_v46  ;;  %v14744_v13 = vmul.f32 %v14681_v22, %v4601_v6  ;;  %v14747_v18 = vmul.f32 %v14681_v22, %v4602_v14  ;;  %v14750_v9 = vmul.f32 %v14681_v22, %v4603_v29 }
 0x569   : > { %v14753_v59 = vmul.f32 %v14681_v22, %v4604_v44  ;;  %v14756_v1 = vmul.f32 %v14681_v22, %v4605_v12  ;;  %v14759_v56 = vmul.f32 %v14681_v22, %v4606_v21  ;;  %v14762_v7 = vmul.f32 %v14681_v22, %v4607_v50 }
 0x56a   : > { %v14765_v3 = vmul.f32 %v14681_v22, %v4608_v63  ;;  %v14768_v27 = vmul.f32 %v14681_v22, %v4609_v24  ;;  %v14771_v30 = vmul.f32 %v14681_v22, %v4610_v31  ;;  %v14774_v0 = vmul.f32 %v14681_v22, %v4611_v60 }
 0x56b   : > { %v14779_v43 = vmul.f32 %v14681_v22, %v4612_v15  ;;  %v14782_v55 = vmul.f32 %v14681_v22, %v4613_v61  ;;  %v14785_v52 = vmul.f32 %v14681_v22, %v4614_v38  ;;  %v14788_v42 = vmul.f32 %v14681_v22, %v4615_v37 }
 0x56c   : > { %v14791_v17 = vadd.f32 %v14776_v32, %v4621_v26  ;;  %v14794_v47 = vadd.f32 %v14776_v32, %v4622_v19  ;;  %v14797_v4 = vadd.f32 %v14776_v32, %v4623_v10  ;;  %v14800_v48 = vadd.f32 %v14776_v32, %v4624_v28 }
 0x56d   : > { %v14803_v8 = vadd.f32 %v14776_v32, %v4625_v58  ;;  %v14806_v23 = vadd.f32 %v14776_v32, %v4626_v35  ;;  %v14812_v39 = vadd.f32 %v14776_v32, %v4627_v36  ;;  %v14816_v6 = vadd.f32 %v14776_v32, %v4628_v20 }
 0x56e   : > { %v9935_v22 = vmul.f32 -1.442695, %v14791_v17  ;;  %v9936_v62 = vmul.f32 -1.442695, %v14794_v47  ;;  %v9937_v5 = vmul.f32 -1.442695, %v14797_v4  ;;  %v14820_v29 = vadd.f32 %v14776_v32, %v4629_v11 }
 0x56f   : > { %v9938_v46 = vmul.f32 -1.442695, %v14800_v48  ;;  %v9939_v14 = vmul.f32 -1.442695, %v14803_v8  ;;  %v9940_v44 = vmul.f32 -1.442695, %v14806_v23  ;;  %v14824_v12 = vadd.f32 %v14776_v32, %v4630_v33 }
 0x570   : > { %12611 = vpow2.f32 %v9935_v22  ;;  %v9941_v21 = vmul.f32 -1.442695, %v14812_v39  ;;  %v14828_v50 = vadd.f32 %v14776_v32, %v4631_v54  ;;  %v9942_v63 = vmul.f32 -1.442695, %v14816_v6 }
 0x571   : > { %12613 = vpow2.f32 %v9936_v62  ;;  %v14832_v24 = vadd.f32 %v14776_v32, %v4632_v25  ;;  %v9943_v31 = vmul.f32 -1.442695, %v14820_v29  ;;  %v14836_v60 = vadd.f32 %v14776_v32, %v4633_v57 }
 0x572   : > { %12615 = vpow2.f32 %v9937_v5  ;;  %v9944_v15 = vmul.f32 -1.442695, %v14824_v12  ;;  %v9945_v61 = vmul.f32 -1.442695, %v14828_v50 }
 0x573   : > { %12617 = vpow2.f32 %v9938_v46  ;;  %v9946_v38 = vmul.f32 -1.442695, %v14832_v24  ;;  %v9947_v37 = vmul.f32 -1.442695, %v14836_v60 }
 0x574   : > { %12619 = vpow2.f32 %v9939_v14  ;;  %v14844_v14 = vadd.f32 %v14776_v32, %v14732_v41  ;;  %v14856_v41 = vadd.f32 %v14776_v32, %v14741_v45 }
 0x575   : > { %12621 = vpow2.f32 %v9940_v44 }
 0x576   : > { %12623 = vpow2.f32 %v9941_v21 }
 0x577   : > { %12625 = vpow2.f32 %v9942_v63  ;;  %v14848_v63 = vadd.f32 %v14776_v32, %v14735_v40  ;;  %v9948_v40 = vmul.f32 -1.442695, %v14844_v14 }
 0x578   : > { %12627 = vpow2.f32 %v9943_v31 }
 0x579   : > { %12629 = vpow2.f32 %v9944_v15 }
 0x57a   : > { %v12612_v26 = vpop.eup %12611  ;;  %12631 = vpow2.f32 %v9945_v61  ;;  %v14852_v61 = vadd.f32 %v14776_v32, %v14738_v53 }
 0x57b   : > { %v12614_v19 = vpop.eup %12613  ;;  %v4789_v10 = vadd.f32 1.0, %v12612_v26  ;;  %12633 = vpow2.f32 %v9946_v38 }
 0x57c   : > { %v12616_v28 = vpop.eup %12615  ;;  %v4790_v58 = vadd.f32 1.0, %v12614_v19  ;;  %12635 = vpow2.f32 %v9947_v37 }
 0x57d   : > { %v12618_v35 = vpop.eup %12617  ;;  %12637 = vrcp.f32 %v4789_v10  ;;  %v4791_v36 = vadd.f32 1.0, %v12616_v28  ;;  %v14861_v10 = vadd.f32 %v14776_v32, %v14744_v13 }
 0x57e   : > { %v12620_v20 = vpop.eup %12619  ;;  %12639 = vrcp.f32 %v4790_v58  ;;  %v4792_v11 = vadd.f32 1.0, %v12618_v35  ;;  %v9949_v58 = vmul.f32 -1.442695, %v14848_v63  ;;  %v14866_v35 = vadd.f32 %v14776_v32, %v14747_v18 }
 0x57f   : > { %v12622_v33 = vpop.eup %12621  ;;  %12641 = vrcp.f32 %v4791_v36  ;;  %v4793_v54 = vadd.f32 1.0, %v12620_v20  ;;  %v9950_v20 = vmul.f32 -1.442695, %v14852_v61  ;;  %v14878_v18 = vadd.f32 %v14776_v32, %v14753_v59 }
 0x580   : > { %v12624_v25 = vpop.eup %12623  ;;  %12643 = vrcp.f32 %v4792_v11  ;;  %v4794_v57 = vadd.f32 1.0, %v12622_v33  ;;  %v14872_v11 = vadd.f32 %v14776_v32, %v14750_v9  ;;  %v14885_v9 = vadd.f32 %v14776_v32, %v14756_v1 }
 0x581   : > { %v12626_v22 = vpop.eup %12625  ;;  %12645 = vrcp.f32 %v4793_v54  ;;  %v4795_v62 = vadd.f32 1.0, %v12624_v25  ;;  %v9951_v54 = vmul.f32 -1.442695, %v14856_v41  ;;  %v9953_v59 = vmul.f32 -1.442695, %v14866_v35 }
 0x582   : > { %v12628_v5 = vpop.eup %12627  ;;  %12647 = vrcp.f32 %v4794_v57  ;;  %v4796_v46 = vadd.f32 1.0, %v12626_v22  ;;  %v9952_v57 = vmul.f32 -1.442695, %v14861_v10  ;;  %v9954_v1 = vmul.f32 -1.442695, %v14872_v11 }
 0x583   : > { %v12630_v44 = vpop.eup %12629  ;;  %12649 = vrcp.f32 %v4795_v62  ;;  %v4797_v21 = vadd.f32 1.0, %v12628_v5  ;;  %v14892_v62 = vadd.f32 %v14776_v32, %v14759_v56  ;;  %v9955_v56 = vmul.f32 -1.442695, %v14878_v18 }
 0x584   : > { %v12632_v31 = vpop.eup %12631  ;;  %12651 = vrcp.f32 %v4796_v46  ;;  %v4798_v15 = vadd.f32 1.0, %v12630_v44  ;;  %v14899_v46 = vadd.f32 %v14776_v32, %v14762_v7  ;;  %v9956_v7 = vmul.f32 -1.442695, %v14885_v9 }
 0x585   : > { %v12634_v38 = vpop.eup %12633  ;;  %12653 = vrcp.f32 %v4797_v21  ;;  %v4799_v37 = vadd.f32 1.0, %v12632_v31  ;;  %v14906_v21 = vadd.f32 %v14776_v32, %v14765_v3  ;;  %v9957_v3 = vmul.f32 -1.442695, %v14892_v62 }
 0x586   : > { %v12636_v26 = vpop.eup %12635  ;;  %12655 = vrcp.f32 %v4798_v15  ;;  %v4800_v19 = vadd.f32 1.0, %v12634_v38  ;;  %v14913_v15 = vadd.f32 %v14776_v32, %v14768_v27 }
 0x587   : > { %v12638_v28 = vpop.eup %12637  ;;  %12657 = vrcp.f32 %v4799_v37  ;;  %v4801_v53 = vadd.f32 1.0, %v12636_v26  ;;  %v9958_v26 = vmul.f32 -1.442695, %v14899_v46 }
 0x588   : > { %v12640_v45 = vpop.eup %12639  ;;  %v4885_v36 = vmul.f32 %v12638_v28, %v14791_v17  ;;  %12659 = vrcp.f32 %v4800_v19 }
 0x589   : > { %v12642_v13 = vpop.eup %12641  ;;  %v4886_v33 = vmul.f32 %v12640_v45, %v14794_v47  ;;  %12661 = vrcp.f32 %v4801_v53 }
 0x58a   : > { %v12644_v25 = vpop.eup %12643  ;;  %4963 = vst.msk [vmem:[#allocation3 + $0x19] sm:$0xff] %vm4187_vm6, %v4885_v36  ;;  %v4887_v17 = vmul.f32 %v12642_v13, %v14797_v4  ;;  %12663 = vpow2.f32 %v9948_v40 }
 0x58b   : > { %v12646_v47 = vpop.eup %12645  ;;  %4964 = vst.msk [vmem:[#allocation3 + $0x21] sm:$0xff] %vm4187_vm6, %v4886_v33  ;;  %v4888_v22 = vmul.f32 %v12644_v25, %v14800_v48  ;;  %12665 = vpow2.f32 %v9949_v58  ;;  %v9960_v58 = vmul.f32 -1.442695, %v14913_v15 }
 0x58c   : > { %v12648_v4 = vpop.eup %12647  ;;  %4965 = vst.msk [vmem:[#allocation3 + $0x31] sm:$0xff] %vm4187_vm6, %v4887_v17  ;;  %v4889_v5 = vmul.f32 %v12646_v47, %v14803_v8  ;;  %12667 = vpow2.f32 %v9950_v20 }
 0x58d   : > { %v12650_v48 = vpop.eup %12649  ;;  %4966 = vst.msk [vmem:[#allocation3 + $0x39] sm:$0xff] %vm4187_vm6, %v4888_v22  ;;  %v4890_v44 = vmul.f32 %v12648_v4, %v14806_v23  ;;  %12669 = vpow2.f32 %v9951_v54 }
 0x58e   : > { %v12652_v8 = vpop.eup %12651  ;;  %4967 = vst.msk [vmem:[#allocation3 + $0x49] sm:$0xff] %vm4187_vm6, %v4889_v5  ;;  %v4891_v31 = vmul.f32 %v12650_v48, %v14812_v39  ;;  %12671 = vpow2.f32 %v9952_v57 }
 0x58f   : > { %v12654_v23 = vpop.eup %12653  ;;  %4968 = vst.msk [vmem:[#allocation3 + $0x51] sm:$0xff] %vm4187_vm6, %v4890_v44  ;;  %v4892_v38 = vmul.f32 %v12652_v8, %v14816_v6  ;;  %12673 = vpow2.f32 %v9953_v59  ;;  %v9959_v6 = vmul.f32 -1.442695, %v14906_v21 }
 0x590   : > { %v12656_v37 = vpop.eup %12655  ;;  %4969 = vst.msk [vmem:[#allocation3 + $0x61] sm:$0xff] %vm4187_vm6, %v4891_v31  ;;  %v4893_v39 = vmul.f32 %v12654_v23, %v14820_v29  ;;  %12675 = vpow2.f32 %v9954_v1  ;;  %v14963_v23 = vadd.f32 %v14776_v32, %v14771_v30 }
 0x591   : > { %v12658_v19 = vpop.eup %12657  ;;  %v14921_v40 = vld [vmem:[#allocation3 + $0x19] sm:$0xff]  ;;  %4970 = vst.msk [vmem:[#allocation3 + $0x69] sm:$0xff] %vm4187_vm6, %v4892_v38  ;;  %v4894_v27 = vmul.f32 %v12656_v37, %v14824_v12  ;;  %12677 = vpow2.f32 %v9955_v56  ;;  %v14967_v37 = vadd.f32 %v14776_v32, %v14774_v0  ;;  %v14981_v0 = vadd.f32 %v14776_v32, %v14782_v55 }
 0x592   : > { %v12660_v28 = vpop.eup %12659  ;;  %11467 = vmatprep.mubr.msk.f32.mxu0 %vm4187_vm6, %v14921_v40  ;;  %v14928_v53 = vld [vmem:[#allocation3 + $0x21] sm:$0xff]  ;;  %4971 = vst.msk [vmem:[#allocation3 + $0x79] sm:$0xff] %vm4187_vm6, %v4893_v39  ;;  %v4895_v29 = vmul.f32 %v12658_v19, %v14828_v50  ;;  %12679 = vpow2.f32 %v9956_v7  ;;  %v14993_v55 = vadd.f32 %v14776_v32, %v14788_v42 }
 0x593   : > { %v12662_v45 = vpop.eup %12661  ;;  %11468 = vmatmul.mubr.msk.f32.gmra.mrb[20].mxu0 %vm4187_vm6, %v14928_v53  ;;  %v14935_v12 = vld [vmem:[#allocation3 + $0x31] sm:$0xff]  ;;  %4972 = vst.msk [vmem:[#allocation3 + $0x81] sm:$0xff] %vm4187_vm6, %v4894_v27  ;;  %v4896_v36 = vmul.f32 %v12660_v28, %v14832_v24  ;;  %12681 = vpow2.f32 %v9957_v3  ;;  %v14973_v27 = vadd.f32 %v14776_v32, %v14779_v43  ;;  %v9961_v43 = vmul.f32 -1.442695, %v14963_v23 }
 0x594   : > { %v12664_v20 = vpop.eup %12663  ;;  %11470 = vmatprep.mubr.msk.f32.mxu0 %vm4187_vm6, %v14935_v12  ;;  %4973 = vst.msk [vmem:[#allocation3 + $0x91] sm:$0xff] %vm4187_vm6, %v4895_v29  ;;  %v4897_v50 = vmul.f32 %v12662_v45, %v14836_v60  ;;  %12683 = vpow2.f32 %v9958_v26  ;;  %v14944_v25 = vld [vmem:[#allocation3 + $0x39] sm:$0xff]  ;;  %v14988_v45 = vadd.f32 %v14776_v32, %v14785_v52  ;;  %v9964_v32 = vmul.f32 -1.442695, %v14981_v0 }
 0x595   : > { %v12666_v13 = vpop.eup %12665  ;;  %4974 = vst.msk [vmem:[#allocation3 + $0x99] sm:$0xff] %vm4187_vm6, %v4896_v36  ;;  %v4802_v33 = vadd.f32 1.0, %v12664_v20  ;;  %12685 = vpow2.f32 %v9959_v6  ;;  %v14949_v57 = vld [vmem:[#allocation3 + $0x49] sm:$0xff] }
 0x596   : > { %v12668_v54 = vpop.eup %12667  ;;  %4975 = vst.msk [vmem:[#allocation3 + $0xa9] sm:$0xff] %vm4187_vm6, %v4897_v50  ;;  %v4803_v24 = vadd.f32 1.0, %v12666_v13  ;;  %12687 = vpow2.f32 %v9960_v58  ;;  %v14953_v1 = vld [vmem:[#allocation3 + $0x51] sm:$0xff]  ;;  %v9962_v50 = vmul.f32 -1.442695, %v14967_v37 }
 0x597   : > { %v12670_v17 = vpop.eup %12669  ;;  %11471 = vmatmul.mubr.msk.f32.gmra.mrb[22].mxu0 %vm4187_vm6, %v14944_v25  ;;  %12689 = vrcp.f32 %v4802_v33  ;;  %v4804_v60 = vadd.f32 1.0, %v12668_v54  ;;  %v14957_v56 = vld [vmem:[#allocation3 + $0x61] sm:$0xff] }
 0x598   : > { %v12672_v47 = vpop.eup %12671  ;;  %11473 = vmatprep.mubr.msk.f32.mxu0 %vm4187_vm6, %v14949_v57  ;;  %12691 = vrcp.f32 %v4803_v24  ;;  %v4805_v22 = vadd.f32 1.0, %v12670_v17  ;;  %v14969_v26 = vld [vmem:[#allocation3 + $0x69] sm:$0xff]  ;;  %v9963_v24 = vmul.f32 -1.442695, %v14973_v27 }
 0x599   : > { %v12674_v59 = vpop.eup %12673  ;;  %12693 = vrcp.f32 %v4804_v60  ;;  %v4806_v4 = vadd.f32 1.0, %v12672_v47  ;;  %v14977_v30 = vld [vmem:[#allocation3 + $0x79] sm:$0xff]  ;;  %v9965_v47 = vmul.f32 -1.442695, %v14988_v45 }
 0x59a   : > { %v12676_v5 = vpop.eup %12675  ;;  %12695 = vrcp.f32 %v4805_v22  ;;  %v4807_v48 = vadd.f32 1.0, %v12674_v59  ;;  %v14995_v33 = vld [vmem:[#allocation3 + $0x81] sm:$0xff] }
 0x59b   : > { %v12678_v44 = vpop.eup %12677  ;;  %11474 = vmatmul.mubr.msk.f32.gmra.mrb[24].mxu0 %vm4187_vm6, %v14953_v1  ;;  %12697 = vrcp.f32 %v4806_v4  ;;  %v4808_v8 = vadd.f32 1.0, %v12676_v5  ;;  %v15001_v52 = vld [vmem:[#allocation3 + $0x91] sm:$0xff] }
 0x59c   : > { %v12680_v31 = vpop.eup %12679  ;;  %11476 = vmatprep.mubr.msk.f32.mxu0 %vm4187_vm6, %v14957_v56  ;;  %12699 = vrcp.f32 %v4807_v48  ;;  %v4809_v7 = vadd.f32 1.0, %v12678_v44  ;;  %v15013_v5 = vld [vmem:[#allocation3 + $0x99] sm:$0xff] }
 0x59d   : > { %v12682_v38 = vpop.eup %12681  ;;  %12701 = vrcp.f32 %v4808_v8  ;;  %v4810_v3 = vadd.f32 1.0, %v12680_v31  ;;  %v15019_v44 = vld [vmem:[#allocation3 + $0xa9] sm:$0xff] }
 0x59e   : > { %v12684_v39 = vpop.eup %12683  ;;  %12703 = vrcp.f32 %v4809_v7  ;;  %v4811_v19 = vadd.f32 1.0, %v12682_v38 }
 0x59f   : > { %v12686_v6 = vpop.eup %12685  ;;  %11477 = vmatmul.mubr.msk.f32.gmra.mrb[26].mxu0 %vm4187_vm6, %v14969_v26  ;;  %12705 = vrcp.f32 %v4810_v3  ;;  %v4812_v28 = vadd.f32 1.0, %v12684_v39 }
 0x5a0   : > { %v12688_v29 = vpop.eup %12687  ;;  %11479 = vmatprep.mubr.msk.f32.mxu0 %vm4187_vm6, %v14977_v30  ;;  %12707 = vrcp.f32 %v4811_v19  ;;  %v4813_v58 = vadd.f32 1.0, %v12686_v6 }
 0x5a1   : > { %v12690_v36 = vpop.eup %12689  ;;  %12709 = vrcp.f32 %v4812_v28  ;;  %v4814_v20 = vadd.f32 1.0, %v12688_v29 }
 0x5a2   : > { %v12692_v13 = vpop.eup %12691  ;;  %v4898_v54 = vmul.f32 %v12690_v36, %v14844_v14  ;;  %12711 = vrcp.f32 %v4813_v58 }
 0x5a3   : > { %v12694_v17 = vpop.eup %12693  ;;  %11480 = vmatmul.mubr.msk.f32.gmra.mrb[28].mxu0 %vm4187_vm6, %v14995_v33  ;;  %v4899_v60 = vmul.f32 %v12692_v13, %v14848_v63  ;;  %12713 = vrcp.f32 %v4814_v20  ;;  %v9966_v63 = vmul.f32 -1.442695, %v14993_v55 }
 0x5a4   : > { %v12696_v42 = vpop.eup %12695  ;;  %11482 = vmatprep.mubr.msk.f32.mxu0 %vm4187_vm6, %v15001_v52  ;;  %4976 = vst.msk [vmem:[#allocation3 + $0xb1] sm:$0xff] %vm4187_vm6, %v4898_v54  ;;  %v4900_v14 = vmul.f32 %v12694_v17, %v14852_v61  ;;  %12715 = vpow2.f32 %v9961_v43 }
 0x5a5   : > { %v12698_v22 = vpop.eup %12697  ;;  %4977 = vst.msk [vmem:[#allocation3 + $0xc1] sm:$0xff] %vm4187_vm6, %v4899_v60  ;;  %v4901_v59 = vmul.f32 %v12696_v42, %v14856_v41  ;;  %12717 = vpow2.f32 %v9962_v50 }
 0x5a6   : > { %v12700_v4 = vpop.eup %12699  ;;  %4978 = vst.msk [vmem:[#allocation3 + $0xc9] sm:$0xff] %vm4187_vm6, %v4900_v14  ;;  %v4902_v48 = vmul.f32 %v12698_v22, %v14861_v10  ;;  %12719 = vpow2.f32 %v9963_v24 }
 0x5a7   : > { %v12702_v61 = vpop.eup %12701  ;;  %11483 = vmatmul.mubr.msk.f32.gmra.mrb[30].mxu0 %vm4187_vm6, %v15013_v5  ;;  %4979 = vst.msk [vmem:[#allocation3 + $0xd9] sm:$0xff] %vm4187_vm6, %v4901_v59  ;;  %v4903_v41 = vmul.f32 %v12700_v4, %v14866_v35  ;;  %12721 = vpow2.f32 %v9964_v32 }
 0x5a8   : > { %v12704_v8 = vpop.eup %12703  ;;  %11485 = vmatprep.mubr.msk.f32.mxu0 %vm4187_vm6, %v15019_v44  ;;  %4980 = vst.msk [vmem:[#allocation3 + $0xe1] sm:$0xff] %vm4187_vm6, %v4902_v48  ;;  %v4904_v10 = vmul.f32 %v12702_v61, %v14872_v11  ;;  %12723 = vpow2.f32 %v9965_v47 }
 0x5a9   : > { %v12706_v31 = vpop.eup %12705  ;;  %4981 = vst.msk [vmem:[#allocation3 + $0xf1] sm:$0xff] %vm4187_vm6, %v4903_v41  ;;  %v4905_v7 = vmul.f32 %v12704_v8, %v14878_v18  ;;  %12725 = vpow2.f32 %v9966_v63 }
 0x5aa   : > { %v12708_v38 = vpop.eup %12707  ;;  %4982 = vst.msk [vmem:[#allocation3 + $0xf9] sm:$0xff] %vm4187_vm6, %v4904_v10  ;;  %v4906_v35 = vmul.f32 %v12706_v31, %v14885_v9 }
 0x5ab   : > { %v12710_v3 = vpop.eup %12709  ;;  %v15031_v39 = vld [vmem:[#allocation3 + $0xb1] sm:$0xff]  ;;  %4983 = vst.msk [vmem:[#allocation3 + $0x109] sm:$0xff] %vm4187_vm6, %v4905_v7  ;;  %v4907_v19 = vmul.f32 %v12708_v38, %v14892_v62 }
 0x5ac   : > { %v12712_v11 = vpop.eup %12711  ;;  %11486 = vmatmul.mubr.msk.f32.gmra.mrb[32].mxu0 %vm4187_vm6, %v15031_v39  ;;  %v15037_v6 = vld [vmem:[#allocation3 + $0xc1] sm:$0xff]  ;;  %4984 = vst.msk [vmem:[#allocation3 + $0x111] sm:$0xff] %vm4187_vm6, %v4906_v35  ;;  %v4908_v18 = vmul.f32 %v12710_v3, %v14899_v46 }
 0x5ad   : > { %v12714_v28 = vpop.eup %12713  ;;  %11488 = vmatprep.mubr.msk.f32.mxu0 %vm4187_vm6, %v15037_v6  ;;  %4985 = vst.msk [vmem:[#allocation3 + $0x121] sm:$0xff] %vm4187_vm6, %v4907_v19  ;;  %v4909_v9 = vmul.f32 %v12712_v11, %v14906_v21  ;;  %v15047_v43 = vld [vmem:[#allocation3 + $0xc9] sm:$0xff]  ;;  %v4996_v19 = vld [vmem:[#allocation3] sm:$0xff] }
 0x5ae   : > { %v12716_v29 = vpop.eup %12715  ;;  %4986 = vst.msk [vmem:[#allocation3 + $0x129] sm:$0xff] %vm4187_vm6, %v4908_v18  ;;  %v4910_v62 = vmul.f32 %v12714_v28, %v14913_v15  ;;  %v15052_v20 = vld [vmem:[#allocation3 + $0xd9] sm:$0xff]  ;;  %v6126_v28 = vld [vmem:[%s16769_s8 + $0x38] sm:$0xff] }
 0x5af   : > { %v12718_v58 = vpop.eup %12717  ;;  %4987 = vst.msk [vmem:[#allocation3 + $0x139] sm:$0xff] %vm4187_vm6, %v4909_v9  ;;  %v4815_v36 = vadd.f32 1.0, %v12716_v29  ;;  %v15057_v17 = vld [vmem:[#allocation3 + $0xe1] sm:$0xff] }
 0x5b0   : > { %v12720_v46 = vpop.eup %12719  ;;  %11489 = vmatmul.mubr.msk.f32.gmra.mrb[34].mxu0 %vm4187_vm6, %v15047_v43  ;;  %4988 = vst.msk [vmem:[#allocation3 + $0x141] sm:$0xff] %vm4187_vm6, %v4910_v62  ;;  %v4816_v21 = vadd.f32 1.0, %v12718_v58  ;;  %v15061_v32 = vld [vmem:[#allocation3 + $0xf1] sm:$0xff]  ;;  %v6125_v18 = vld [vmem:[%s16769_s8 + $0x30] sm:$0xff]  ;;  %v4997_v9 = vld [vmem:[#allocation3 + $0x8] sm:$0xff] }
 0x5b1   : > { %v12722_v50 = vpop.eup %12721  ;;  %11491 = vmatprep.mubr.msk.f32.mxu0 %vm4187_vm6, %v15052_v20  ;;  %12727 = vrcp.f32 %v4815_v36  ;;  %v4817_v15 = vadd.f32 1.0, %v12720_v46  ;;  %v15065_v14 = vld [vmem:[#allocation3 + $0xf9] sm:$0xff]  ;;  %v15128_v29 = vpack.c.bf16 %v6126_v28, %v6125_v18  ;;  %v15141_v36 = vld [vmem:[#allocation3 + $0x30] sm:$0xff] }
 0x5b2   : > { %v12724_v13 = vpop.eup %12723  ;;  %12729 = vrcp.f32 %v4816_v21  ;;  %v4818_v54 = vadd.f32 1.0, %v12722_v50  ;;  %v15069_v47 = vld [vmem:[#allocation3 + $0x109] sm:$0xff]  ;;  %v15131_v62 = vld [vmem:[#allocation3 + $0x18] sm:$0xff]  ;;  %v15137_v58 = vld [vmem:[#allocation3 + $0x20] sm:$0xff] }
 0x5b3   : > { %v12726_v24 = vpop.eup %12725  ;;  %12731 = vrcp.f32 %v4817_v15  ;;  %v4819_v60 = vadd.f32 1.0, %v12724_v13  ;;  %v15073_v59 = vld [vmem:[#allocation3 + $0x111] sm:$0xff]  ;;  %v15157_v50 = vld [vmem:[#allocation3 + $0x60] sm:$0xff]  ;;  %v15161_v15 = vld [vmem:[#allocation3 + $0x68] sm:$0xff] }
 0x5b4   : > { %11492 = vmatmul.mubr.msk.f32.gmra.mrb[36].mxu0 %vm4187_vm6, %v15057_v17  ;;  %12733 = vrcp.f32 %v4818_v54  ;;  %v4820_v42 = vadd.f32 1.0, %v12726_v24  ;;  %v15077_v4 = vld [vmem:[#allocation3 + $0x121] sm:$0xff]  ;;  %v15145_v46 = vld [vmem:[#allocation3 + $0x38] sm:$0xff]  ;;  %v15153_v21 = vld [vmem:[#allocation3 + $0x50] sm:$0xff] }
 0x5b5   : > { %11494 = vmatprep.mubr.msk.f32.mxu0 %vm4187_vm6, %v15061_v32  ;;  %12735 = vrcp.f32 %v4819_v60  ;;  %v15085_v7 = vld [vmem:[#allocation3 + $0x129] sm:$0xff]  ;;  %v15165_v13 = vld [vmem:[#allocation3 + $0x78] sm:$0xff]  ;;  %v15169_v54 = vld [vmem:[#allocation3 + $0x80] sm:$0xff] }
 0x5b6   : > { %12737 = vrcp.f32 %v4820_v42  ;;  %v15173_v24 = vld [vmem:[#allocation3 + $0x90] sm:$0xff]  ;;  %v15177_v60 = vld [vmem:[#allocation3 + $0x98] sm:$0xff]  ;;  %v15181_v42 = vld [vmem:[#allocation3 + $0xa8] sm:$0xff] }
 0x5b8   : > { %11495 = vmatmul.mubr.msk.f32.gmra.mrb[38].mxu0 %vm4187_vm6, %v15065_v14 }
 0x5b9   : > { %11497 = vmatprep.mubr.msk.f32.mxu0 %vm4187_vm6, %v15069_v47 }
 0x5bb   : > { %v12728_v22 = vpop.eup %12727 }
 0x5bc   : > { %v12730_v63 = vpop.eup %12729  ;;  %11498 = vmatmul.mubr.msk.f32.gmra.mrb[40].mxu0 %vm4187_vm6, %v15073_v59  ;;  %v4911_v48 = vmul.f32 %v12728_v22, %v14963_v23  ;;  %v15091_v23 = vld [vmem:[#allocation3 + $0x139] sm:$0xff]  ;;  %v15185_v22 = vld [vmem:[#allocation3 + $0xb0] sm:$0xff] }
 0x5bd   : > { %v12732_v61 = vpop.eup %12731  ;;  %11500 = vmatprep.mubr.msk.f32.mxu0 %vm4187_vm6, %v15077_v4  ;;  %v4912_v41 = vmul.f32 %v12730_v63, %v14967_v37  ;;  %v15189_v63 = vld [vmem:[#allocation3 + $0xc0] sm:$0xff] }
 0x5be   : > { %v12734_v8 = vpop.eup %12733  ;;  %4989 = vst.msk [vmem:[#allocation3 + $0x151] sm:$0xff] %vm4187_vm6, %v4911_v48  ;;  %v4913_v10 = vmul.f32 %v12732_v61, %v14973_v27  ;;  %v15193_v48 = vld [vmem:[#allocation3 + $0xc8] sm:$0xff]  ;;  %v15197_v61 = vld [vmem:[#allocation3 + $0xd8] sm:$0xff] }
 0x5bf   : > { %v12736_v31 = vpop.eup %12735  ;;  %4990 = vst.msk [vmem:[#allocation3 + $0x159] sm:$0xff] %vm4187_vm6, %v4912_v41  ;;  %v4914_v38 = vmul.f32 %v12734_v8, %v14981_v0  ;;  %v15100_v0 = vld [vmem:[#allocation3 + $0x141] sm:$0xff]  ;;  %v15205_v8 = vld [vmem:[#allocation3 + $0xf0] sm:$0xff] }
 0x5c0   : > { %v12738_v35 = vpop.eup %12737  ;;  %11501 = vmatmul.mubr.msk.f32.gmra.mrb[42].mxu0 %vm4187_vm6, %v15085_v7  ;;  %4991 = vst.msk [vmem:[#allocation3 + $0x169] sm:$0xff] %vm4187_vm6, %v4913_v10  ;;  %v4915_v37 = vmul.f32 %v12736_v31, %v14988_v45  ;;  %v15201_v41 = vld [vmem:[#allocation3 + $0xe0] sm:$0xff]  ;;  %v15209_v10 = vld [vmem:[#allocation3 + $0xf8] sm:$0xff]  ;;  %v15213_v31 = vld [vmem:[#allocation3 + $0x108] sm:$0xff] }
 0x5c1   : > { %11503 = vmatprep.mubr.msk.f32.mxu0 %vm4187_vm6, %v15091_v23  ;;  %4992 = vst.msk [vmem:[#allocation3 + $0x171] sm:$0xff] %vm4187_vm6, %v4914_v38  ;;  %v4916_v27 = vmul.f32 %v12738_v35, %v14993_v55  ;;  %v15217_v38 = vld [vmem:[#allocation3 + $0x110] sm:$0xff]  ;;  %v15221_v35 = vld [vmem:[#allocation3 + $0x120] sm:$0xff] }
 0x5c2   : > { %4993 = vst.msk [vmem:[#allocation3 + $0x181] sm:$0xff] %vm4187_vm6, %v4915_v37  ;;  %v15225_v37 = vld [vmem:[#allocation3 + $0x128] sm:$0xff] }
 0x5c3   : > { %4994 = vst.msk [vmem:[#allocation3 + $0x189] sm:$0xff] %vm4187_vm6, %v4916_v27  ;;  %v15229_v27 = vld [vmem:[#allocation3 + $0x138] sm:$0xff] }
 0x5c4   : > { %11504 = vmatmul.mubr.msk.f32.gmra.mrb[44].mxu0 %vm4187_vm6, %v15100_v0 }
 0x5c5   : > { %v15105_v3 = vld [vmem:[#allocation3 + $0x151] sm:$0xff] }
 0x5c6   : > { %17049 = vst [vmem:[#allocation49_spill] sm:$0xff] %v15105_v3  ;;  %11506 = vmatprep.mubr.msk.f32.mxu0 %vm4187_vm6, %v15105_v3  ;;  %v15109_v45 = vld [vmem:[#allocation3 + $0x159] sm:$0xff]  ;;  %v15237_v18 = vld [vmem:[#allocation3 + $0x150] sm:$0xff]  ;;  %v15269_v3 = vld [vmem:[#allocation3 + $0x22] sm:$0xff] }
 0x5c7   : > { %17050 = vst [vmem:[#allocation50_spill] sm:$0xff] %v15109_v45  ;;  %v15113_v55 = vld [vmem:[#allocation3 + $0x169] sm:$0xff]  ;;  %v15241_v28 = vld [vmem:[#allocation3 + $0x158] sm:$0xff] }
 0x5c8   : > { %11507 = vmatmul.mubr.msk.f32.gmra.mrb[46].mxu0 %vm4187_vm6, %v15109_v45  ;;  %17051 = vst [vmem:[#allocation51_spill] sm:$0xff] %v15113_v55  ;;  %v15117_v11 = vld [vmem:[#allocation3 + $0x171] sm:$0xff]  ;;  %v15263_v45 = vld [vmem:[#allocation3 + $0x1a] sm:$0xff] }
 0x5c9   : > { %11509 = vmatprep.mubr.msk.f32.mxu0 %vm4187_vm6, %v15113_v55  ;;  %17052 = vst [vmem:[#allocation52_spill] sm:$0xff] %v15117_v11  ;;  %v15249_v49 = vld [vmem:[#allocation3 + $0x170] sm:$0xff]  ;;  %v15260_v55 = vpack.c.bf16 %v6513_v51, %v6512_v16  ;;  %v15277_v51 = vld [vmem:[#allocation3 + $0x3a] sm:$0xff] }
 0x5ca   : > { %17054 = vst [vmem:[#allocation54_spill] sm:$0xff] %v15277_v51  ;;  %v15281_v16 = vld [vmem:[#allocation3 + $0x4a] sm:$0xff] }
 0x5cb   : > { %17055 = vst [vmem:[#allocation55_spill] sm:$0xff] %v15281_v16 }
 0x5cc   : > { %11510 = vmatmul.mubr.msk.f32.gmra.mrb[48].mxu0 %vm4187_vm6, %v15117_v11  ;;  %v5707_v11 = vld [vmem:[#allocation3 + $0xa] sm:$0xff] }
 0x5cd   : > { %11516 = vmatprep.mubr.msk.f32.mxu0 %vm4187_vm6, %v4996_v19  ;;  %v15233_v19 = vld [vmem:[#allocation3 + $0x140] sm:$0xff] }
 0x5d0   : > { %11517 = vmatmul.mubr.msk.f32.vlgmr.msra.gmra.mrb[18].mxu0 %vm4187_vm6, %v4997_v9  ;;  %v15245_v9 = vld [vmem:[#allocation3 + $0x168] sm:$0xff] }
 0x5d1   : > { %12015 = vmatpush3.bf16.msra.mxu0 %v14675_v2  ;;  %11519 = vmatprep.mubr.msk.f32.mxu0 %vm4187_vm6, %v15131_v62  ;;  %v15149_v2 = vld [vmem:[#allocation3 + $0x48] sm:$0xff] }
 0x5d2   : > { %12017 = vmatprep.subr.bf16.mxu0 %v15128_v29 }
 0x5d4   : > { %11520 = vmatmul.mubr.msk.f32.gmra.mrb[20].mxu0 %vm4187_vm6, %v15137_v58 }
 0x5d5   : > { %11522 = vmatprep.mubr.msk.f32.mxu0 %vm4187_vm6, %v15141_v36 }
 0x5d8   : > { %11523 = vmatmul.mubr.msk.f32.gmra.mrb[22].mxu0 %vm4187_vm6, %v15145_v46 }
 0x5d9   : > { %11525 = vmatprep.mubr.msk.f32.mxu0 %vm4187_vm6, %v15149_v2 }
 0x5dc   : > { %11526 = vmatmul.mubr.msk.f32.gmra.mrb[24].mxu0 %vm4187_vm6, %v15153_v21 }
 0x5dd   : > { %11528 = vmatprep.mubr.msk.f32.mxu0 %vm4187_vm6, %v15157_v50 }
 0x5e0   : > { %11529 = vmatmul.mubr.msk.f32.gmra.mrb[26].mxu0 %vm4187_vm6, %v15161_v15 }
 0x5e1   : > { %11531 = vmatprep.mubr.msk.f32.mxu0 %vm4187_vm6, %v15165_v13 }
 0x5e4   : > { %11532 = vmatmul.mubr.msk.f32.gmra.mrb[28].mxu0 %vm4187_vm6, %v15169_v54 }
 0x5e5   : > { %11534 = vmatprep.mubr.msk.f32.mxu0 %vm4187_vm6, %v15173_v24 }
 0x5e8   : > { %11535 = vmatmul.mubr.msk.f32.gmra.mrb[30].mxu0 %vm4187_vm6, %v15177_v60 }
 0x5e9   : > { %11537 = vmatprep.mubr.msk.f32.mxu0 %vm4187_vm6, %v15181_v42 }
 0x5ec   : > { %11538 = vmatmul.mubr.msk.f32.gmra.mrb[32].mxu0 %vm4187_vm6, %v15185_v22 }
 0x5ed   : > { %11540 = vmatprep.mubr.msk.f32.mxu0 %vm4187_vm6, %v15189_v63 }
 0x5f0   : > { %11541 = vmatmul.mubr.msk.f32.gmra.mrb[34].mxu0 %vm4187_vm6, %v15193_v48 }
 0x5f1   : > { %11543 = vmatprep.mubr.msk.f32.mxu0 %vm4187_vm6, %v15197_v61 }
 0x5f4   : > { %11544 = vmatmul.mubr.msk.f32.gmra.mrb[36].mxu0 %vm4187_vm6, %v15201_v41 }
 0x5f5   : > { %11546 = vmatprep.mubr.msk.f32.mxu0 %vm4187_vm6, %v15205_v8 }
 0x5f8   : > { %11547 = vmatmul.mubr.msk.f32.gmra.mrb[38].mxu0 %vm4187_vm6, %v15209_v10 }
 0x5f9   : > { %11549 = vmatprep.mubr.msk.f32.mxu0 %vm4187_vm6, %v15213_v31 }
 0x5fc   : > { %11550 = vmatmul.mubr.msk.f32.gmra.mrb[40].mxu0 %vm4187_vm6, %v15217_v38 }
 0x5fd   : > { %11552 = vmatprep.mubr.msk.f32.mxu0 %vm4187_vm6, %v15221_v35 }
 0x600   : > { %11553 = vmatmul.mubr.msk.f32.gmra.mrb[42].mxu0 %vm4187_vm6, %v15225_v37 }
 0x601   : > { %11555 = vmatprep.mubr.msk.f32.mxu0 %vm4187_vm6, %v15229_v27 }
 0x604   : > { %11556 = vmatmul.mubr.msk.f32.gmra.mrb[44].mxu0 %vm4187_vm6, %v15233_v19 }
 0x605   : > { %11558 = vmatprep.mubr.msk.f32.mxu0 %vm4187_vm6, %v15237_v18 }
 0x608   : > { %11559 = vmatmul.mubr.msk.f32.gmra.mrb[46].mxu0 %vm4187_vm6, %v15241_v28 }
 0x609   : > { %11561 = vmatprep.mubr.msk.f32.mxu0 %vm4187_vm6, %v15245_v9 }
 0x60c   : > { %11562 = vmatmul.mubr.msk.f32.gmra.mrb[48].mxu0 %vm4187_vm6, %v15249_v49 }
 0x60d   : > { %11568 = vmatprep.mubr.msk.f32.mxu0 %vm4187_vm6, %v5706_v34  ;;  %v15273_v34 = vld [vmem:[#allocation3 + $0x32] sm:$0xff] }
 0x60e   : > { %17053 = vst [vmem:[#allocation53_spill] sm:$0xff] %v15273_v34 }
 0x610   : > { %11569 = vmatmul.mubr.msk.f32.vlgmr.msra.gmra.mrb[18].mxu0 %vm4187_vm6, %v5707_v11  ;;  %v15285_v11 = vld [vmem:[#allocation3 + $0x52] sm:$0xff] }
 0x611   : > { %12019 = vmatpush3.bf16.msra.mxu0 %v15128_v29  ;;  %11571 = vmatprep.mubr.msk.f32.mxu0 %vm4187_vm6, %v15263_v45  ;;  %17056 = vst [vmem:[#allocation56_spill] sm:$0xff] %v15285_v11  ;;  %v15289_v29 = vld [vmem:[#allocation3 + $0x62] sm:$0xff] }
 0x612   : > { %12021 = vmatprep.subr.bf16.mxu0 %v15260_v55  ;;  %17057 = vst [vmem:[#allocation58_spill] sm:$0xff] %v15289_v29 }
 0x614   : > { %11572 = vmatmul.mubr.msk.f32.gmra.mrb[20].mxu0 %vm4187_vm6, %v15269_v3 }
 0x615   : > { %11574 = vmatprep.mubr.msk.f32.mxu0 %vm4187_vm6, %v15273_v34  ;;  %v15293_v34 = vld [vmem:[#allocation3 + $0x6a] sm:$0xff] }
 0x616   : > { %17058 = vst [vmem:[#allocation59_spill] sm:$0xff] %v15293_v34 }
 0x618   : > { %11575 = vmatmul.mubr.msk.f32.gmra.mrb[22].mxu0 %vm4187_vm6, %v15277_v51  ;;  %v15297_v51 = vld [vmem:[#allocation3 + $0x7a] sm:$0xff] }
 0x619   : > { %11577 = vmatprep.mubr.msk.f32.mxu0 %vm4187_vm6, %v15281_v16  ;;  %17059 = vst [vmem:[#allocation61_spill] sm:$0xff] %v15297_v51  ;;  %v15301_v16 = vld [vmem:[#allocation3 + $0x82] sm:$0xff] }
 0x61a   : > { %17060 = vst [vmem:[#allocation64_spill] sm:$0xff] %v15301_v16 }
 0x61c   : > { %11578 = vmatmul.mubr.msk.f32.gmra.mrb[24].mxu0 %vm4187_vm6, %v15285_v11  ;;  %v15305_v11 = vld [vmem:[#allocation3 + $0x92] sm:$0xff] }
 0x61d   : > { %11580 = vmatprep.mubr.msk.f32.mxu0 %vm4187_vm6, %v15289_v29  ;;  %17061 = vst [vmem:[#allocation7_spill] sm:$0xff] %v15305_v11  ;;  %v15309_v29 = vld [vmem:[#allocation3 + $0x9a] sm:$0xff] }
 0x61e   : > { %17062 = vst [vmem:[#allocation38_spill] sm:$0xff] %v15309_v29 }
 0x620   : > { %11581 = vmatmul.mubr.msk.f32.gmra.mrb[26].mxu0 %vm4187_vm6, %v15293_v34  ;;  %v15313_v34 = vld [vmem:[#allocation3 + $0xaa] sm:$0xff] }
 0x621   : > { %11583 = vmatprep.mubr.msk.f32.mxu0 %vm4187_vm6, %v15297_v51  ;;  %17063 = vst [vmem:[#allocation39_spill] sm:$0xff] %v15313_v34  ;;  %v15317_v51 = vld [vmem:[#allocation3 + $0xb2] sm:$0xff] }
 0x622   : > { %17064 = vst [vmem:[#allocation40_spill] sm:$0xff] %v15317_v51 }
 0x624   : > { %11584 = vmatmul.mubr.msk.f32.gmra.mrb[28].mxu0 %vm4187_vm6, %v15301_v16  ;;  %v15321_v16 = vld [vmem:[#allocation3 + $0xc2] sm:$0xff] }
 0x625   : > { %11586 = vmatprep.mubr.msk.f32.mxu0 %vm4187_vm6, %v15305_v11  ;;  %17065 = vst [vmem:[#allocation41_spill] sm:$0xff] %v15321_v16  ;;  %v15325_v11 = vld [vmem:[#allocation3 + $0xca] sm:$0xff] }
 0x626   : > { %17066 = vst [vmem:[#allocation44_spill] sm:$0xff] %v15325_v11 }
 0x628   : > { %11587 = vmatmul.mubr.msk.f32.gmra.mrb[30].mxu0 %vm4187_vm6, %v15309_v29  ;;  %v15329_v29 = vld [vmem:[#allocation3 + $0xda] sm:$0xff] }
 0x629   : > { %11589 = vmatprep.mubr.msk.f32.mxu0 %vm4187_vm6, %v15313_v34  ;;  %17067 = vst [vmem:[#allocation45_spill] sm:$0xff] %v15329_v29  ;;  %v15333_v34 = vld [vmem:[#allocation3 + $0xe2] sm:$0xff] }
 0x62a   : > { %17068 = vst [vmem:[#allocation46_spill] sm:$0xff] %v15333_v34 }
 0x62c   : > { %11590 = vmatmul.mubr.msk.f32.gmra.mrb[32].mxu0 %vm4187_vm6, %v15317_v51  ;;  %v15337_v51 = vld [vmem:[#allocation3 + $0xf2] sm:$0xff] }
 0x62d   : > { %11592 = vmatprep.mubr.msk.f32.mxu0 %vm4187_vm6, %v15321_v16  ;;  %17069 = vst [vmem:[#allocation69_spill] sm:$0xff] %v15337_v51  ;;  %v15341_v16 = vld [vmem:[#allocation3 + $0xfa] sm:$0xff] }
 0x62e   : > { %17070 = vst [vmem:[#allocation70_spill] sm:$0xff] %v15341_v16 }
 0x630   : > { %11593 = vmatmul.mubr.msk.f32.gmra.mrb[34].mxu0 %vm4187_vm6, %v15325_v11  ;;  %v15345_v11 = vld [vmem:[#allocation3 + $0x10a] sm:$0xff] }
 0x631   : > { %11595 = vmatprep.mubr.msk.f32.mxu0 %vm4187_vm6, %v15329_v29  ;;  %17071 = vst [vmem:[#allocation57_spill] sm:$0xff] %v15345_v11  ;;  %v15349_v29 = vld [vmem:[#allocation3 + $0x112] sm:$0xff] }
 0x632   : > { %17072 = vst [vmem:[#allocation60_spill] sm:$0xff] %v15349_v29 }
 0x634   : > { %11596 = vmatmul.mubr.msk.f32.gmra.mrb[36].mxu0 %vm4187_vm6, %v15333_v34  ;;  %v15353_v34 = vld [vmem:[#allocation3 + $0x122] sm:$0xff] }
 0x635   : > { %11598 = vmatprep.mubr.msk.f32.mxu0 %vm4187_vm6, %v15337_v51  ;;  %17073 = vst [vmem:[#allocation62_spill] sm:$0xff] %v15353_v34  ;;  %v15357_v51 = vld [vmem:[#allocation3 + $0x12a] sm:$0xff] }
 0x636   : > { %17074 = vst [vmem:[#allocation63_spill] sm:$0xff] %v15357_v51 }
 0x638   : > { %11599 = vmatmul.mubr.msk.f32.gmra.mrb[38].mxu0 %vm4187_vm6, %v15341_v16  ;;  %v15361_v16 = vld [vmem:[#allocation3 + $0x13a] sm:$0xff] }
 0x639   : > { %11601 = vmatprep.mubr.msk.f32.mxu0 %vm4187_vm6, %v15345_v11  ;;  %17075 = vst [vmem:[#allocation65_spill] sm:$0xff] %v15361_v16  ;;  %v15365_v11 = vld [vmem:[#allocation3 + $0x142] sm:$0xff] }
 0x63a   : > { %17076 = vst [vmem:[#allocation66_spill] sm:$0xff] %v15365_v11 }
 0x63c   : > { %11602 = vmatmul.mubr.msk.f32.gmra.mrb[40].mxu0 %vm4187_vm6, %v15349_v29  ;;  %v15369_v29 = vld [vmem:[#allocation3 + $0x152] sm:$0xff] }
 0x63d   : > { %11604 = vmatprep.mubr.msk.f32.mxu0 %vm4187_vm6, %v15353_v34  ;;  %17077 = vst [vmem:[#allocation67_spill] sm:$0xff] %v15369_v29  ;;  %v15373_v34 = vld [vmem:[#allocation3 + $0x15a] sm:$0xff] }
 0x63e   : > { %17078 = vst [vmem:[#allocation68_spill] sm:$0xff] %v15373_v34 }
 0x640   : > { %11605 = vmatmul.mubr.msk.f32.gmra.mrb[42].mxu0 %vm4187_vm6, %v15357_v51  ;;  %v15377_v51 = vld [vmem:[#allocation3 + $0x16a] sm:$0xff] }
 0x641   : > { %11607 = vmatprep.mubr.msk.f32.mxu0 %vm4187_vm6, %v15361_v16  ;;  %v15381_v16 = vld [vmem:[#allocation3 + $0x172] sm:$0xff] }
 0x642   : > { %17079 = vst [vmem:[#allocation71_spill] sm:$0xff] %v15381_v16 }
 0x644   : > { %11608 = vmatmul.mubr.msk.f32.gmra.mrb[44].mxu0 %vm4187_vm6, %v15365_v11  ;;  %v6899_v11 = vld [vmem:[%s16769_s8 + $0x50] sm:$0xff] }
 0x645   : > { %11610 = vmatprep.mubr.msk.f32.mxu0 %vm4187_vm6, %v15369_v29  ;;  %v6900_v29 = vld [vmem:[%s16769_s8 + $0x58] sm:$0xff] }
 0x648   : > { %11611 = vmatmul.mubr.msk.f32.gmra.mrb[46].mxu0 %vm4187_vm6, %v15373_v34  ;;  %v12024_v34 = vpack.c.bf16 %v6900_v29, %v6899_v11  ;;  %v7288_v11 = vld [vmem:[%s16769_s8 + $0x68] sm:$0xff] }
 0x649   : > { %11613 = vmatprep.mubr.msk.f32.mxu0 %vm4187_vm6, %v15377_v51 }
 0x64c   : > { %11614 = vmatmul.mubr.msk.f32.gmra.mrb[48].mxu0 %vm4187_vm6, %v15381_v16 }
 0x64d   : > { %11620 = vmatprep.mubr.msk.f32.mxu0 %vm4187_vm6, %v15131_v62  ;;  %v15456_v62 = vld [vmem:[#allocation3 + $0x188] sm:$0xff] }
 0x650   : > { %11621 = vmatmul.mubr.msk.f32.vlgmr.msra.gmra.mrb[18].mxu0 %vm4187_vm6, %v15137_v58  ;;  %v7287_v58 = vld [vmem:[%s16769_s8 + $0x60] sm:$0xff] }
 0x651   : > { %12023 = vmatpush3.bf16.msra.mxu0 %v15260_v55  ;;  %11623 = vmatprep.mubr.msk.f32.mxu0 %vm4187_vm6, %v15141_v36  ;;  %v15452_v55 = vld [vmem:[#allocation3 + $0x180] sm:$0xff]  ;;  %v12028_v29 = vpack.c.bf16 %v7288_v11, %v7287_v58  ;;  %v17104_v58 = vld [vmem:[#allocation62_spill] sm:$0xff]  ;;  %v17105_v11 = vld [vmem:[#allocation63_spill] sm:$0xff] }
 0x652   : > { %12025 = vmatprep.subr.bf16.mxu0 %v12024_v34 }
 0x654   : > { %11624 = vmatmul.mubr.msk.f32.gmra.mrb[20].mxu0 %vm4187_vm6, %v15145_v46 }
 0x655   : > { %11626 = vmatprep.mubr.msk.f32.mxu0 %vm4187_vm6, %v15149_v2 }
 0x658   : > { %11627 = vmatmul.mubr.msk.f32.gmra.mrb[22].mxu0 %vm4187_vm6, %v15153_v21 }
 0x659   : > { %11629 = vmatprep.mubr.msk.f32.mxu0 %vm4187_vm6, %v15157_v50 }
 0x65c   : > { %11630 = vmatmul.mubr.msk.f32.gmra.mrb[24].mxu0 %vm4187_vm6, %v15161_v15 }
 0x65d   : > { %11632 = vmatprep.mubr.msk.f32.mxu0 %vm4187_vm6, %v15165_v13 }
 0x660   : > { %11633 = vmatmul.mubr.msk.f32.gmra.mrb[26].mxu0 %vm4187_vm6, %v15169_v54 }
 0x661   : > { %11635 = vmatprep.mubr.msk.f32.mxu0 %vm4187_vm6, %v15173_v24 }
 0x664   : > { %11636 = vmatmul.mubr.msk.f32.gmra.mrb[28].mxu0 %vm4187_vm6, %v15177_v60 }
 0x665   : > { %11638 = vmatprep.mubr.msk.f32.mxu0 %vm4187_vm6, %v15181_v42 }
 0x668   : > { %11639 = vmatmul.mubr.msk.f32.gmra.mrb[30].mxu0 %vm4187_vm6, %v15185_v22 }
 0x669   : > { %11641 = vmatprep.mubr.msk.f32.mxu0 %vm4187_vm6, %v15189_v63 }
 0x66c   : > { %11642 = vmatmul.mubr.msk.f32.gmra.mrb[32].mxu0 %vm4187_vm6, %v15193_v48 }
 0x66d   : > { %11644 = vmatprep.mubr.msk.f32.mxu0 %vm4187_vm6, %v15197_v61 }
 0x670   : > { %11645 = vmatmul.mubr.msk.f32.gmra.mrb[34].mxu0 %vm4187_vm6, %v15201_v41 }
 0x671   : > { %11647 = vmatprep.mubr.msk.f32.mxu0 %vm4187_vm6, %v15205_v8 }
 0x674   : > { %11648 = vmatmul.mubr.msk.f32.gmra.mrb[36].mxu0 %vm4187_vm6, %v15209_v10 }
 0x675   : > { %11650 = vmatprep.mubr.msk.f32.mxu0 %vm4187_vm6, %v15213_v31 }
 0x678   : > { %11651 = vmatmul.mubr.msk.f32.gmra.mrb[38].mxu0 %vm4187_vm6, %v15217_v38 }
 0x679   : > { %11653 = vmatprep.mubr.msk.f32.mxu0 %vm4187_vm6, %v15221_v35 }
 0x67c   : > { %11654 = vmatmul.mubr.msk.f32.gmra.mrb[40].mxu0 %vm4187_vm6, %v15225_v37 }
 0x67d   : > { %11656 = vmatprep.mubr.msk.f32.mxu0 %vm4187_vm6, %v15229_v27 }
 0x680   : > { %11657 = vmatmul.mubr.msk.f32.gmra.mrb[42].mxu0 %vm4187_vm6, %v15233_v19 }
 0x681   : > { %11659 = vmatprep.mubr.msk.f32.mxu0 %vm4187_vm6, %v15237_v18 }
 0x684   : > { %11660 = vmatmul.mubr.msk.f32.gmra.mrb[44].mxu0 %vm4187_vm6, %v15241_v28 }
 0x685   : > { %11662 = vmatprep.mubr.msk.f32.mxu0 %vm4187_vm6, %v15245_v9 }
 0x688   : > { %11663 = vmatmul.mubr.msk.f32.gmra.mrb[46].mxu0 %vm4187_vm6, %v15249_v49 }
 0x689   : > { %11665 = vmatprep.mubr.msk.f32.mxu0 %vm4187_vm6, %v15452_v55 }
 0x68c   : > { %11666 = vmatmul.mubr.msk.f32.gmra.mrb[48].mxu0 %vm4187_vm6, %v15456_v62 }
 0x68d   : > { %11672 = vmatprep.mubr.msk.f32.mxu0 %vm4187_vm6, %v14921_v40  ;;  %v17080_v40 = vld [vmem:[#allocation49_spill] sm:$0xff] }
 0x690   : > { %11673 = vmatmul.mubr.msk.f32.vlgmr.msra.gmra.mrb[18].mxu0 %vm4187_vm6, %v14928_v53  ;;  %v17081_v53 = vld [vmem:[#allocation50_spill] sm:$0xff] }
 0x691   : > { %12027 = vmatpush3.bf16.msra.mxu0 %v12024_v34  ;;  %11675 = vmatprep.mubr.msk.f32.mxu0 %vm4187_vm6, %v14935_v12  ;;  %v17082_v12 = vld [vmem:[#allocation51_spill] sm:$0xff]  ;;  %v17103_v34 = vld [vmem:[#allocation60_spill] sm:$0xff] }
 0x692   : > { %12029 = vmatprep.subr.bf16.mxu0 %v12028_v29 }
 0x694   : > { %11676 = vmatmul.mubr.msk.f32.gmra.mrb[20].mxu0 %vm4187_vm6, %v14944_v25  ;;  %v17083_v25 = vld [vmem:[#allocation52_spill] sm:$0xff] }
 0x695   : > { %11678 = vmatprep.mubr.msk.f32.mxu0 %vm4187_vm6, %v14949_v57  ;;  %v15526_v57 = vld [vmem:[#allocation3 + $0x181] sm:$0xff] }
 0x698   : > { %11679 = vmatmul.mubr.msk.f32.gmra.mrb[22].mxu0 %vm4187_vm6, %v14953_v1  ;;  %v15530_v1 = vld [vmem:[#allocation3 + $0x189] sm:$0xff] }
 0x699   : > { %11681 = vmatprep.mubr.msk.f32.mxu0 %vm4187_vm6, %v14957_v56  ;;  %v7674_v56 = vld [vmem:[%s16769_s8 + $0x70] sm:$0xff] }
 0x69c   : > { %11682 = vmatmul.mubr.msk.f32.gmra.mrb[24].mxu0 %vm4187_vm6, %v14969_v26  ;;  %v7675_v26 = vld [vmem:[%s16769_s8 + $0x78] sm:$0xff] }
 0x69d   : > { %11684 = vmatprep.mubr.msk.f32.mxu0 %vm4187_vm6, %v14977_v30  ;;  %v12032_v30 = vpack.c.bf16 %v7675_v26, %v7674_v56  ;;  %v17107_v56 = vld [vmem:[#allocation66_spill] sm:$0xff]  ;;  %v17108_v26 = vld [vmem:[#allocation67_spill] sm:$0xff] }
 0x6a0   : > { %11685 = vmatmul.mubr.msk.f32.gmra.mrb[26].mxu0 %vm4187_vm6, %v14995_v33  ;;  %v17084_v33 = vld [vmem:[#allocation53_spill] sm:$0xff] }
 0x6a1   : > { %11687 = vmatprep.mubr.msk.f32.mxu0 %vm4187_vm6, %v15001_v52  ;;  %v17085_v52 = vld [vmem:[#allocation54_spill] sm:$0xff] }
 0x6a4   : > { %11688 = vmatmul.mubr.msk.f32.gmra.mrb[28].mxu0 %vm4187_vm6, %v15013_v5  ;;  %v17086_v5 = vld [vmem:[#allocation55_spill] sm:$0xff] }
 0x6a5   : > { %11690 = vmatprep.mubr.msk.f32.mxu0 %vm4187_vm6, %v15019_v44  ;;  %v17087_v44 = vld [vmem:[#allocation56_spill] sm:$0xff] }
 0x6a8   : > { %11691 = vmatmul.mubr.msk.f32.gmra.mrb[30].mxu0 %vm4187_vm6, %v15031_v39  ;;  %v17088_v39 = vld [vmem:[#allocation58_spill] sm:$0xff] }
 0x6a9   : > { %11693 = vmatprep.mubr.msk.f32.mxu0 %vm4187_vm6, %v15037_v6  ;;  %v17089_v6 = vld [vmem:[#allocation59_spill] sm:$0xff] }
 0x6ac   : > { %11694 = vmatmul.mubr.msk.f32.gmra.mrb[32].mxu0 %vm4187_vm6, %v15047_v43  ;;  %v17090_v43 = vld [vmem:[#allocation61_spill] sm:$0xff] }
 0x6ad   : > { %11696 = vmatprep.mubr.msk.f32.mxu0 %vm4187_vm6, %v15052_v20  ;;  %v17091_v20 = vld [vmem:[#allocation64_spill] sm:$0xff] }
 0x6b0   : > { %11697 = vmatmul.mubr.msk.f32.gmra.mrb[34].mxu0 %vm4187_vm6, %v15057_v17  ;;  %v17092_v17 = vld [vmem:[#allocation7_spill] sm:$0xff] }
 0x6b1   : > { %11699 = vmatprep.mubr.msk.f32.mxu0 %vm4187_vm6, %v15061_v32  ;;  %v17093_v32 = vld [vmem:[#allocation38_spill] sm:$0xff] }
 0x6b4   : > { %11700 = vmatmul.mubr.msk.f32.gmra.mrb[36].mxu0 %vm4187_vm6, %v15065_v14  ;;  %v17094_v14 = vld [vmem:[#allocation39_spill] sm:$0xff] }
 0x6b5   : > { %11702 = vmatprep.mubr.msk.f32.mxu0 %vm4187_vm6, %v15069_v47  ;;  %v17095_v47 = vld [vmem:[#allocation40_spill] sm:$0xff] }
 0x6b8   : > { %11703 = vmatmul.mubr.msk.f32.gmra.mrb[38].mxu0 %vm4187_vm6, %v15073_v59  ;;  %v17096_v59 = vld [vmem:[#allocation41_spill] sm:$0xff] }
 0x6b9   : > { %11705 = vmatprep.mubr.msk.f32.mxu0 %vm4187_vm6, %v15077_v4  ;;  %v17097_v4 = vld [vmem:[#allocation44_spill] sm:$0xff] }
 0x6bc   : > { %11706 = vmatmul.mubr.msk.f32.gmra.mrb[40].mxu0 %vm4187_vm6, %v15085_v7  ;;  %v17098_v7 = vld [vmem:[#allocation45_spill] sm:$0xff] }
 0x6bd   : > { %11708 = vmatprep.mubr.msk.f32.mxu0 %vm4187_vm6, %v15091_v23  ;;  %v17099_v23 = vld [vmem:[#allocation46_spill] sm:$0xff] }
 0x6c0   : > { %11709 = vmatmul.mubr.msk.f32.gmra.mrb[42].mxu0 %vm4187_vm6, %v15100_v0  ;;  %v17100_v0 = vld [vmem:[#allocation69_spill] sm:$0xff] }
 0x6c1   : > { %11711 = vmatprep.mubr.msk.f32.mxu0 %vm4187_vm6, %v17080_v40 }
 0x6c4   : > { %11712 = vmatmul.mubr.msk.f32.gmra.mrb[44].mxu0 %vm4187_vm6, %v17081_v53 }
 0x6c5   : > { %11714 = vmatprep.mubr.msk.f32.mxu0 %vm4187_vm6, %v17082_v12 }
 0x6c8   : > { %11715 = vmatmul.mubr.msk.f32.gmra.mrb[46].mxu0 %vm4187_vm6, %v17083_v25 }
 0x6c9   : > { %11717 = vmatprep.mubr.msk.f32.mxu0 %vm4187_vm6, %v15526_v57 }
 0x6cc   : > { %11718 = vmatmul.mubr.msk.f32.gmra.mrb[48].mxu0 %vm4187_vm6, %v15530_v1 }
 0x6cd   : > { %11724 = vmatprep.mubr.msk.f32.mxu0 %vm4187_vm6, %v15263_v45  ;;  %v17102_v45 = vld [vmem:[#allocation57_spill] sm:$0xff] }
 0x6d0   : > { %11725 = vmatmul.mubr.msk.f32.vlgmr.msra.gmra.mrb[18].mxu0 %vm4187_vm6, %v15269_v3  ;;  %v17101_v3 = vld [vmem:[#allocation70_spill] sm:$0xff] }
 0x6d1   : > { %12031 = vmatpush3.bf16.msra.mxu0 %v12028_v29  ;;  %11727 = vmatprep.mubr.msk.f32.mxu0 %vm4187_vm6, %v17084_v33  ;;  %v17106_v29 = vld [vmem:[#allocation65_spill] sm:$0xff] }
 0x6d2   : > { %12033 = vmatprep.subr.bf16.mxu0 %v12032_v30 }
 0x6d4   : > { %11728 = vmatmul.mubr.msk.f32.gmra.mrb[20].mxu0 %vm4187_vm6, %v17085_v52 }
 0x6d5   : > { %11730 = vmatprep.mubr.msk.f32.mxu0 %vm4187_vm6, %v17086_v5 }
 0x6d8   : > { %11731 = vmatmul.mubr.msk.f32.gmra.mrb[22].mxu0 %vm4187_vm6, %v17087_v44 }
 0x6d9   : > { %11733 = vmatprep.mubr.msk.f32.mxu0 %vm4187_vm6, %v17088_v39 }
 0x6dc   : > { %11734 = vmatmul.mubr.msk.f32.gmra.mrb[24].mxu0 %vm4187_vm6, %v17089_v6 }
 0x6dd   : > { %11736 = vmatprep.mubr.msk.f32.mxu0 %vm4187_vm6, %v17090_v43 }
 0x6e0   : > { %11737 = vmatmul.mubr.msk.f32.gmra.mrb[26].mxu0 %vm4187_vm6, %v17091_v20 }
 0x6e1   : > { %11739 = vmatprep.mubr.msk.f32.mxu0 %vm4187_vm6, %v17092_v17 }
 0x6e4   : > { %11740 = vmatmul.mubr.msk.f32.gmra.mrb[28].mxu0 %vm4187_vm6, %v17093_v32 }
 0x6e5   : > { %11742 = vmatprep.mubr.msk.f32.mxu0 %vm4187_vm6, %v17094_v14 }
 0x6e8   : > { %11743 = vmatmul.mubr.msk.f32.gmra.mrb[30].mxu0 %vm4187_vm6, %v17095_v47 }
 0x6e9   : > { %11745 = vmatprep.mubr.msk.f32.mxu0 %vm4187_vm6, %v17096_v59 }
 0x6ec   : > { %11746 = vmatmul.mubr.msk.f32.gmra.mrb[32].mxu0 %vm4187_vm6, %v17097_v4 }
 0x6ed   : > { %11748 = vmatprep.mubr.msk.f32.mxu0 %vm4187_vm6, %v17098_v7 }
 0x6f0   : > { %11749 = vmatmul.mubr.msk.f32.gmra.mrb[34].mxu0 %vm4187_vm6, %v17099_v23 }
 0x6f1   : > { %11751 = vmatprep.mubr.msk.f32.mxu0 %vm4187_vm6, %v17100_v0 }
 0x6f4   : > { %11752 = vmatmul.mubr.msk.f32.gmra.mrb[36].mxu0 %vm4187_vm6, %v17101_v3  ;;  %v17109_v3 = vld [vmem:[#allocation68_spill] sm:$0xff] }
 0x6f5   : > { %11754 = vmatprep.mubr.msk.f32.mxu0 %vm4187_vm6, %v17102_v45 }
 0x6f8   : > { %11755 = vmatmul.mubr.msk.f32.gmra.mrb[38].mxu0 %vm4187_vm6, %v17103_v34 }
 0x6f9   : > { %11757 = vmatprep.mubr.msk.f32.mxu0 %vm4187_vm6, %v17104_v58  ;;  %v15600_v58 = vld [vmem:[#allocation3 + $0x182] sm:$0xff] }
 0x6fc   : > { %11758 = vmatmul.mubr.msk.f32.gmra.mrb[40].mxu0 %vm4187_vm6, %v17105_v11 }
 0x6fd   : > { %11760 = vmatprep.mubr.msk.f32.mxu0 %vm4187_vm6, %v17106_v29  ;;  %v15604_v29 = vld [vmem:[#allocation3 + $0x18a] sm:$0xff] }
 0x700   : > { %11761 = vmatmul.mubr.msk.f32.gmra.mrb[42].mxu0 %vm4187_vm6, %v17107_v56 }
 0x701   : > { %11763 = vmatprep.mubr.msk.f32.mxu0 %vm4187_vm6, %v17108_v26  ;;  %v8061_v26 = vld [vmem:[%s16769_s8 + $0x80] sm:$0xff] }
 0x704   : > { %11764 = vmatmul.mubr.msk.f32.gmra.mrb[44].mxu0 %vm4187_vm6, %v17109_v3  ;;  %v8062_v3 = vld [vmem:[%s16769_s8 + $0x88] sm:$0xff] }
 0x705   : > { %11766 = vmatprep.mubr.msk.f32.mxu0 %vm4187_vm6, %v15377_v51 }
 0x708   : > { %11767 = vmatmul.mubr.msk.f32.gmra.mrb[46].mxu0 %vm4187_vm6, %v15381_v16  ;;  %v12036_v16 = vpack.c.bf16 %v8062_v3, %v8061_v26 }
 0x709   : > { %11769 = vmatprep.mubr.msk.f32.mxu0 %vm4187_vm6, %v15600_v58 }
 0x70c   : > { %11770 = vmatmul.mubr.msk.f32.gmra.mrb[48].mxu0 %vm4187_vm6, %v15604_v29 }
 0x70d   : > { %11776 = vmatprep.mubr.msk.f32.mxu0 %vm4187_vm6, %v15141_v36  ;;  %v7285_v36 = vld [vmem:[#allocation3 + $0x198] sm:$0xff] }
 0x710   : > { %11777 = vmatmul.mubr.msk.f32.vlgmr.msra.gmra.mrb[18].mxu0 %vm4187_vm6, %v15145_v46  ;;  %v7286_v46 = vld [vmem:[#allocation3 + $0x1a0] sm:$0xff] }
 0x711   : > { %12035 = vmatpush3.bf16.msra.mxu0 %v12032_v30  ;;  %11779 = vmatprep.mubr.msk.f32.mxu0 %vm4187_vm6, %v15149_v2  ;;  %v7642_v2 = vld [vmem:[#allocation3 + $0x31] sm:$0xff]  ;;  %v8060_v30 = vld [vmem:[#allocation3 + $0x1a2] sm:$0xff] }
 0x712   : > { %12037 = vmatprep.subr.bf16.mxu0 %v12036_v16 }
 0x714   : > { %11780 = vmatmul.mubr.msk.f32.gmra.mrb[20].mxu0 %vm4187_vm6, %v15153_v21  ;;  %v7643_v21 = vld [vmem:[#allocation3 + $0x39] sm:$0xff] }
 0x715   : > { %11782 = vmatprep.mubr.msk.f32.mxu0 %vm4187_vm6, %v15157_v50  ;;  %v7644_v50 = vld [vmem:[#allocation3 + $0x49] sm:$0xff] }
 0x718   : > { %11783 = vmatmul.mubr.msk.f32.gmra.mrb[22].mxu0 %vm4187_vm6, %v15161_v15  ;;  %v7645_v15 = vld [vmem:[#allocation3 + $0x51] sm:$0xff] }
 0x719   : > { %11785 = vmatprep.mubr.msk.f32.mxu0 %vm4187_vm6, %v15165_v13  ;;  %v7646_v13 = vld [vmem:[#allocation3 + $0x61] sm:$0xff] }
 0x71c   : > { %11786 = vmatmul.mubr.msk.f32.gmra.mrb[24].mxu0 %vm4187_vm6, %v15169_v54  ;;  %v7647_v54 = vld [vmem:[#allocation3 + $0x69] sm:$0xff] }
 0x71d   : > { %11788 = vmatprep.mubr.msk.f32.mxu0 %vm4187_vm6, %v15173_v24  ;;  %v7648_v24 = vld [vmem:[#allocation3 + $0x79] sm:$0xff] }
 0x720   : > { %11789 = vmatmul.mubr.msk.f32.gmra.mrb[26].mxu0 %vm4187_vm6, %v15177_v60  ;;  %v7649_v60 = vld [vmem:[#allocation3 + $0x81] sm:$0xff] }
 0x721   : > { %11791 = vmatprep.mubr.msk.f32.mxu0 %vm4187_vm6, %v15181_v42  ;;  %v7650_v42 = vld [vmem:[#allocation3 + $0x91] sm:$0xff] }
 0x724   : > { %11792 = vmatmul.mubr.msk.f32.gmra.mrb[28].mxu0 %vm4187_vm6, %v15185_v22  ;;  %v7651_v22 = vld [vmem:[#allocation3 + $0x99] sm:$0xff] }
 0x725   : > { %11794 = vmatprep.mubr.msk.f32.mxu0 %vm4187_vm6, %v15189_v63  ;;  %v7652_v63 = vld [vmem:[#allocation3 + $0xa9] sm:$0xff] }
 0x728   : > { %11795 = vmatmul.mubr.msk.f32.gmra.mrb[30].mxu0 %vm4187_vm6, %v15193_v48  ;;  %v7653_v48 = vld [vmem:[#allocation3 + $0xb1] sm:$0xff] }
 0x729   : > { %11797 = vmatprep.mubr.msk.f32.mxu0 %vm4187_vm6, %v15197_v61  ;;  %v7654_v61 = vld [vmem:[#allocation3 + $0xc1] sm:$0xff] }
 0x72c   : > { %11798 = vmatmul.mubr.msk.f32.gmra.mrb[32].mxu0 %vm4187_vm6, %v15201_v41  ;;  %v7655_v41 = vld [vmem:[#allocation3 + $0xc9] sm:$0xff] }
 0x72d   : > { %11800 = vmatprep.mubr.msk.f32.mxu0 %vm4187_vm6, %v15205_v8  ;;  %v7656_v8 = vld [vmem:[#allocation3 + $0xd9] sm:$0xff] }
 0x730   : > { %11801 = vmatmul.mubr.msk.f32.gmra.mrb[34].mxu0 %vm4187_vm6, %v15209_v10  ;;  %v7657_v10 = vld [vmem:[#allocation3 + $0xe1] sm:$0xff] }
 0x731   : > { %11803 = vmatprep.mubr.msk.f32.mxu0 %vm4187_vm6, %v15213_v31  ;;  %v7658_v31 = vld [vmem:[#allocation3 + $0xf1] sm:$0xff] }
 0x734   : > { %11804 = vmatmul.mubr.msk.f32.gmra.mrb[36].mxu0 %vm4187_vm6, %v15217_v38  ;;  %v7659_v38 = vld [vmem:[#allocation3 + $0xf9] sm:$0xff] }
 0x735   : > { %11806 = vmatprep.mubr.msk.f32.mxu0 %vm4187_vm6, %v15221_v35  ;;  %v7660_v35 = vld [vmem:[#allocation3 + $0x109] sm:$0xff] }
 0x738   : > { %11807 = vmatmul.mubr.msk.f32.gmra.mrb[38].mxu0 %vm4187_vm6, %v15225_v37  ;;  %v7661_v37 = vld [vmem:[#allocation3 + $0x111] sm:$0xff] }
 0x739   : > { %11809 = vmatprep.mubr.msk.f32.mxu0 %vm4187_vm6, %v15229_v27  ;;  %v7662_v27 = vld [vmem:[#allocation3 + $0x121] sm:$0xff] }
 0x73c   : > { %11810 = vmatmul.mubr.msk.f32.gmra.mrb[40].mxu0 %vm4187_vm6, %v15233_v19  ;;  %v7663_v19 = vld [vmem:[#allocation3 + $0x129] sm:$0xff] }
 0x73d   : > { %11812 = vmatprep.mubr.msk.f32.mxu0 %vm4187_vm6, %v15237_v18  ;;  %v7664_v18 = vld [vmem:[#allocation3 + $0x139] sm:$0xff] }
 0x740   : > { %11813 = vmatmul.mubr.msk.f32.gmra.mrb[42].mxu0 %vm4187_vm6, %v15241_v28  ;;  %v7665_v28 = vld [vmem:[#allocation3 + $0x141] sm:$0xff] }
 0x741   : > { %11815 = vmatprep.mubr.msk.f32.mxu0 %vm4187_vm6, %v15245_v9  ;;  %v7672_v9 = vld [vmem:[#allocation3 + $0x199] sm:$0xff] }
 0x744   : > { %11816 = vmatmul.mubr.msk.f32.gmra.mrb[44].mxu0 %vm4187_vm6, %v15249_v49  ;;  %v17110_v49 = vmov 0.0|0.0  }
 0x745   : > { %11818 = vmatprep.mubr.msk.f32.mxu0 %vm4187_vm6, %v15452_v55  ;;  %v17111_v55 = vld [vmem:[#allocation48_spill] sm:$0xff] }
 0x748   : > { %11819 = vmatmul.mubr.msk.f32.gmra.mrb[46].mxu0 %vm4187_vm6, %v15456_v62  ;;  %v17112_v62 = vld [vmem:[#allocation70_spill] sm:$0xff] }
 0x749   : > { %11821 = vmatprep.mubr.msk.f32.mxu0 %vm4187_vm6, %v7285_v36 }
 0x74c   : > { %11822 = vmatmul.mubr.msk.f32.gmra.mrb[48].mxu0 %vm4187_vm6, %v7286_v46 }
 0x74d   : > { %11828 = vmatprep.mubr.msk.f32.mxu0 %vm4187_vm6, %v7642_v2 }
 0x750   : > { %11829 = vmatmul.mubr.msk.f32.vlgmr.msra.gmra.mrb[18].mxu0 %vm4187_vm6, %v7643_v21 }
 0x751   : > { %12039 = vmatpush3.bf16.msra.mxu0 %v12036_v16  ;;  %11831 = vmatprep.mubr.msk.f32.mxu0 %vm4187_vm6, %v7644_v50  ;;  %v7673_v16 = vld [vmem:[#allocation3 + $0x1a1] sm:$0xff] }
 0x752   : > { %12040 = vmatprep.subr.bf16.mxu0 %v17110_v49 }
 0x754   : > { %11832 = vmatmul.mubr.msk.f32.gmra.mrb[20].mxu0 %vm4187_vm6, %v7645_v15 }
 0x755   : > { %11834 = vmatprep.mubr.msk.f32.mxu0 %vm4187_vm6, %v7646_v13 }
 0x758   : > { %11835 = vmatmul.mubr.msk.f32.gmra.mrb[22].mxu0 %vm4187_vm6, %v7647_v54 }
 0x759   : > { %11837 = vmatprep.mubr.msk.f32.mxu0 %vm4187_vm6, %v7648_v24 }
 0x75c   : > { %11838 = vmatmul.mubr.msk.f32.gmra.mrb[24].mxu0 %vm4187_vm6, %v7649_v60 }
 0x75d   : > { %11840 = vmatprep.mubr.msk.f32.mxu0 %vm4187_vm6, %v7650_v42 }
 0x760   : > { %11841 = vmatmul.mubr.msk.f32.gmra.mrb[26].mxu0 %vm4187_vm6, %v7651_v22 }
 0x761   : > { %11843 = vmatprep.mubr.msk.f32.mxu0 %vm4187_vm6, %v7652_v63 }
 0x764   : > { %11844 = vmatmul.mubr.msk.f32.gmra.mrb[28].mxu0 %vm4187_vm6, %v7653_v48 }
 0x765   : > { %11846 = vmatprep.mubr.msk.f32.mxu0 %vm4187_vm6, %v7654_v61 }
 0x768   : > { %11847 = vmatmul.mubr.msk.f32.gmra.mrb[30].mxu0 %vm4187_vm6, %v7655_v41 }
 0x769   : > { %11849 = vmatprep.mubr.msk.f32.mxu0 %vm4187_vm6, %v7656_v8 }
 0x76c   : > { %11850 = vmatmul.mubr.msk.f32.gmra.mrb[32].mxu0 %vm4187_vm6, %v7657_v10 }
 0x76d   : > { %11852 = vmatprep.mubr.msk.f32.mxu0 %vm4187_vm6, %v7658_v31 }
 0x770   : > { %11853 = vmatmul.mubr.msk.f32.gmra.mrb[34].mxu0 %vm4187_vm6, %v7659_v38 }
 0x771   : > { %11855 = vmatprep.mubr.msk.f32.mxu0 %vm4187_vm6, %v7660_v35 }
 0x774   : > { %11856 = vmatmul.mubr.msk.f32.gmra.mrb[36].mxu0 %vm4187_vm6, %v7661_v37 }
 0x775   : > { %11858 = vmatprep.mubr.msk.f32.mxu0 %vm4187_vm6, %v7662_v27 }
 0x778   : > { %11859 = vmatmul.mubr.msk.f32.gmra.mrb[38].mxu0 %vm4187_vm6, %v7663_v19 }
 0x779   : > { %11861 = vmatprep.mubr.msk.f32.mxu0 %vm4187_vm6, %v7664_v18 }
 0x77c   : > { %11862 = vmatmul.mubr.msk.f32.gmra.mrb[40].mxu0 %vm4187_vm6, %v7665_v28 }
 0x77d   : > { %11864 = vmatprep.mubr.msk.f32.mxu0 %vm4187_vm6, %v17080_v40  ;;  %v17113_v40 = vld [vmem:[#allocation62_spill] sm:$0xff] }
 0x780   : > { %11865 = vmatmul.mubr.msk.f32.gmra.mrb[42].mxu0 %vm4187_vm6, %v17081_v53  ;;  %v17114_v53 = vld [vmem:[#allocation65_spill] sm:$0xff] }
 0x781   : > { %11867 = vmatprep.mubr.msk.f32.mxu0 %vm4187_vm6, %v17082_v12  ;;  %v17115_v12 = vld [vmem:[#allocation67_spill] sm:$0xff] }
 0x784   : > { %11868 = vmatmul.mubr.msk.f32.gmra.mrb[44].mxu0 %vm4187_vm6, %v17083_v25  ;;  %v17116_v25 = vld [vmem:[#allocation68_spill] sm:$0xff] }
 0x785   : > { %11870 = vmatprep.mubr.msk.f32.mxu0 %vm4187_vm6, %v15526_v57  ;;  %v17117_v57 = vld [vmem:[#allocation71_spill] sm:$0xff] }
 0x788   : > { %11871 = vmatmul.mubr.msk.f32.gmra.mrb[46].mxu0 %vm4187_vm6, %v15530_v1  ;;  %v8059_v1 = vld [vmem:[#allocation3 + $0x19a] sm:$0xff] }
 0x789   : > { %11873 = vmatprep.mubr.msk.f32.mxu0 %vm4187_vm6, %v7672_v9 }
 0x78c   : > { %11874 = vmatmul.mubr.msk.f32.gmra.mrb[48].mxu0 %vm4187_vm6, %v7673_v16 }
 0x78d   : > { %11880 = vmatprep.mubr.msk.f32.mxu0 %vm4187_vm6, %v17084_v33  ;;  %v17118_v33 = vmov 0.0  }
 0x790   : > { %11881 = vmatmul.mubr.msk.f32.vlgmr.msra.gmra.mrb[18].mxu0 %vm4187_vm6, %v17085_v52 }
 0x791   : > { %11883 = vmatprep.mubr.msk.f32.mxu0 %vm4187_vm6, %v17086_v5  ;;  %12042 = vmatpush3.bf16.msra.mxu0 %v17111_v55 }
 0x794   : > { %11884 = vmatmul.mubr.msk.f32.gmra.mrb[20].mxu0 %vm4187_vm6, %v17087_v44 }
 0x795   : > { %11886 = vmatprep.mubr.msk.f32.mxu0 %vm4187_vm6, %v17088_v39 }
 0x798   : > { %11887 = vmatmul.mubr.msk.f32.gmra.mrb[22].mxu0 %vm4187_vm6, %v17089_v6 }
 0x799   : > { %11889 = vmatprep.mubr.msk.f32.mxu0 %vm4187_vm6, %v17090_v43 }
 0x79c   : > { %11890 = vmatmul.mubr.msk.f32.gmra.mrb[24].mxu0 %vm4187_vm6, %v17091_v20 }
 0x79d   : > { %11892 = vmatprep.mubr.msk.f32.mxu0 %vm4187_vm6, %v17092_v17 }
 0x7a0   : > { %11893 = vmatmul.mubr.msk.f32.gmra.mrb[26].mxu0 %vm4187_vm6, %v17093_v32 }
 0x7a1   : > { %11895 = vmatprep.mubr.msk.f32.mxu0 %vm4187_vm6, %v17094_v14 }
 0x7a4   : > { %11896 = vmatmul.mubr.msk.f32.gmra.mrb[28].mxu0 %vm4187_vm6, %v17095_v47 }
 0x7a5   : > { %11898 = vmatprep.mubr.msk.f32.mxu0 %vm4187_vm6, %v17096_v59 }
 0x7a8   : > { %11899 = vmatmul.mubr.msk.f32.gmra.mrb[30].mxu0 %vm4187_vm6, %v17097_v4 }
 0x7a9   : > { %11901 = vmatprep.mubr.msk.f32.mxu0 %vm4187_vm6, %v17098_v7 }
 0x7ac   : > { %11902 = vmatmul.mubr.msk.f32.gmra.mrb[32].mxu0 %vm4187_vm6, %v17099_v23 }
 0x7ad   : > { %11904 = vmatprep.mubr.msk.f32.mxu0 %vm4187_vm6, %v17100_v0 }
 0x7b0   : > { %11905 = vmatmul.mubr.msk.f32.gmra.mrb[34].mxu0 %vm4187_vm6, %v17112_v62 }
 0x7b1   : > { %11907 = vmatprep.mubr.msk.f32.mxu0 %vm4187_vm6, %v17102_v45 }
 0x7b4   : > { %11908 = vmatmul.mubr.msk.f32.gmra.mrb[36].mxu0 %vm4187_vm6, %v17103_v34 }
 0x7b5   : > { %11910 = vmatprep.mubr.msk.f32.mxu0 %vm4187_vm6, %v17113_v40 }
 0x7b8   : > { %11911 = vmatmul.mubr.msk.f32.gmra.mrb[38].mxu0 %vm4187_vm6, %v17105_v11 }
 0x7b9   : > { %11913 = vmatprep.mubr.msk.f32.mxu0 %vm4187_vm6, %v17114_v53 }
 0x7bc   : > { %11914 = vmatmul.mubr.msk.f32.gmra.mrb[40].mxu0 %vm4187_vm6, %v17107_v56 }
 0x7bd   : > { %11916 = vmatprep.mubr.msk.f32.mxu0 %vm4187_vm6, %v17115_v12 }
 0x7c0   : > { %11917 = vmatmul.mubr.msk.f32.gmra.mrb[42].mxu0 %vm4187_vm6, %v17116_v25 }
 0x7c1   : > { %11919 = vmatprep.mubr.msk.f32.mxu0 %vm4187_vm6, %v15377_v51  ;;  %v15783_v51 = vld [vmem:[%s16770_s9] ss:$0 sm:$0xff] }
 0x7c4   : > { %11920 = vmatmul.mubr.msk.f32.gmra.mrb[44].mxu0 %vm4187_vm6, %v17117_v57 }
 0x7c5   : > { %11922 = vmatprep.mubr.msk.f32.mxu0 %vm4187_vm6, %v15600_v58 }
 0x7c8   : > { %11923 = vmatmul.mubr.msk.f32.gmra.mrb[46].mxu0 %vm4187_vm6, %v15604_v29 }
 0x7c9   : > { %11925 = vmatprep.mubr.msk.f32.mxu0 %vm4187_vm6, %v8059_v1 }
 0x7cc   : > { %11926 = vmatmul.mubr.msk.f32.gmra.mrb[48].mxu0 %vm4187_vm6, %v8060_v30 }
 0x7cd   : > { %11932 = vmatprep.mubr.msk.f32.mxu0 %vm12935_vm5, %v17118_v33 }
 0x863   : > { %v11882_v52 = vpop.f32.mrb[18].mxu0 }
 0x864   : > { %v15786_v5 = vadd.f32 %v11882_v52, %v15783_v51  ;;  %v8225_v44 = vpop.f32.mrb[19].mxu0 }
 0x865   : > { %v15789_v39 = vadd.f32 %v15783_v51, %v8225_v44 }
 0x866   : > { %v8457_v6 = vsel %vm4187_vm6, %v15786_v5, 0.0 }
 0x867   : > { %v8456_v43 = vsel %vm4187_vm6, %v15789_v39, 0.0  ;;  %v11885_v20 = vpop.f32.mrb[20].mxu0 }
 0x868   : > { %v8235_v17 = vpop.f32.mrb[21].mxu0  ;;  %v15796_v32 = vadd.f32 %v11885_v20, %v15783_v51  ;;  %v8458_v47 = vadd.f32 %v8457_v6, %v8456_v43 }
 0x869   : > { %v15799_v14 = vadd.f32 %v15783_v51, %v8235_v17 }
 0x86a   : > { %v8461_v0 = vsel %vm4187_vm6, %v15796_v32, 0.0 }
 0x86b   : > { %v8459_v59 = vsel %vm4187_vm6, %v15799_v14, 0.0  ;;  %v11888_v4 = vpop.f32.mrb[22].mxu0 }
 0x86c   : > { %v8460_v7 = vadd.f32 %v8459_v59, %v8458_v47  ;;  %v8245_v23 = vpop.f32.mrb[23].mxu0  ;;  %v15806_v3 = vadd.f32 %v11888_v4, %v15783_v51 }
 0x86d   : > { %v15809_v45 = vadd.f32 %v15783_v51, %v8245_v23 }
 0x86e   : > { %v8462_v34 = vadd.f32 %v8461_v0, %v8460_v7  ;;  %v8465_v26 = vsel %vm4187_vm6, %v15806_v3, 0.0 }
 0x86f   : > { %v8463_v58 = vsel %vm4187_vm6, %v15809_v45, 0.0  ;;  %v11891_v11 = vpop.f32.mrb[24].mxu0 }
 0x870   : > { %v8464_v29 = vadd.f32 %v8463_v58, %v8462_v34  ;;  %v8255_v56 = vpop.f32.mrb[25].mxu0  ;;  %v15816_v36 = vadd.f32 %v11891_v11, %v15783_v51 }
 0x871   : > { %v15819_v46 = vadd.f32 %v15783_v51, %v8255_v56 }
 0x872   : > { %v8466_v2 = vadd.f32 %v8465_v26, %v8464_v29  ;;  %v8469_v13 = vsel %vm4187_vm6, %v15816_v36, 0.0 }
 0x873   : > { %v8467_v21 = vsel %vm4187_vm6, %v15819_v46, 0.0  ;;  %v11894_v50 = vpop.f32.mrb[26].mxu0 }
 0x874   : > { %v8468_v49 = vadd.f32 %v8467_v21, %v8466_v2  ;;  %v8265_v15 = vpop.f32.mrb[27].mxu0  ;;  %v15826_v54 = vadd.f32 %v11894_v50, %v15783_v51 }
 0x875   : > { %v15829_v24 = vadd.f32 %v15783_v51, %v8265_v15 }
 0x876   : > { %v8470_v60 = vadd.f32 %v8469_v13, %v8468_v49  ;;  %v8473_v61 = vsel %vm4187_vm6, %v15826_v54, 0.0 }
 0x877   : > { %v8471_v42 = vsel %vm4187_vm6, %v15829_v24, 0.0  ;;  %v11897_v22 = vpop.f32.mrb[28].mxu0 }
 0x878   : > { %v8472_v63 = vadd.f32 %v8471_v42, %v8470_v60  ;;  %v8275_v48 = vpop.f32.mrb[29].mxu0  ;;  %v15836_v41 = vadd.f32 %v11897_v22, %v15783_v51 }
 0x879   : > { %v15839_v8 = vadd.f32 %v15783_v51, %v8275_v48 }
 0x87a   : > { %v8474_v10 = vadd.f32 %v8473_v61, %v8472_v63  ;;  %v8477_v27 = vsel %vm4187_vm6, %v15836_v41, 0.0 }
 0x87b   : > { %v8475_v31 = vsel %vm4187_vm6, %v15839_v8, 0.0  ;;  %v11900_v38 = vpop.f32.mrb[30].mxu0 }
 0x87c   : > { %v8476_v35 = vadd.f32 %v8475_v31, %v8474_v10  ;;  %v8285_v37 = vpop.f32.mrb[31].mxu0  ;;  %v15846_v19 = vadd.f32 %v11900_v38, %v15783_v51 }
 0x87d   : > { %v15849_v18 = vadd.f32 %v15783_v51, %v8285_v37 }
 0x87e   : > { %v8478_v28 = vadd.f32 %v8477_v27, %v8476_v35  ;;  %v8481_v40 = vsel %vm4187_vm6, %v15846_v19, 0.0 }
 0x87f   : > { %v8479_v9 = vsel %vm4187_vm6, %v15849_v18, 0.0  ;;  %v11903_v16 = vpop.f32.mrb[32].mxu0 }
 0x880   : > { %v8480_v55 = vadd.f32 %v8479_v9, %v8478_v28  ;;  %v8295_v62 = vpop.f32.mrb[33].mxu0  ;;  %v15856_v53 = vadd.f32 %v11903_v16, %v15783_v51 }
 0x881   : > { %v15859_v12 = vadd.f32 %v15783_v51, %v8295_v62 }
 0x882   : > { %v8482_v25 = vadd.f32 %v8481_v40, %v8480_v55  ;;  %v8485_v52 = vsel %vm4187_vm6, %v15856_v53, 0.0 }
 0x883   : > { %v8483_v57 = vsel %vm4187_vm6, %v15859_v12, 0.0  ;;  %v11906_v1 = vpop.f32.mrb[34].mxu0 }
 0x884   : > { %v8484_v30 = vadd.f32 %v8483_v57, %v8482_v25  ;;  %v8305_v33 = vpop.f32.mrb[35].mxu0  ;;  %v15866_v44 = vadd.f32 %v11906_v1, %v15783_v51 }
 0x885   : > { %v15869_v6 = vadd.f32 %v15783_v51, %v8305_v33 }
 0x886   : > { %v8486_v43 = vadd.f32 %v8485_v52, %v8484_v30  ;;  %v8489_v4 = vsel %vm4187_vm6, %v15866_v44, 0.0 }
 0x887   : > { %v8487_v20 = vsel %vm4187_vm6, %v15869_v6, 0.0  ;;  %v11909_v17 = vpop.f32.mrb[36].mxu0 }
 0x888   : > { %v8488_v47 = vadd.f32 %v8487_v20, %v8486_v43  ;;  %v8315_v59 = vpop.f32.mrb[37].mxu0  ;;  %v15876_v7 = vadd.f32 %v11909_v17, %v15783_v51 }
 0x889   : > { %v15879_v23 = vadd.f32 %v15783_v51, %v8315_v59 }
 0x88a   : > { %v8490_v0 = vadd.f32 %v8489_v4, %v8488_v47  ;;  %v8493_v56 = vsel %vm4187_vm6, %v15876_v7, 0.0 }
 0x88b   : > { %v8491_v34 = vsel %vm4187_vm6, %v15879_v23, 0.0  ;;  %v11912_v58 = vpop.f32.mrb[38].mxu0 }
 0x88c   : > { %v8492_v11 = vadd.f32 %v8491_v34, %v8490_v0  ;;  %v8325_v29 = vpop.f32.mrb[39].mxu0  ;;  %v15886_v26 = vadd.f32 %v11912_v58, %v15783_v51 }
 0x88d   : > { %v15889_v2 = vadd.f32 %v15783_v51, %v8325_v29 }
 0x88e   : > { %v8494_v21 = vadd.f32 %v8493_v56, %v8492_v11  ;;  %v8497_v60 = vsel %vm4187_vm6, %v15886_v26, 0.0 }
 0x88f   : > { %v8495_v50 = vsel %vm4187_vm6, %v15889_v2, 0.0  ;;  %v11915_v49 = vpop.f32.mrb[40].mxu0 }
 0x890   : > { %v8496_v15 = vadd.f32 %v8495_v50, %v8494_v21  ;;  %v8335_v13 = vpop.f32.mrb[41].mxu0  ;;  %v15896_v42 = vadd.f32 %v11915_v49, %v15783_v51 }
 0x891   : > { %v15899_v22 = vadd.f32 %v15783_v51, %v8335_v13 }
 0x892   : > { %v8498_v63 = vadd.f32 %v8497_v60, %v8496_v15  ;;  %v8501_v38 = vsel %vm4187_vm6, %v15896_v42, 0.0 }
 0x893   : > { %v8499_v48 = vsel %vm4187_vm6, %v15899_v22, 0.0  ;;  %v11918_v61 = vpop.f32.mrb[42].mxu0 }
 0x894   : > { %v8500_v10 = vadd.f32 %v8499_v48, %v8498_v63  ;;  %v8345_v31 = vpop.f32.mrb[43].mxu0  ;;  %v15906_v35 = vadd.f32 %v11918_v61, %v15783_v51 }
 0x895   : > { %v15909_v37 = vadd.f32 %v15783_v51, %v8345_v31 }
 0x896   : > { %v8502_v27 = vadd.f32 %v8501_v38, %v8500_v10  ;;  %v8505_v62 = vsel %vm4187_vm6, %v15906_v35, 0.0 }
 0x897   : > { %v8503_v28 = vsel %vm4187_vm6, %v15909_v37, 0.0  ;;  %v11921_v9 = vpop.f32.mrb[44].mxu0 }
 0x898   : > { %v8504_v16 = vadd.f32 %v8503_v28, %v8502_v27  ;;  %v8355_v55 = vpop.f32.mrb[45].mxu0  ;;  %v15916_v40 = vadd.f32 %v11921_v9, %v15783_v51  ;;  %v17119_v27 = vld [vmem:[#allocation47_spill] sm:$0xff] }
 0x899   : > { %v15919_v25 = vadd.f32 %v15783_v51, %v8355_v55 }
 0x89a   : > { %v8506_v57 = vadd.f32 %v8505_v62, %v8504_v16  ;;  %v8509_v43 = vsel %vm4187_vm6, %v15916_v40, 0.0 }
 0x89b   : > { %v8507_v1 = vsel %vm4187_vm6, %v15919_v25, 0.0  ;;  %v11924_v30 = vpop.f32.mrb[46].mxu0 }
 0x89c   : > { %v8508_v33 = vadd.f32 %v8507_v1, %v8506_v57  ;;  %v8365_v52 = vpop.f32.mrb[47].mxu0  ;;  %v15926_v20 = vadd.f32 %v11924_v30, %v15783_v51 }
 0x89d   : > { %v15929_v17 = vadd.f32 %v15783_v51, %v8365_v52 }
 0x89e   : > { %v8510_v47 = vadd.f32 %v8509_v43, %v8508_v33  ;;  %v8513_v58 = vsel %vm4187_vm6, %v15926_v20, 0.0 }
 0x89f   : > { %v8511_v59 = vsel %vm4187_vm6, %v15929_v17, 0.0  ;;  %v11927_v4 = vpop.f32.mrb[48].mxu0 }
 0x8a0   : > { %v8512_v0 = vadd.f32 %v8511_v59, %v8510_v47  ;;  %v8375_v34 = vpop.f32.mrb[49].mxu0  ;;  %v15936_v11 = vadd.f32 %v11927_v4, %v15783_v51 }
 0x8a1   : > { %v15939_v29 = vadd.f32 %v15783_v51, %v8375_v34  ;;  %v15949_v51 = vld [vmem:[%s16773_s12] sm:$0xf] }
 0x8a2   : > { %v8514_v56 = vadd.f32 %v8513_v58, %v8512_v0  ;;  %v8517_v49 = vsel %vm4187_vm6, %v15936_v11, 0.0  ;;  %11942 = vmatprep.subr.msk.mxu1 %vm870_vm0, %v15949_v51 }
 0x8a3   : > { %v8515_v21 = vsel %vm4187_vm6, %v15939_v29, 0.0 }
 0x8a4   : > { %v8516_v50 = vadd.f32 %v8515_v21, %v8514_v56 }
 0x8a6   : > { %v8518_v15 = vadd.f32 %v8517_v49, %v8516_v50 }
 0x8a8   : > { %v8519_v13 = vrot.slane %v8518_v15, 4 }
 0x8aa   : > { %v8520_v60 = vadd.f32 %v8519_v13, %v8518_v15 }
 0x8ac   : > { %v8521_v63 = vrot.slane %v8520_v60, 2 }
 0x8ae   : > { %v8522_v48 = vadd.f32 %v8521_v63, %v8520_v60 }
 0x8b0   : > { %v8523_v61 = vrot.slane %v8522_v48, 1 }
 0x8b2   : > { %v8524_v10 = vadd.f32 %v8523_v61, %v8522_v48 }
 0x8b4   : > { %11933 = vmatmul.mubr.msk.f32.vlgmr.msra.gmra.mrb[50].mxu0 %vm4187_vm6, %v8524_v10 }
 0x987   : > { %v8594_v31 = vpop.f32.mrb[50].mxu0 }
 0x988   : > { %v11934_v38 = vpop.f32.mrb[51].mxu0  ;;  %v15954_v28 = vrot.slane %v8594_v31, %v17119_v27 }
 0x98a   : > { %v15958_v9 = vsub.f32 %v15789_v39, %v15954_v28  ;;  %v15962_v16 = vsub.f32 %v15786_v5, %v15954_v28  ;;  %v15966_v55 = vsub.f32 %v15799_v14, %v15954_v28  ;;  %v15970_v62 = vsub.f32 %v15796_v32, %v15954_v28 }
 0x98b   : > { %v15978_v39 = vsub.f32 %v15809_v45, %v15954_v28  ;;  %v15984_v14 = vsub.f32 %v15806_v3, %v15954_v28  ;;  %v15992_v43 = vsub.f32 %v15819_v46, %v15954_v28  ;;  %v15999_v3 = vsub.f32 %v15816_v36, %v15954_v28 }
 0x98c   : > { %v8634_v57 = vmul.f32 %v15958_v9, %v15958_v9  ;;  %v8635_v1 = vmul.f32 %v15962_v16, %v15962_v16  ;;  %v8636_v5 = vmul.f32 %v15966_v55, %v15966_v55  ;;  %v8637_v32 = vmul.f32 %v15970_v62, %v15970_v62 }
 0x98d   : > { %v8638_v45 = vmul.f32 %v15978_v39, %v15978_v39  ;;  %v8639_v4 = vmul.f32 %v15984_v14, %v15984_v14  ;;  %v16006_v46 = vsub.f32 %v15829_v24, %v15954_v28  ;;  %v8640_v58 = vmul.f32 %v15992_v43, %v15992_v43 }
 0x98e   : > { %v8666_v30 = vsel %vm4187_vm6, %v8634_v57, 0.0  ;;  %v8667_v33 = vsel %vm4187_vm6, %v8635_v1, 0.0  ;;  %v8669_v47 = vsel %vm4187_vm6, %v8636_v5, 0.0  ;;  %v8671_v0 = vsel %vm4187_vm6, %v8637_v32, 0.0 }
 0x98f   : > { %v8668_v52 = vadd.f32 %v8667_v33, %v8666_v30  ;;  %v8673_v56 = vsel %vm4187_vm6, %v8638_v45, 0.0  ;;  %v16013_v36 = vsub.f32 %v15826_v54, %v15954_v28  ;;  %v8641_v50 = vmul.f32 %v15999_v3, %v15999_v3 }
 0x990   : > { %v8675_v49 = vsel %vm4187_vm6, %v8639_v4, 0.0  ;;  %v16020_v24 = vsub.f32 %v15839_v8, %v15954_v28  ;;  %v8642_v13 = vmul.f32 %v16006_v46, %v16006_v46  ;;  %v8677_v60 = vsel %vm4187_vm6, %v8640_v58, 0.0 }
 0x991   : > { %v8670_v59 = vadd.f32 %v8669_v47, %v8668_v52  ;;  %v16027_v54 = vsub.f32 %v15836_v41, %v15954_v28  ;;  %v8643_v48 = vmul.f32 %v16013_v36, %v16013_v36  ;;  %v8679_v61 = vsel %vm4187_vm6, %v8641_v50, 0.0 }
 0x992   : > { %v16034_v8 = vsub.f32 %v15849_v18, %v15954_v28  ;;  %v8644_v31 = vmul.f32 %v16020_v24, %v16020_v24  ;;  %v8681_v38 = vsel %vm4187_vm6, %v8642_v13, 0.0  ;;  %v16041_v41 = vsub.f32 %v15846_v19, %v15954_v28 }
 0x993   : > { %v8672_v34 = vadd.f32 %v8671_v0, %v8670_v59  ;;  %v8645_v1 = vmul.f32 %v16027_v54, %v16027_v54  ;;  %v8683_v5 = vsel %vm4187_vm6, %v8643_v48, 0.0  ;;  %v16048_v18 = vsub.f32 %v15859_v12, %v15954_v28 }
 0x994   : > { %v8646_v30 = vmul.f32 %v16034_v8, %v16034_v8  ;;  %v8685_v33 = vsel %vm4187_vm6, %v8644_v31, 0.0  ;;  %v16055_v19 = vsub.f32 %v15856_v53, %v15954_v28  ;;  %v8647_v45 = vmul.f32 %v16041_v41, %v16041_v41 }
 0x995   : > { %v8674_v21 = vadd.f32 %v8673_v56, %v8672_v34  ;;  %v8687_v47 = vsel %vm4187_vm6, %v8645_v1, 0.0  ;;  %v16062_v12 = vsub.f32 %v15869_v6, %v15954_v28  ;;  %v8648_v4 = vmul.f32 %v16048_v18, %v16048_v18 }
 0x996   : > { %v8689_v0 = vsel %vm4187_vm6, %v8646_v30, 0.0  ;;  %v16069_v53 = vsub.f32 %v15866_v44, %v15954_v28  ;;  %v8649_v58 = vmul.f32 %v16055_v19, %v16055_v19  ;;  %v8691_v56 = vsel %vm4187_vm6, %v8647_v45, 0.0 }
 0x997   : > { %v8676_v15 = vadd.f32 %v8675_v49, %v8674_v21  ;;  %v16076_v6 = vsub.f32 %v15879_v23, %v15954_v28  ;;  %v8650_v50 = vmul.f32 %v16062_v12, %v16062_v12  ;;  %v8693_v49 = vsel %vm4187_vm6, %v8648_v4, 0.0 }
 0x998   : > { %v16083_v44 = vsub.f32 %v15876_v7, %v15954_v28  ;;  %v8651_v13 = vmul.f32 %v16069_v53, %v16069_v53  ;;  %v16090_v23 = vsub.f32 %v15889_v2, %v15954_v28  ;;  %v16097_v7 = vsub.f32 %v15886_v26, %v15954_v28 }
 0x999   : > { %v8678_v63 = vadd.f32 %v8677_v60, %v8676_v15  ;;  %v8695_v60 = vsel %vm4187_vm6, %v8649_v58, 0.0  ;;  %v8652_v48 = vmul.f32 %v16076_v6, %v16076_v6  ;;  %v16104_v2 = vsub.f32 %v15899_v22, %v15954_v28 }
 0x99a   : > { %v8653_v31 = vmul.f32 %v16083_v44, %v16083_v44  ;;  %v8654_v1 = vmul.f32 %v16090_v23, %v16090_v23  ;;  %v16111_v26 = vsub.f32 %v15896_v42, %v15954_v28  ;;  %v8655_v30 = vmul.f32 %v16097_v7, %v16097_v7 }
 0x99b   : > { %v8680_v10 = vadd.f32 %v8679_v61, %v8678_v63  ;;  %v8697_v61 = vsel %vm4187_vm6, %v8650_v50, 0.0  ;;  %v16118_v22 = vsub.f32 %v15909_v37, %v15954_v28  ;;  %v8656_v45 = vmul.f32 %v16104_v2, %v16104_v2 }
 0x99c   : > { %v16125_v42 = vsub.f32 %v15906_v35, %v15954_v28  ;;  %v8657_v4 = vmul.f32 %v16111_v26, %v16111_v26  ;;  %v16132_v37 = vsub.f32 %v15919_v25, %v15954_v28  ;;  %v16139_v35 = vsub.f32 %v15916_v40, %v15954_v28 }
 0x99d   : > { %v8682_v57 = vadd.f32 %v8681_v38, %v8680_v10  ;;  %v8699_v38 = vsel %vm4187_vm6, %v8651_v13, 0.0  ;;  %v8658_v58 = vmul.f32 %v16118_v22, %v16118_v22  ;;  %v16146_v25 = vsub.f32 %v15929_v17, %v15954_v28 }
 0x99e   : > { %v8659_v50 = vmul.f32 %v16125_v42, %v16125_v42  ;;  %v8660_v13 = vmul.f32 %v16132_v37, %v16132_v37  ;;  %v16153_v40 = vsub.f32 %v15926_v20, %v15954_v28  ;;  %v16160_v17 = vsub.f32 %v15939_v29, %v15954_v28 }
 0x99f   : > { %v8684_v32 = vadd.f32 %v8683_v5, %v8682_v57  ;;  %v8701_v5 = vsel %vm4187_vm6, %v8652_v48, 0.0  ;;  %v8661_v48 = vmul.f32 %v16139_v35, %v16139_v35  ;;  %v16167_v20 = vsub.f32 %v15936_v11, %v15954_v28 }
 0x9a0   : > { %v8664_v29 = vmul.f32 %v16160_v17, %v16160_v17 }
 0x9a1   : > { %v8686_v52 = vadd.f32 %v8685_v33, %v8684_v32  ;;  %v8703_v33 = vsel %vm4187_vm6, %v8653_v31, 0.0  ;;  %v8662_v31 = vmul.f32 %v16146_v25, %v16146_v25 }
 0x9a2   : > { %v8725_v11 = vsel %vm4187_vm6, %v8664_v29, 0.0  ;;  %v17135_v29 = vld [vmem:[#allocation13_spill] sm:$0xff] }
 0x9a3   : > { %v8688_v59 = vadd.f32 %v8687_v47, %v8686_v52  ;;  %v8705_v47 = vsel %vm4187_vm6, %v8654_v1, 0.0  ;;  %v8663_v1 = vmul.f32 %v16153_v40, %v16153_v40 }
 0x9a5   : > { %v8690_v34 = vadd.f32 %v8689_v0, %v8688_v59  ;;  %v8707_v0 = vsel %vm4187_vm6, %v8655_v30, 0.0  ;;  %v8721_v30 = vsel %vm4187_vm6, %v8662_v31, 0.0  ;;  %v17129_v31 = vld [vmem:[#allocation37_spill] sm:$0xff] }
 0x9a7   : > { %v8692_v21 = vadd.f32 %v8691_v56, %v8690_v34  ;;  %v8709_v56 = vsel %vm4187_vm6, %v8656_v45, 0.0  ;;  %v8723_v45 = vsel %vm4187_vm6, %v8663_v1, 0.0  ;;  %v17132_v1 = vld [vmem:[#allocation10_spill] sm:$0xff] }
 0x9a9   : > { %v8694_v15 = vadd.f32 %v8693_v49, %v8692_v21  ;;  %v8711_v49 = vsel %vm4187_vm6, %v8657_v4, 0.0 }
 0x9ab   : > { %v8696_v63 = vadd.f32 %v8695_v60, %v8694_v15  ;;  %v8713_v60 = vsel %vm4187_vm6, %v8658_v58, 0.0 }
 0x9ad   : > { %v8698_v10 = vadd.f32 %v8697_v61, %v8696_v63  ;;  %v8715_v61 = vsel %vm4187_vm6, %v8659_v50, 0.0 }
 0x9af   : > { %v8700_v57 = vadd.f32 %v8699_v38, %v8698_v10  ;;  %v8717_v38 = vsel %vm4187_vm6, %v8660_v13, 0.0  ;;  %v17122_v13 = vld [vmem:[#allocation30_spill] sm:$0xff] }
 0x9b1   : > { %v8702_v32 = vadd.f32 %v8701_v5, %v8700_v57  ;;  %v8719_v5 = vsel %vm4187_vm6, %v8661_v48, 0.0  ;;  %v17125_v48 = vld [vmem:[#allocation33_spill] sm:$0xff] }
 0x9b3   : > { %v8704_v52 = vadd.f32 %v8703_v33, %v8702_v32 }
 0x9b5   : > { %v8706_v59 = vadd.f32 %v8705_v47, %v8704_v52  ;;  %v8665_v52 = vmul.f32 %v16167_v20, %v16167_v20 }
 0x9b7   : > { %v8708_v34 = vadd.f32 %v8707_v0, %v8706_v59  ;;  %v8727_v59 = vsel %vm4187_vm6, %v8665_v52, 0.0  ;;  %v17138_v52 = vld [vmem:[#allocation16_spill] sm:$0xff] }
 0x9b9   : > { %v8710_v21 = vadd.f32 %v8709_v56, %v8708_v34 }
 0x9bb   : > { %v8712_v15 = vadd.f32 %v8711_v49, %v8710_v21  ;;  %v17120_v49 = vld [vmem:[#allocation28_spill] sm:$0xff] }
 0x9bd   : > { %v8714_v63 = vadd.f32 %v8713_v60, %v8712_v15  ;;  %v17121_v15 = vld [vmem:[#allocation29_spill] sm:$0xff]  ;;  %v17123_v60 = vld [vmem:[#allocation31_spill] sm:$0xff] }
 0x9bf   : > { %v8716_v10 = vadd.f32 %v8715_v61, %v8714_v63  ;;  %v17124_v63 = vld [vmem:[#allocation32_spill] sm:$0xff]  ;;  %v17126_v61 = vld [vmem:[#allocation34_spill] sm:$0xff] }
 0x9c1   : > { %v8718_v57 = vadd.f32 %v8717_v38, %v8716_v10  ;;  %v17128_v10 = vld [vmem:[#allocation36_spill] sm:$0xff] }
 0x9c2   : > { %v17130_v38 = vld [vmem:[#allocation8_spill] sm:$0xff] }
 0x9c3   : > { %v8720_v32 = vadd.f32 %v8719_v5, %v8718_v57  ;;  %v17131_v57 = vld [vmem:[#allocation9_spill] sm:$0xff]  ;;  %v17133_v5 = vld [vmem:[#allocation11_spill] sm:$0xff] }
 0x9c5   : > { %v8722_v33 = vadd.f32 %v8721_v30, %v8720_v32  ;;  %v17134_v32 = vld [vmem:[#allocation12_spill] sm:$0xff]  ;;  %v17136_v30 = vld [vmem:[#allocation14_spill] sm:$0xff] }
 0x9c7   : > { %v8724_v47 = vadd.f32 %v8723_v45, %v8722_v33  ;;  %v17137_v33 = vld [vmem:[#allocation15_spill] sm:$0xff]  ;;  %v17139_v45 = vld [vmem:[#allocation17_spill] sm:$0xff] }
 0x9c9   : > { %v8726_v28 = vadd.f32 %v8725_v11, %v8724_v47  ;;  %v17140_v47 = vld [vmem:[#allocation18_spill] sm:$0xff]  ;;  %v17141_v11 = vld [vmem:[#allocation19_spill] sm:$0xff] }
 0x9cb   : > { %v8728_v4 = vadd.f32 %v8727_v59, %v8726_v28  ;;  %v17142_v28 = vld [vmem:[#allocation20_spill] sm:$0xff]  ;;  %v17143_v59 = vld [vmem:[#allocation21_spill] sm:$0xff] }
 0x9cd   : > { %v8729_v0 = vrot.slane %v8728_v4, 4 }
 0x9cf   : > { %v8730_v34 = vadd.f32 %v8729_v0, %v8728_v4  ;;  %v17144_v4 = vld [vmem:[#allocation22_spill] sm:$0xff]  ;;  %v17145_v0 = vld [vmem:[#allocation23_spill] sm:$0xff] }
 0x9d1   : > { %v8731_v58 = vrot.slane %v8730_v34, 2 }
 0x9d3   : > { %v8732_v56 = vadd.f32 %v8731_v58, %v8730_v34  ;;  %v17146_v34 = vld [vmem:[#allocation24_spill] sm:$0xff]  ;;  %v17147_v58 = vld [vmem:[#allocation25_spill] sm:$0xff] }
 0x9d5   : > { %v8733_v21 = vrot.slane %v8732_v56, 1 }
 0x9d7   : > { %v8734_v50 = vadd.f32 %v8733_v21, %v8732_v56  ;;  %v17148_v56 = vld [vmem:[#allocation26_spill] sm:$0xff]  ;;  %v17149_v21 = vld [vmem:[#allocation27_spill] sm:$0xff] }
 0x9d9   : > { %11940 = vmatmul.mubr.msk.f32.vlgmr.msra.gmra.mrb[32].mxu1 %vm4187_vm6, %v8734_v50  ;;  %v17150_v50 = vld [vmem:[#allocation42_spill] sm:$0xff] }
 0x9da   : > { %11943 = vmatpush3.msk.msra.mxu1 %vm870_vm0, %v15949_v51  ;;  %11944 = vmatprep.mubr.msk.f32.mxu1 %vm628_vm1, %v17120_v49  ;;  %v17127_v51 = vld [vmem:[#allocation35_spill] sm:$0xff] }
 0x9db   : > { %v17151_v49 = vld [vmem:[#allocation43_spill] sm:$0xff] }
 0x9dd   : > { %11945 = vmatmul.mubr.msk.f32.vlgmr.msra.gmra.mrb[34].mxu1 %vm628_vm1, %v17121_v15 }
 0x9de   : > { %11947 = vmatprep.mubr.msk.f32.mxu1 %vm628_vm1, %v17122_v13 }
 0x9e1   : > { %11948 = vmatmul.mubr.msk.f32.gmra.mrb[36].mxu1 %vm628_vm1, %v17123_v60 }
 0x9e2   : > { %11950 = vmatprep.mubr.msk.f32.mxu1 %vm628_vm1, %v17124_v63 }
 0x9e5   : > { %11951 = vmatmul.mubr.msk.f32.gmra.mrb[38].mxu1 %vm628_vm1, %v17125_v48 }
 0x9e6   : > { %11953 = vmatprep.mubr.msk.f32.mxu1 %vm628_vm1, %v17126_v61 }
 0x9e9   : > { %11954 = vmatmul.mubr.msk.f32.gmra.mrb[40].mxu1 %vm628_vm1, %v17127_v51 }
 0x9ea   : > { %11956 = vmatprep.mubr.msk.f32.mxu1 %vm628_vm1, %v17128_v10  ;;  %v8454_v10 = vld [vmem:[%s16771_s10] sm:$0x1] }
 0x9ed   : > { %11957 = vmatmul.mubr.msk.f32.gmra.mrb[42].mxu1 %vm628_vm1, %v17129_v31 }
 0x9ee   : > { %11959 = vmatprep.mubr.msk.f32.mxu1 %vm628_vm1, %v17130_v38 }
 0x9f1   : > { %11960 = vmatmul.mubr.msk.f32.gmra.mrb[44].mxu1 %vm628_vm1, %v17131_v57 }
 0x9f2   : > { %11962 = vmatprep.mubr.msk.f32.mxu1 %vm628_vm1, %v17132_v1 }
 0x9f5   : > { %11963 = vmatmul.mubr.msk.f32.gmra.mrb[46].mxu1 %vm628_vm1, %v17133_v5 }
 0x9f6   : > { %11965 = vmatprep.mubr.msk.f32.mxu1 %vm628_vm1, %v17134_v32 }
 0x9f9   : > { %11966 = vmatmul.mubr.msk.f32.gmra.mrb[48].mxu1 %vm628_vm1, %v17135_v29 }
 0x9fa   : > { %11968 = vmatprep.mubr.msk.f32.mxu1 %vm628_vm1, %v17136_v30 }
 0x9fd   : > { %11969 = vmatmul.mubr.msk.f32.gmra.mrb[50].mxu1 %vm628_vm1, %v17137_v33 }
 0x9fe   : > { %11971 = vmatprep.mubr.msk.f32.mxu1 %vm628_vm1, %v17138_v52 }
 0xa01   : > { %11972 = vmatmul.mubr.msk.f32.gmra.mrb[52].mxu1 %vm628_vm1, %v17139_v45 }
 0xa02   : > { %11974 = vmatprep.mubr.msk.f32.mxu1 %vm628_vm1, %v17140_v47 }
 0xa05   : > { %11975 = vmatmul.mubr.msk.f32.gmra.mrb[54].mxu1 %vm628_vm1, %v17141_v11 }
 0xa06   : > { %11977 = vmatprep.mubr.msk.f32.mxu1 %vm628_vm1, %v17142_v28 }
 0xa09   : > { %11978 = vmatmul.mubr.msk.f32.gmra.mrb[56].mxu1 %vm628_vm1, %v17143_v59  ;;  %v16288_v59 = vld [vmem:[%s16772_s11] ss:$0 sm:$0xff] }
 0xa0a   : > { %11980 = vmatprep.mubr.msk.f32.mxu1 %vm628_vm1, %v17144_v4 }
 0xa0d   : > { %11981 = vmatmul.mubr.msk.f32.gmra.mrb[58].mxu1 %vm628_vm1, %v17145_v0 }
 0xa0e   : > { %11983 = vmatprep.mubr.msk.f32.mxu1 %vm628_vm1, %v17146_v34 }
 0xa11   : > { %11984 = vmatmul.mubr.msk.f32.gmra.mrb[60].mxu1 %vm628_vm1, %v17147_v58 }
 0xa12   : > { %11986 = vmatprep.mubr.msk.f32.mxu1 %vm628_vm1, %v17148_v56 }
 0xa15   : > { %11987 = vmatmul.mubr.msk.f32.gmra.mrb[62].mxu1 %vm628_vm1, %v17149_v21 }
 0xa16   : > { %11989 = vmatprep.mubr.msk.f32.mxu1 %vm628_vm1, %v17150_v50 }
 0xa19   : > { %11990 = vmatmul.mubr.msk.f32.gmra.mrb[64].mxu1 %vm628_vm1, %v17151_v49 }
 0xaac   : > { %v8804_v15 = vpop.f32.mrb[32].mxu1 }
 0xaad   : > { %v8805_v13 = vadd.f32 1e-05, %v8804_v15  ;;  %v11941_v60 = vpop.f32.mrb[33].mxu1 }
 0xaaf   : > { %12739 = vrsqrt.f32 %v8805_v13 }
 0xab0   : > { %v16247_v63 = vpop.f32.mrb[34].mxu1 }
 0xab1   : > { %v16249_v48 = vpop.f32.mrb[35].mxu1 }
 0xab4   : > { %v16251_v61 = vpop.f32.mrb[36].mxu1 }
 0xab5   : > { %v16253_v51 = vpop.f32.mrb[37].mxu1 }
 0xab8   : > { %v16258_v31 = vpop.f32.mrb[38].mxu1 }
 0xab9   : > { %v12740_v38 = vpop.eup %12739  ;;  %v16260_v57 = vpop.f32.mrb[39].mxu1 }
 0xaba   : > { %v8809_v1 = vmul.f32 %v12740_v38, %v8454_v10 }
 0xabc   : > { %v16262_v5 = vpop.f32.mrb[40].mxu1  ;;  %v16267_v29 = vrot.slane %v8809_v1, %v17119_v27 }
 0xabd   : > { %v16264_v32 = vpop.f32.mrb[41].mxu1 }
 0xabe   : > { %v8815_v52 = vmul.f32 %v16267_v29, %v15962_v16  ;;  %v8816_v45 = vmul.f32 %v16267_v29, %v15966_v55  ;;  %v8817_v47 = vmul.f32 %v16267_v29, %v15970_v62  ;;  %v8819_v11 = vmul.f32 %v16267_v29, %v15984_v14 }
 0xabf   : > { %v8818_v27 = vmul.f32 %v16267_v29, %v15978_v39  ;;  %v8821_v28 = vmul.f32 %v16267_v29, %v15999_v3  ;;  %v8820_v16 = vmul.f32 %v16267_v29, %v15992_v43  ;;  %v8822_v62 = vmul.f32 %v16267_v29, %v16006_v46 }
 0xac0   : > { %v16269_v30 = vpop.f32.mrb[42].mxu1  ;;  %v8823_v14 = vmul.f32 %v16267_v29, %v16013_v36  ;;  %v16301_v3 = vadd.f32 %v16288_v59, %v8815_v52  ;;  %v16304_v4 = vadd.f32 %v16288_v59, %v8817_v47  ;;  %v16307_v0 = vadd.f32 %v16288_v59, %v8816_v45 }
 0xac1   : > { %v16271_v33 = vpop.f32.mrb[43].mxu1  ;;  %v16310_v43 = vadd.f32 %v16288_v59, %v8819_v11  ;;  %v8824_v46 = vmul.f32 %v16267_v29, %v16020_v24  ;;  %v8825_v36 = vmul.f32 %v16267_v29, %v16027_v54  ;;  %v16317_v34 = vadd.f32 %v16288_v59, %v8818_v27  ;;  %v16357_v11 = vld [vmem:[%s16774_s13] ss:$0 sm:$0xff] }
 0xac2   : > { %v16320_v58 = vadd.f32 %v16288_v59, %v8821_v28  ;;  %v10260_v56 = vmul.f32 -1.442695, %v16301_v3  ;;  %v10262_v21 = vmul.f32 -1.442695, %v16304_v4  ;;  %v10261_v50 = vmul.f32 -1.442695, %v16307_v0 }
 0xac3   : > { %v16326_v49 = vadd.f32 %v16288_v59, %v8820_v16  ;;  %v8827_v24 = vmul.f32 %v16267_v29, %v16041_v41  ;;  %v10264_v54 = vmul.f32 -1.442695, %v16310_v43  ;;  %v16332_v15 = vadd.f32 %v16288_v59, %v8823_v14 }
 0xac4   : > { %v16292_v55 = vpop.f32.mrb[44].mxu1  ;;  %v8826_v13 = vmul.f32 %v16267_v29, %v16034_v8  ;;  %12741 = vpow2.f32 %v10260_v56  ;;  %v10263_v60 = vmul.f32 -1.442695, %v16317_v34  ;;  %v16338_v10 = vadd.f32 %v16288_v59, %v8822_v62 }
 0xac5   : > { %v16298_v39 = vpop.f32.mrb[45].mxu1  ;;  %12743 = vpow2.f32 %v10262_v21  ;;  %v10266_v1 = vmul.f32 -1.442695, %v16320_v58  ;;  %v16344_v41 = vadd.f32 %v16288_v59, %v8825_v36  ;;  %v10265_v45 = vmul.f32 -1.442695, %v16326_v49 }
 0xac6   : > { %12745 = vpow2.f32 %v10261_v50  ;;  %v16350_v8 = vadd.f32 %v16288_v59, %v8824_v46  ;;  %v10268_v27 = vmul.f32 -1.442695, %v16332_v15  ;;  %v16361_v28 = vadd.f32 %v16288_v59, %v8827_v24 }
 0xac7   : > { %12747 = vpow2.f32 %v10264_v54  ;;  %v10267_v62 = vmul.f32 -1.442695, %v16338_v10  ;;  %v16367_v14 = vadd.f32 %v16288_v59, %v8826_v13  ;;  %v10270_v46 = vmul.f32 -1.442695, %v16344_v41 }
 0xac8   : > { %v16340_v38 = vpop.f32.mrb[46].mxu1  ;;  %12749 = vpow2.f32 %v10263_v60  ;;  %v16372_v36 = vadd.f32 %v16247_v63, %v16357_v11  ;;  %v10269_v56 = vmul.f32 -1.442695, %v16350_v8  ;;  %v16379_v50 = vadd.f32 %v16251_v61, %v16357_v11 }
 0xac9   : > { %v16346_v52 = vpop.f32.mrb[47].mxu1  ;;  %12751 = vpow2.f32 %v10266_v1  ;;  %v16383_v24 = vadd.f32 %v16357_v11, %v16253_v51  ;;  %v10272_v54 = vmul.f32 -1.442695, %v16361_v28  ;;  %v16390_v63 = vadd.f32 %v16258_v31, %v16357_v11 }
 0xaca   : > { %12753 = vpow2.f32 %v10265_v45  ;;  %v16394_v60 = vadd.f32 %v16357_v11, %v16260_v57  ;;  %v10271_v61 = vmul.f32 -1.442695, %v16367_v14  ;;  %v8814_v51 = vmul.f32 %v16267_v29, %v15958_v9 }
 0xacb   : > { %12755 = vpow2.f32 %v10268_v27  ;;  %v8828_v1 = vmul.f32 %v16267_v29, %v16048_v18  ;;  %v16403_v45 = vadd.f32 %v16262_v5, %v16357_v11  ;;  %v8829_v27 = vmul.f32 %v16267_v29, %v16055_v19 }
 0xacc   : > { %v16352_v47 = vpop.f32.mrb[48].mxu1  ;;  %12757 = vpow2.f32 %v10267_v62  ;;  %v8830_v57 = vmul.f32 %v16267_v29, %v16062_v12  ;;  %v8831_v62 = vmul.f32 %v16267_v29, %v16069_v53  ;;  %v8832_v18 = vmul.f32 %v16267_v29, %v16076_v6 }
 0xacd   : > { %17152 = vst [vmem:[#allocation49_spill] sm:$0xff] %v16352_v47  ;;  %v16363_v16 = vpop.f32.mrb[49].mxu1  ;;  %12759 = vpow2.f32 %v10270_v46  ;;  %v8833_v5 = vmul.f32 %v16267_v29, %v16083_v44  ;;  %v8834_v12 = vmul.f32 %v16267_v29, %v16090_v23  ;;  %v16423_v53 = vmul.f32 %v16267_v29, %v16097_v7 }
 0xace   : > { %17153 = vst [vmem:[#allocation50_spill] sm:$0xff] %v16363_v16  ;;  %v12742_v31 = vpop.eup %12741  ;;  %12761 = vpow2.f32 %v10269_v56  ;;  %v16427_v6 = vmul.f32 %v16267_v29, %v16104_v2  ;;  %v16431_v44 = vmul.f32 %v16267_v29, %v16111_v26  ;;  %v16435_v23 = vmul.f32 %v16267_v29, %v16118_v22 }
 0xacf   : > { %v8981_v46 = vadd.f32 1.0, %v12742_v31  ;;  %12763 = vpow2.f32 %v10272_v54  ;;  %v16439_v7 = vmul.f32 %v16267_v29, %v16125_v42  ;;  %v16445_v26 = vadd.f32 %v16357_v11, %v16264_v32 }
 0xad0   : > { %v16375_v21 = vpop.f32.mrb[50].mxu1  ;;  %12765 = vpow2.f32 %v10271_v61 }
 0xad1   : > { %17154 = vst [vmem:[#allocation51_spill] sm:$0xff] %v16375_v21  ;;  %v16386_v13 = vpop.f32.mrb[51].mxu1  ;;  %12767 = vrcp.f32 %v8981_v46  ;;  %v16449_v46 = vadd.f32 %v16269_v30, %v16357_v11  ;;  %v16466_v30 = vadd.f32 %v16357_v11, %v16298_v39  ;;  %v16482_v39 = vadd.f32 %v16288_v59, %v8831_v62 }
 0xad2   : > { %17155 = vst [vmem:[#allocation52_spill] sm:$0xff] %v16386_v13  ;;  %v12744_v13 = vpop.eup %12743 }
 0xad3   : > { %v12746_v19 = vpop.eup %12745  ;;  %v8983_v56 = vadd.f32 1.0, %v12744_v13  ;;  %17164 = vst [vmem:[#allocation7_spill] sm:$0xff] %v16482_v39 }
 0xad4   : > { %v16411_v9 = vpop.f32.mrb[52].mxu1  ;;  %v8982_v54 = vadd.f32 1.0, %v12746_v19 }
 0xad5   : > { %17156 = vst [vmem:[#allocation53_spill] sm:$0xff] %v16411_v9  ;;  %v16417_v21 = vpop.f32.mrb[53].mxu1  ;;  %v12748_v9 = vpop.eup %12747  ;;  %12769 = vrcp.f32 %v8983_v56  ;;  %v16458_v56 = vadd.f32 %v16288_v59, %v8829_v27  ;;  %v16474_v27 = vadd.f32 %v16288_v59, %v8830_v57 }
 0xad6   : > { %17157 = vst [vmem:[#allocation54_spill] sm:$0xff] %v16417_v21  ;;  %v12750_v31 = vpop.eup %12749  ;;  %v8985_v13 = vadd.f32 1.0, %v12748_v9  ;;  %12771 = vrcp.f32 %v8982_v54  ;;  %v16455_v9 = vadd.f32 %v16357_v11, %v16271_v33  ;;  %v16469_v33 = vadd.f32 %v16288_v59, %v8828_v1 }
 0xad7   : > { %v12752_v2 = vpop.eup %12751  ;;  %v8984_v21 = vadd.f32 1.0, %v12750_v31  ;;  %17160 = vst [vmem:[#allocation58_spill] sm:$0xff] %v16458_v56  ;;  %v16462_v31 = vadd.f32 %v16292_v55, %v16357_v11 }
 0xad8   : > { %v16441_v61 = vpop.f32.mrb[54].mxu1  ;;  %v12754_v19 = vpop.eup %12753  ;;  %12773 = vrcp.f32 %v8985_v13  ;;  %v8987_v42 = vadd.f32 1.0, %v12752_v2 }
 0xad9   : > { %17158 = vst [vmem:[#allocation55_spill] sm:$0xff] %v16441_v61  ;;  %v16451_v22 = vpop.f32.mrb[55].mxu1  ;;  %v12756_v54 = vpop.eup %12755  ;;  %12775 = vrcp.f32 %v8984_v21  ;;  %v8986_v32 = vadd.f32 1.0, %v12754_v19 }
 0xada   : > { %17159 = vst [vmem:[#allocation56_spill] sm:$0xff] %v16451_v22  ;;  %v12758_v13 = vpop.eup %12757  ;;  %12777 = vrcp.f32 %v8987_v42  ;;  %v8989_v2 = vadd.f32 1.0, %v12756_v54  ;;  %v16479_v22 = vadd.f32 %v16288_v59, %v8814_v51  ;;  %v10274_v54 = vmul.f32 -1.442695, %v16458_v56 }
 0xadb   : > { %v12760_v21 = vpop.eup %12759  ;;  %12779 = vrcp.f32 %v8986_v32  ;;  %v8988_v19 = vadd.f32 1.0, %v12758_v13  ;;  %v16489_v13 = vadd.f32 %v16288_v59, %v8833_v5  ;;  %v16492_v51 = vadd.f32 %v16288_v59, %v8834_v12 }
 0xadc   : > { %v16471_v61 = vpop.f32.mrb[56].mxu1  ;;  %17163 = vst [vmem:[#allocation64_spill] sm:$0xff] %v16479_v22  ;;  %v12762_v42 = vpop.eup %12761  ;;  %12781 = vrcp.f32 %v8989_v2  ;;  %v8991_v1 = vadd.f32 1.0, %v12760_v21  ;;  %v10273_v2 = vmul.f32 -1.442695, %v16469_v33 }
 0xadd   : > { %17161 = vst [vmem:[#allocation59_spill] sm:$0xff] %v16471_v61  ;;  %v16476_v55 = vpop.f32.mrb[57].mxu1  ;;  %v16486_v61 = vadd.f32 %v16288_v59, %v8832_v18  ;;  %v12764_v57 = vpop.eup %12763  ;;  %12783 = vrcp.f32 %v8988_v19  ;;  %v8990_v32 = vadd.f32 1.0, %v12762_v42  ;;  %v10275_v56 = vmul.f32 -1.442695, %v16474_v27 }
 0xade   : > { %17162 = vst [vmem:[#allocation61_spill] sm:$0xff] %v16476_v55  ;;  %v12766_v55 = vpop.eup %12765  ;;  %12785 = vrcp.f32 %v8991_v1  ;;  %v8993_v62 = vadd.f32 1.0, %v12764_v57  ;;  %v10259_v19 = vmul.f32 -1.442695, %v16479_v22  ;;  %v10276_v5 = vmul.f32 -1.442695, %v16482_v39 }
 0xadf   : > { %v12768_v18 = vpop.eup %12767  ;;  %12787 = vrcp.f32 %v8990_v32  ;;  %v8992_v16 = vadd.f32 1.0, %v12766_v55  ;;  %v10277_v1 = vmul.f32 -1.442695, %v16486_v61  ;;  %v16506_v57 = vadd.f32 %v16288_v59, %v16423_v53 }
 0xae0   : > { %v16495_v21 = vpop.f32.mrb[58].mxu1  ;;  %v12770_v12 = vpop.eup %12769  ;;  %v9077_v47 = vmul.f32 %v12768_v18, %v16301_v3  ;;  %12789 = vrcp.f32 %v8993_v62  ;;  %v10278_v55 = vmul.f32 -1.442695, %v16489_v13  ;;  %v16519_v53 = vadd.f32 %v16288_v59, %v16427_v6 }
 0xae1   : > { %17165 = vst [vmem:[#allocation38_spill] sm:$0xff] %v16495_v21  ;;  %v16499_v42 = vpop.f32.mrb[59].mxu1  ;;  %v12772_v21 = vpop.eup %12771  ;;  %v9079_v32 = vmul.f32 %v12770_v12, %v16304_v4  ;;  %12791 = vrcp.f32 %v8992_v16 }
 0xae2   : > { %17166 = vst [vmem:[#allocation39_spill] sm:$0xff] %v16499_v42  ;;  %v10279_v42 = vmul.f32 -1.442695, %v16492_v51  ;;  %v12774_v22 = vpop.eup %12773  ;;  %v16512_v39 = vadd.f32 %v16372_v36, %v9077_v47  ;;  %v9078_v3 = vmul.f32 %v12772_v21, %v16307_v0  ;;  %12793 = vpow2.f32 %v10274_v54 }
 0xae3   : > { %v12776_v18 = vpop.eup %12775  ;;  %v16522_v4 = vadd.f32 %v16379_v50, %v9079_v32  ;;  %v9081_v16 = vmul.f32 %v12774_v22, %v16310_v43  ;;  %12795 = vpow2.f32 %v10273_v2  ;;  %v16529_v47 = vadd.f32 %v16288_v59, %v16431_v44 }
 0xae4   : > { %v16515_v62 = vpop.f32.mrb[60].mxu1  ;;  %v12778_v0 = vpop.eup %12777  ;;  %v16532_v36 = vadd.f32 %v16383_v24, %v9078_v3  ;;  %v9080_v6 = vmul.f32 %v12776_v18, %v16317_v34  ;;  %12797 = vpow2.f32 %v10275_v56  ;;  %v10280_v54 = vmul.f32 -1.442695, %v16506_v57 }
 0xae5   : > { %v16525_v12 = vpop.f32.mrb[61].mxu1  ;;  %v12780_v50 = vpop.eup %12779  ;;  %v16537_v21 = vadd.f32 %v16390_v63, %v9081_v16  ;;  %v9083_v43 = vmul.f32 %v12778_v0, %v16320_v58  ;;  %12799 = vpow2.f32 %v10259_v19  ;;  %v16542_v44 = vadd.f32 %v16288_v59, %v16435_v23 }
 0xae6   : > { %v12782_v22 = vpop.eup %12781  ;;  %v16545_v24 = vadd.f32 %v16394_v60, %v9080_v6  ;;  %v9082_v34 = vmul.f32 %v12780_v50, %v16326_v49  ;;  %12801 = vpow2.f32 %v10276_v5  ;;  %v16552_v63 = vadd.f32 %v16288_v59, %v16439_v7 }
 0xae7   : > { %v12784_v2 = vpop.eup %12783  ;;  %v16555_v58 = vadd.f32 %v16403_v45, %v9083_v43  ;;  %v9085_v23 = vmul.f32 %v12782_v22, %v16332_v15  ;;  %12803 = vpow2.f32 %v10277_v1  ;;  %v10281_v60 = vmul.f32 -1.442695, %v16519_v53 }
 0xae8   : > { %v16548_v56 = vpop.f32.mrb[62].mxu1  ;;  %v12786_v32 = vpop.eup %12785  ;;  %v16562_v49 = vadd.f32 %v16445_v26, %v9082_v34  ;;  %v9084_v5 = vmul.f32 %v12784_v2, %v16338_v10  ;;  %12805 = vpow2.f32 %v10278_v55  ;;  %v10282_v7 = vmul.f32 -1.442695, %v16529_v47 }
 0xae9   : > { %v16558_v19 = vpop.f32.mrb[63].mxu1  ;;  %v12788_v3 = vpop.eup %12787  ;;  %v16567_v45 = vadd.f32 %v16449_v46, %v9085_v23  ;;  %v9087_v15 = vmul.f32 %v12786_v32, %v16344_v41  ;;  %12807 = vpow2.f32 %v10279_v42  ;;  %v10283_v1 = vmul.f32 -1.442695, %v16542_v44 }
 0xaea   : > { %v12790_v18 = vpop.eup %12789  ;;  %v16572_v16 = vadd.f32 %v16455_v9, %v9084_v5  ;;  %v9086_v26 = vmul.f32 %v12788_v3, %v16350_v8  ;;  %12809 = vpow2.f32 %v10280_v54  ;;  %v10284_v10 = vmul.f32 -1.442695, %v16552_v63 }
 0xaeb   : > { %v12792_v55 = vpop.eup %12791  ;;  %v16579_v46 = vadd.f32 %v16462_v31, %v9087_v15  ;;  %v9089_v41 = vmul.f32 %v12790_v18, %v16361_v28  ;;  %v9347_v42 = vadd.f32 %v16340_v38, %v16357_v11  ;;  %12811 = vpow2.f32 %v10281_v60 }
 0xaec   : > { %v16575_v0 = vpop.f32.mrb[64].mxu1  ;;  %v12794_v9 = vpop.eup %12793  ;;  %v16587_v8 = vadd.f32 %v16466_v30, %v9086_v26  ;;  %v9088_v54 = vmul.f32 %v12792_v55, %v16367_v14  ;;  %v9342_v50 = vadd.f32 %v16357_v11, %v16346_v52  ;;  %12813 = vpow2.f32 %v10282_v7 }
 0xaed   : > { %v16584_v6 = vpop.f32.mrb[65].mxu1  ;;  %v12796_v31 = vpop.eup %12795  ;;  %v16592_v43 = vadd.f32 %v9347_v42, %v9089_v41  ;;  %v8995_v28 = vadd.f32 1.0, %v12794_v9  ;;  %12815 = vpow2.f32 %v10283_v1  ;;  %v8840_v14 = vmul.f32 %v16267_v29, %v16132_v37  ;;  %v17167_v42 = vld [vmem:[#allocation49_spill] sm:$0xff] }
 0xaee   : > { %v12798_v22 = vpop.eup %12797  ;;  %v16594_v38 = vadd.f32 %v9342_v50, %v9088_v54  ;;  %v8994_v34 = vadd.f32 1.0, %v12796_v31  ;;  %12817 = vpow2.f32 %v10284_v10  ;;  %v8841_v32 = vmul.f32 %v16267_v29, %v16139_v35  ;;  %v17168_v50 = vld [vmem:[#allocation50_spill] sm:$0xff] }
 0xaef   : > { %v12800_v2 = vpop.eup %12799  ;;  %12819 = vrcp.f32 %v8995_v28  ;;  %v8996_v30 = vadd.f32 1.0, %v12798_v22  ;;  %v8842_v3 = vmul.f32 %v16267_v29, %v16146_v25  ;;  %v16604_v15 = vadd.f32 %v16357_v11, %v16249_v48  ;;  %v17169_v22 = vld [vmem:[#allocation51_spill] sm:$0xff] }
 0xaf0   : > { %v12802_v23 = vpop.eup %12801  ;;  %12821 = vrcp.f32 %v8994_v34  ;;  %v8980_v52 = vadd.f32 1.0, %v12800_v2  ;;  %v8843_v37 = vmul.f32 %v16267_v29, %v16153_v40  ;;  %v8844_v26 = vmul.f32 %v16267_v29, %v16160_v17 }
 0xaf1   : > { %v12804_v60 = vpop.eup %12803  ;;  %12823 = vrcp.f32 %v8996_v30  ;;  %v8997_v5 = vadd.f32 1.0, %v12802_v23  ;;  %v8845_v55 = vmul.f32 %v16267_v29, %v16167_v20  ;;  %v16613_v48 = vadd.f32 %v16288_v59, %v8840_v14 }
 0xaf2   : > { %v12806_v7 = vpop.eup %12805  ;;  %12825 = vrcp.f32 %v8980_v52  ;;  %v8998_v1 = vadd.f32 1.0, %v12804_v60  ;;  %v9357_v9 = vadd.f32 %v17167_v42, %v16357_v11  ;;  %v16618_v54 = vadd.f32 %v16288_v59, %v8841_v32  ;;  %v17172_v42 = vld [vmem:[#allocation54_spill] sm:$0xff] }
 0xaf3   : > { %v12808_v18 = vpop.eup %12807  ;;  %12827 = vrcp.f32 %v8997_v5  ;;  %v8999_v35 = vadd.f32 1.0, %v12806_v7  ;;  %v9352_v31 = vadd.f32 %v16357_v11, %v17168_v50  ;;  %v16623_v29 = vadd.f32 %v16288_v59, %v8842_v3 }
 0xaf4   : > { %v12810_v10 = vpop.eup %12809  ;;  %12829 = vrcp.f32 %v8998_v1  ;;  %v9000_v25 = vadd.f32 1.0, %v12808_v18  ;;  %v9367_v34 = vadd.f32 %v17169_v22, %v16357_v11  ;;  %v16628_v30 = vadd.f32 %v16288_v59, %v8843_v37  ;;  %v17170_v18 = vld [vmem:[#allocation58_spill] sm:$0xff] }
 0xaf5   : > { %v12812_v41 = vpop.eup %12811  ;;  %12831 = vrcp.f32 %v8999_v35  ;;  %v9001_v40 = vadd.f32 1.0, %v12810_v10  ;;  %v10285_v52 = vmul.f32 -1.442695, %v16613_v48  ;;  %v16632_v60 = vadd.f32 %v16288_v59, %v8844_v26  ;;  %v17171_v35 = vld [vmem:[#allocation52_spill] sm:$0xff] }
 0xaf6   : > { %v12814_v17 = vpop.eup %12813  ;;  %12833 = vrcp.f32 %v9000_v25  ;;  %v9002_v20 = vadd.f32 1.0, %v12812_v41  ;;  %v10286_v7 = vmul.f32 -1.442695, %v16618_v54  ;;  %v16636_v3 = vadd.f32 %v16288_v59, %v8845_v55 }
 0xaf7   : > { %v12816_v28 = vpop.eup %12815  ;;  %12835 = vrcp.f32 %v9001_v40  ;;  %v9003_v2 = vadd.f32 1.0, %v12814_v17  ;;  %v9362_v10 = vadd.f32 %v16357_v11, %v17171_v35  ;;  %v10287_v25 = vmul.f32 -1.442695, %v16623_v29 }
 0xaf8   : > { %v12818_v23 = vpop.eup %12817  ;;  %12837 = vrcp.f32 %v9002_v20  ;;  %v9004_v14 = vadd.f32 1.0, %v12816_v28  ;;  %v9372_v40 = vadd.f32 %v16357_v11, %v17172_v42  ;;  %v10288_v17 = vmul.f32 -1.442695, %v16628_v30 }
 0xaf9   : > { %v12820_v32 = vpop.eup %12819  ;;  %12839 = vrcp.f32 %v9003_v2  ;;  %v9005_v5 = vadd.f32 1.0, %v12818_v23  ;;  %v10289_v20 = vmul.f32 -1.442695, %v16632_v60  ;;  %v17173_v2 = vld [vmem:[#allocation64_spill] sm:$0xff] }
 0xafa   : > { %v12822_v1 = vpop.eup %12821  ;;  %v9091_v37 = vmul.f32 %v12820_v32, %v17170_v18  ;;  %12841 = vrcp.f32 %v9004_v14  ;;  %v17174_v32 = vld [vmem:[#allocation53_spill] sm:$0xff] }
 0xafb   : > { %v12824_v41 = vpop.eup %12823  ;;  %v9090_v26 = vmul.f32 %v12822_v1, %v16469_v33  ;;  %12843 = vrcp.f32 %v9005_v5  ;;  %v10290_v33 = vmul.f32 -1.442695, %v16636_v3  ;;  %v9377_v5 = vadd.f32 %v17174_v32, %v16357_v11  ;;  %v17180_v32 = vld [vmem:[#allocation39_spill] sm:$0xff] }
 0xafc   : > { %v12826_v59 = vpop.eup %12825  ;;  %v16646_v55 = vadd.f32 %v9357_v9, %v9091_v37  ;;  %v9092_v50 = vmul.f32 %v12824_v41, %v16474_v27  ;;  %12845 = vpow2.f32 %v10285_v52  ;;  %v17175_v9 = vld [vmem:[#allocation7_spill] sm:$0xff]  ;;  %v17176_v52 = vld [vmem:[#allocation56_spill] sm:$0xff] }
 0xafd   : > { %v12828_v28 = vpop.eup %12827  ;;  %v16650_v22 = vadd.f32 %v9352_v31, %v9090_v26  ;;  %v9076_v23 = vmul.f32 %v12826_v59, %v17173_v2  ;;  %12847 = vpow2.f32 %v10286_v7  ;;  %v9382_v37 = vadd.f32 %v16357_v11, %v17176_v52  ;;  %v17177_v41 = vld [vmem:[#allocation55_spill] sm:$0xff] }
 0xafe   : > { %v12830_v14 = vpop.eup %12829  ;;  %v9456_v1 = vadd.f32 %v9362_v10, %v9092_v50  ;;  %v9093_v18 = vmul.f32 %v12828_v28, %v17175_v9  ;;  %12849 = vpow2.f32 %v10287_v25  ;;  %v9387_v26 = vadd.f32 %v17177_v41, %v16357_v11  ;;  %v17178_v25 = vld [vmem:[#allocation61_spill] sm:$0xff] }
 0xaff   : > { %v12832_v27 = vpop.eup %12831  ;;  %v9440_v31 = vadd.f32 %v16604_v15, %v9076_v23  ;;  %v9094_v35 = vmul.f32 %v12830_v14, %v16486_v61  ;;  %12851 = vpow2.f32 %v10288_v17  ;;  %v9392_v50 = vadd.f32 %v16357_v11, %v17178_v25  ;;  %v17179_v17 = vld [vmem:[#allocation59_spill] sm:$0xff] }
 0xb00   : > { %v12834_v7 = vpop.eup %12833  ;;  %9504 = vxpose.xlu1.b32.start [1/16] (narrow) %v9456_v1, 16  ;;  %v9457_v42 = vadd.f32 %v9367_v34, %v9093_v18  ;;  %v9095_v10 = vmul.f32 %v12832_v27, %v16489_v13  ;;  %12853 = vpow2.f32 %v10289_v20  ;;  %v9397_v2 = vadd.f32 %v17179_v17, %v16357_v11 }
 0xb01   : > { %v12836_v59 = vpop.eup %12835  ;;  %9472 = vxpose.xlu0.b32.start [1/16] (narrow) %v9440_v31, 16  ;;  %v9458_v28 = vadd.f32 %v9372_v40, %v9094_v35  ;;  %v9096_v15 = vmul.f32 %v12834_v7, %v16492_v51  ;;  %12855 = vpow2.f32 %v10290_v33  ;;  %v9402_v13 = vadd.f32 %v16357_v11, %v17180_v32  ;;  %v17181_v40 = vld [vmem:[#allocation38_spill] sm:$0xff] }
 0xb02   : > { %v12838_v61 = vpop.eup %12837  ;;  %v9459_v23 = vadd.f32 %v9377_v5, %v9095_v10  ;;  %v9097_v14 = vmul.f32 %v12836_v59, %v16506_v57  ;;  %v9407_v18 = vadd.f32 %v17181_v40, %v16357_v11 }
 0xb03   : > { %v12840_v34 = vpop.eup %12839  ;;  %v9460_v20 = vadd.f32 %v9382_v37, %v9096_v15  ;;  %v9098_v1 = vmul.f32 %v12838_v61, %v16519_v53  ;;  %v9422_v61 = vadd.f32 %v16357_v11, %v16558_v19  ;;  %v9437_v19 = vadd.f32 %v16575_v0, %v16357_v11 }
 0xb04   : > { %v12842_v9 = vpop.eup %12841  ;;  %9505 = vxpose.xlu1.b32.cont [2/16] (narrow) %v9457_v42, 16  ;;  %v9461_v51 = vadd.f32 %v9387_v26, %v9097_v14  ;;  %v9099_v33 = vmul.f32 %v12840_v34, %v16529_v47 }
 0xb05   : > { %v12844_v27 = vpop.eup %12843  ;;  %9473 = vxpose.xlu0.b32.cont [2/16] (narrow) %v16512_v39, 16  ;;  %v9462_v5 = vadd.f32 %v9392_v50, %v9098_v1  ;;  %v9100_v57 = vmul.f32 %v12842_v9, %v16542_v44 }
 0xb06   : > { %v12846_v52 = vpop.eup %12845  ;;  %v9463_v31 = vadd.f32 %v9397_v2, %v9099_v33  ;;  %v9101_v37 = vmul.f32 %v12844_v27, %v16552_v63  ;;  %v9427_v2 = vadd.f32 %v16548_v56, %v16357_v11 }
 0xb07   : > { %v12848_v35 = vpop.eup %12847  ;;  %v9464_v53 = vadd.f32 %v9402_v13, %v9100_v57  ;;  %v9006_v7 = vadd.f32 1.0, %v12846_v52 }
 0xb08   : > { %v12850_v41 = vpop.eup %12849  ;;  %9506 = vxpose.xlu1.b32.cont [3/16] (narrow) %v9458_v28, 16  ;;  %v9465_v10 = vadd.f32 %v9407_v18, %v9101_v37  ;;  %v9007_v42 = vadd.f32 1.0, %v12848_v35  ;;  %v9417_v28 = vadd.f32 %v16515_v62, %v16357_v11 }
 0xb09   : > { %v12852_v26 = vpop.eup %12851  ;;  %9474 = vxpose.xlu0.b32.cont [3/16] (narrow) %v16532_v36, 16  ;;  %12857 = vrcp.f32 %v9006_v7  ;;  %v9008_v47 = vadd.f32 1.0, %v12850_v41  ;;  %v9412_v36 = vadd.f32 %v16357_v11, %v16525_v12 }
 0xb0a   : > { %v12854_v39 = vpop.eup %12853  ;;  %12859 = vrcp.f32 %v9007_v42  ;;  %v9009_v59 = vadd.f32 1.0, %v12852_v26 }
 0xb0b   : > { %v12856_v44 = vpop.eup %12855  ;;  %12861 = vrcp.f32 %v9008_v47  ;;  %v9010_v25 = vadd.f32 1.0, %v12854_v39 }
 0xb0c   : > { %9507 = vxpose.xlu1.b32.cont [4/16] (narrow) %v9459_v23, 16  ;;  %12863 = vrcp.f32 %v9009_v59  ;;  %v9011_v63 = vadd.f32 1.0, %v12856_v44  ;;  %v9432_v23 = vadd.f32 %v16357_v11, %v16584_v6 }
 0xb0d   : > { %9475 = vxpose.xlu0.b32.cont [4/16] (narrow) %v16522_v4, 16  ;;  %12865 = vrcp.f32 %v9010_v25 }
 0xb0e   : > { %12867 = vrcp.f32 %v9011_v63 }
 0xb10   : > { %9508 = vxpose.xlu1.b32.cont [5/16] (narrow) %v9460_v20, 16 }
 0xb11   : > { %9476 = vxpose.xlu0.b32.cont [5/16] (narrow) %v16545_v24, 16 }
 0xb13   : > { %v12858_v50 = vpop.eup %12857 }
 0xb14   : > { %v12860_v15 = vpop.eup %12859  ;;  %9509 = vxpose.xlu1.b32.cont [6/16] (narrow) %v9461_v51, 16  ;;  %v9102_v17 = vmul.f32 %v12858_v50, %v16613_v48 }
 0xb15   : > { %v12862_v4 = vpop.eup %12861  ;;  %9477 = vxpose.xlu0.b32.cont [6/16] (narrow) %v16537_v21, 16  ;;  %v9103_v24 = vmul.f32 %v12860_v15, %v16618_v54 }
 0xb16   : > { %v12864_v12 = vpop.eup %12863  ;;  %v9466_v62 = vadd.f32 %v9412_v36, %v9102_v17  ;;  %v9104_v14 = vmul.f32 %v12862_v4, %v16623_v29 }
 0xb17   : > { %v12866_v34 = vpop.eup %12865  ;;  %v9467_v48 = vadd.f32 %v9417_v28, %v9103_v24  ;;  %v9105_v32 = vmul.f32 %v12864_v12, %v16628_v30 }
 0xb18   : > { %v12868_v13 = vpop.eup %12867  ;;  %9510 = vxpose.xlu1.b32.cont [7/16] (narrow) %v9462_v5, 16  ;;  %v9468_v56 = vadd.f32 %v9422_v61, %v9104_v14  ;;  %v9106_v21 = vmul.f32 %v12866_v34, %v16632_v60 }
 0xb19   : > { %9478 = vxpose.xlu0.b32.cont [7/16] (narrow) %v16562_v49, 16  ;;  %v9469_v54 = vadd.f32 %v9427_v2, %v9105_v32  ;;  %v9107_v6 = vmul.f32 %v12868_v13, %v16636_v3 }
 0xb1a   : > { %v9470_v20 = vadd.f32 %v9432_v23, %v9106_v21 }
 0xb1b   : > { %v9471_v1 = vadd.f32 %v9437_v19, %v9107_v6 }
 0xb1c   : > { %9511 = vxpose.xlu1.b32.cont [8/16] (narrow) %v9463_v31, 16 }
 0xb1d   : > { %9479 = vxpose.xlu0.b32.cont [8/16] (narrow) %v16555_v58, 16 }
 0xb20   : > { %9512 = vxpose.xlu1.b32.cont [9/16] (narrow) %v9464_v53, 16 }
 0xb21   : > { %9480 = vxpose.xlu0.b32.cont [9/16] (narrow) %v16572_v16, 16 }
 0xb24   : > { %9513 = vxpose.xlu1.b32.cont [10/16] (narrow) %v9465_v10, 16 }
 0xb25   : > { %9481 = vxpose.xlu0.b32.cont [10/16] (narrow) %v16567_v45, 16 }
 0xb28   : > { %9514 = vxpose.xlu1.b32.cont [11/16] (narrow) %v9466_v62, 16 }
 0xb29   : > { %9482 = vxpose.xlu0.b32.cont [11/16] (narrow) %v16587_v8, 16 }
 0xb2c   : > { %9515 = vxpose.xlu1.b32.cont [12/16] (narrow) %v9467_v48, 16 }
 0xb2d   : > { %9483 = vxpose.xlu0.b32.cont [12/16] (narrow) %v16579_v46, 16 }
 0xb30   : > { %9516 = vxpose.xlu1.b32.cont [13/16] (narrow) %v9468_v56, 16 }
 0xb31   : > { %9484 = vxpose.xlu0.b32.cont [13/16] (narrow) %v16594_v38, 16 }
 0xb34   : > { %9517 = vxpose.xlu1.b32.cont [14/16] (narrow) %v9469_v54, 16 }
 0xb35   : > { %9485 = vxpose.xlu0.b32.cont [14/16] (narrow) %v16592_v43, 16 }
 0xb38   : > { %9518 = vxpose.xlu1.b32.cont [15/16] (narrow) %v9470_v20, 16 }
 0xb39   : > { %9486 = vxpose.xlu0.b32.cont [15/16] (narrow) %v16650_v22, 16 }
 0xb3c   : > { %9519 = vxpose.xlu1.b32.end [16/16] (narrow) %v9471_v1, 16 }
 0xb3d   : > { %9487 = vxpose.xlu0.b32.end [16/16] (narrow) %v16646_v55, 16 }
 0xb80   : > { %v9520_v11 = vpop.trf.xlu1 }
 0xb81   : > { %9537 = vst [vmem:[%s498_s30 + $0x8] sm:$0xff] %v9520_v11  ;;  %v9488_v58 = vpop.trf.xlu0 }
 0xb82   : > { %9536 = vst [vmem:[%s498_s30] sm:$0xff] %v9488_v58 }
 0xb84   : > { %v9521_v49 = vpop.trf.xlu1 }
 0xb85   : > { %9539 = vst [vmem:[%s498_s30 + $0x18] sm:$0xff] %v9521_v49  ;;  %v9489_v45 = vpop.trf.xlu0 }
 0xb86   : > { %9538 = vst [vmem:[%s498_s30 + $0x10] sm:$0xff] %v9489_v45 }
 0xb87   : > { %12882 = shalt.err (!%p12879_p3)
}
 0xb88   : > { %s12883_s23 = scalar_lea.hbm %s16718_s1, 512  ;;  %s12887_s25 = scalar_lea.hbm %s16776_s15, 1024 }
 0xb89   : > { %p12884_p4 = scmp.ne.s32.totalorder %s16718_s1, %s12883_s23  ;;  %p12888_p9 = scmp.lt.u32.totalorder %s16718_s1, %s16776_s15 }
 0xb8a   : > { %p12889_p10 = scmp.lt.u32.totalorder %s12887_s25, %s12883_s23  ;;  %p12891_p12 = scmp.lt.u32.totalorder %s12883_s23, %s16718_s1 }
 0xb8b   : > { %p12885_p7 = pnand %p12884_p4, %p13058_p5 }
 0xb8c   : > { %p12890_p11 = por %p12889_p10, %p12888_p9 }
 0xb8d   : > { %p12886_p8 = pneg %p12885_p7 }
 0xb8e   : > { %p12892_p13 = por %p12891_p12, %p12890_p11 }
 0xb90   : > { %p12893_p0 = pnand %p12892_p13, %p12886_p8 }
 0xb92   : > { %12896 = shalt.err (!%p12893_p0)
}
 0xb93   : > { %s12938_s2 = smov 256   ;;  %s12939_s4 = smov 16  }
 0xb94   : > { %12560 = dma.vmem_to_hbm [thread:$0]  (%p13058_p5), %s16713_s16, 512, %s16718_s1, %s16720_s26, %s12938_s2, %s12938_s2, %s12939_s4  }
 0xb95 PF: > { %p12566_p1 = scmp.ge.s32.totalorder %s12931_s21, 2  ;;  %s9569_s22 = sand.u32 1, %s12919_s18  }
 0xb96   : > { %s9570_s23 = scalar_lea.sflag [#allocation5], %s9569_s22 }
 0xb97   : > { %p12563_p2 = pnand %p12566_p1, %p13062_p6 }
 0xb99   : > { %12914 = dma.done.wait (!%p12563_p2), %s9570_s23, 512  }
 0xb9a   : > { %12916 = vsyncadd (!%p12563_p2), %s9570_s23, 4294966784  ;;  %p25_p3 = scmp.ge.s32.totalorder %s13045_s24, 4   ;;  %s17182_s18 = smov %s12923_s19 }
 0xb9b   : > { %s17183_s19 = smov %s12927_s20  ;;  %s17184_s20 = smov %s13056_s27 }
 0xb9c   : > { %s17185_s21 = smov %s13045_s24  ;;  %27 = sbr.rel (!%p25_p3) target bundleno = 9 (0x9), region = 124 }
 0xba3   :  { %9575 = vsyncpa [#allocation5], 1 }
 0xba4   :  { %9577 = vsyncpa [#allocation5 + $0x1], 1 }

</bundles_post_ra>
